<compile_context>
chip_gen: v5e
topology: v5e:2x2
jax: 0.10.0
libtpu: 0.0.40
codegen_flags: <defaults>
</compile_context>

<pallas_src>
import functools

import jax
import jax.numpy as jnp
import numpy as np
from jax.experimental import pallas as pl
from jax.experimental.pallas import tpu as pltpu

NUM_CLASSES = 10
KOUT = NUM_CLASSES + 1     # fc output channels (CTC blank included)
KPAD = 128                 # lane-dense padded fc output width


# ------------------------------ fused kernel -------------------------------
def _fused_forward_kernel(xpad_ref, w1_ref, b1_ref, w2_ref, b2_ref,
                          wfc_ref, bfc_ref, out_ref, p1_ref, o2_ref,
                          *, n_batch, h_in, w2_width, c1, c2):
    NW = n_batch * w2_width        # rows of every slab, ordered w2*N + n
    H1 = h_in                      # conv1 output height (=input H, pad=1, k=3)
    H1P = H1 // 2                  # after first (2,1) pool
    H2 = H1P                       # conv2 output height
    H2P = H2 // 2                  # after second (2,1) pool
    rows2 = H2 * NW

    # p1 slab: (H1P+2)*NW rows; first/last NW-row bands are conv2's H padding.
    p1_ref[...] = jnp.zeros_like(p1_ref)

    # Columns with w2 in {0, W2-1} are conv2's W padding -> must stay zero.
    col = jax.lax.broadcasted_iota(jnp.int32, (NW, 1), 0)
    keep = jnp.logical_and(col >= n_batch, col < (w2_width - 1) * n_batch)

    # ---- conv1 (Ci=1, kernel (3,1)) as VPU shifted multiply-adds,
    #      fused bias + ReLU + (2,1) max-pool, written into the p1 slab ------
    def conv1_row(h):              # h: conv1 output height index
        acc = None
        for dh in range(3):
            term = xpad_ref[:, pl.ds(h + dh, 1)] * w1_ref[pl.ds(dh, 1), :]
            acc = term if acc is None else acc + term
        return jnp.maximum(acc + b1_ref[...], 0.0)           # (NW, c1)

    for hp in range(H1P):
        pooled = jnp.maximum(conv1_row(2 * hp), conv1_row(2 * hp + 1))
        pooled = jnp.where(keep, pooled, 0.0)                # zero W-pad cols
        p1_ref[pl.ds((hp + 1) * NW, NW), :] = pooled

    # ---- conv2 (c1->c2, kernel (3,1)) as in-VMEM im2col MXU matmuls,
    #      one (H2*NW, c1) x (c1, c2) matmul per H tap, fused bias + ReLU ----
    acc2 = None
    for dh in range(3):
        lhs = p1_ref[pl.ds(dh * NW, rows2), :]               # shifted H tap
        rhs = w2_ref[pl.ds(dh * c1, c1), :]
        d = jnp.dot(lhs, rhs, preferred_element_type=jnp.float32)
        acc2 = d if acc2 is None else acc2 + d
    o2_ref[...] = jnp.maximum(acc2 + b2_ref[...], 0.0)       # (H2*NW, c2)

    # ---- (2,1) max-pool over H fused with fc(192 -> KOUT) on the MXU -------
    accf = None
    for hp in range(H2P):
        a = o2_ref[pl.ds((2 * hp) * NW, NW), :]
        b = o2_ref[pl.ds((2 * hp + 1) * NW, NW), :]
        p2 = jnp.maximum(a, b)                               # (NW, c2)
        d = jnp.dot(p2, wfc_ref[pl.ds(hp * c2, c2), :],
                    preferred_element_type=jnp.float32)
        accf = d if accf is None else accf + d
    out_ref[...] = (accf + bfc_ref[...]).astype(out_ref.dtype)  # lane-dense 128


# ------------------------------- wrapper ------------------------------------
def phase_two_forward(x, params):
    """Forward of PhaseTwoModelTmp / NeuralNetAudioPhaseTwo. x: (N, 1, H, T)."""
    n, ci, h, t = x.shape
    assert ci == 1 and h % 4 == 0
    c1 = params["w1"].shape[0]                # 32
    c2 = params["w2"].shape[0]                # 64
    h2p = (h // 2) // 2                       # 3
    assert c2 * h2p == params["wfc"].shape[1]
    w2w = t + 4                               # width after two pad-1 convs
    nw = n * w2w
    f32 = jnp.float32

    # One-time tiny layout prep (fused under jit): padded input slab with
    # rows = w2*N + n (== final output ordering), lanes = H padded by 1.
    x2d = x.reshape(n, h, t).transpose(2, 0, 1).reshape(t * n, h).astype(f32)
    xpad = jnp.pad(x2d, ((2 * n, 2 * n), (1, 1)))            # (NW, H+2)

    w1m = params["w1"][:, 0, :, 0].T.astype(f32)             # (3, c1)  [dh, co]
    b1m = params["b1"].reshape(1, c1).astype(f32)
    w2m = (params["w2"][:, :, :, 0].transpose(2, 1, 0)       # (3, c1, c2)
           .reshape(3 * c1, c2).astype(f32))                 # [dh*c1+ci, co]
    b2m = params["b2"].reshape(1, c2).astype(f32)
    wfcm = jnp.pad(params["wfc"].astype(f32).reshape(KOUT, c2, h2p)
                   .transpose(2, 1, 0),                      # (h2p, c2, KOUT)
                   ((0, 0), (0, 0), (0, KPAD - KOUT))).reshape(h2p * c2, KPAD)
    bfcm = jnp.pad(params["bfc"].astype(f32), (0, KPAD - KOUT)).reshape(1, KPAD)

    kernel = functools.partial(_fused_forward_kernel, n_batch=n, h_in=h,
                               w2_width=w2w, c1=c1, c2=c2)
    out2d = pl.pallas_call(
        kernel,
        out_shape=jax.ShapeDtypeStruct((nw, KPAD), f32),
        grid=(1,),
        in_specs=[
            pl.BlockSpec(xpad.shape, lambda i: (0, 0)),
            pl.BlockSpec(w1m.shape, lambda i: (0, 0)),
            pl.BlockSpec(b1m.shape, lambda i: (0, 0)),
            pl.BlockSpec(w2m.shape, lambda i: (0, 0)),
            pl.BlockSpec(b2m.shape, lambda i: (0, 0)),
            pl.BlockSpec(wfcm.shape, lambda i: (0, 0)),
            pl.BlockSpec(bfcm.shape, lambda i: (0, 0)),
        ],
        out_specs=pl.BlockSpec((nw, KPAD), lambda i: (0, 0)),
        scratch_shapes=[
            pltpu.VMEM(((h // 2 + 2) * nw, c1), f32),   # pooled conv1 (+H pad)
            pltpu.VMEM(((h // 2) * nw, c2), f32),       # conv2 + ReLU output
        ],
        compiler_params=pltpu.CompilerParams(
            dimension_semantics=("arbitrary",)),
    )(xpad, w1m, b1m, w2m, b2m, wfcm, bfcm)

    # rows already ordered (w2, n); drop the lane padding.
    return out2d.reshape(w2w, n, KPAD)[:, :, :KOUT]          # (T+4, N, 11)


# --------------------------- pure-JAX reference ----------------------------
def reference_forward(x, params):
    def conv(x, w, b):
        y = jax.lax.conv_general_dilated(
            x, w, window_strides=(1, 1), padding=((1, 1), (1, 1)),
            dimension_numbers=("NCHW", "OIHW", "NCHW"))
        return jnp.maximum(y + b[None, :, None, None], 0.0)

    def pool(x):
        N, C, H, W = x.shape
        return x.reshape(N, C, H // 2, 2, W).max(axis=3)

    x = pool(conv(x, params["w1"], params["b1"]))
    x = pool(conv(x, params["w2"], params["b2"]))
    Wf, N = x.shape[3], x.shape[0]
    xp = jnp.transpose(x, (3, 0, 1, 2)).reshape(Wf, N, -1)
    return jnp.einsum("wnf,kf->wnk", xp, params["wfc"]) + params["bfc"]


# --------------------------------- main -------------------------------------
if __name__ == "__main__":
    key = jax.random.PRNGKey(0)
    k1, k2, k3, k4, k5, k6, kx = jax.random.split(key, 7)

    params = {
        "w1": jax.random.normal(k1, (32, 1, 3, 1), jnp.float32) * 0.10,
        "b1": jax.random.normal(k2, (32,), jnp.float32) * 0.10,
        "w2": jax.random.normal(k3, (64, 32, 3, 1), jnp.float32) * 0.05,
        "b2": jax.random.normal(k4, (64,), jnp.float32) * 0.05,
        "wfc": jax.random.normal(k5, (NUM_CLASSES + 1, 192), jnp.float32) * 0.05,
        "bfc": jax.random.normal(k6, (NUM_CLASSES + 1,), jnp.float32) * 0.05,
    }

    # Input: (N=2, C=1, H=12 feature bins, W=16 time frames).  H=12 so that
    # after two (2,1) pools 64*3 = 192 matches the fc input size.
    x = jax.random.normal(kx, (2, 1, 12, 16), jnp.float32)

    fwd = jax.jit(phase_two_forward)
    out = jax.block_until_ready(fwd(x, params))
    ref = jax.block_until_ready(reference_forward(x, params))

    assert out.shape == (20, 2, NUM_CLASSES + 1), out.shape
    assert np.allclose(np.asarray(out), np.asarray(ref), atol=1e-4, rtol=1e-4), (
        "mismatch vs reference")

    print("KERNEL_OK")
</pallas_src>

<mosaic_0001>
module attributes {stable_mosaic.version = 11 : i64} {
  func.func @_fused_forward_kernel(%arg0: i32, %arg1: memref<40x14xf32, #tpu.memory_space<vmem>>, %arg2: memref<3x32xf32, #tpu.memory_space<vmem>>, %arg3: memref<1x32xf32, #tpu.memory_space<vmem>>, %arg4: memref<96x64xf32, #tpu.memory_space<vmem>>, %arg5: memref<1x64xf32, #tpu.memory_space<vmem>>, %arg6: memref<192x128xf32, #tpu.memory_space<vmem>>, %arg7: memref<1x128xf32, #tpu.memory_space<vmem>>, %arg8: memref<40x128xf32, #tpu.memory_space<vmem>>, %arg9: memref<320x32xf32, #tpu.memory_space<vmem>>, %arg10: memref<240x64xf32, #tpu.memory_space<vmem>>) attributes {dimension_semantics = [#tpu.dimension_semantics<arbitrary>], iteration_bounds = array<i64: 1>, scalar_prefetch = 0 : i64, scratch_operands = 2 : i64, tpu.core_type = #tpu.core_type<tc>, window_params = [{pipeline_mode = #tpu.pipeline_mode<synchronous>, transform_indices = @transform_0, window_bounds = array<i64: 40, 14>}, {pipeline_mode = #tpu.pipeline_mode<synchronous>, transform_indices = @transform_1, window_bounds = array<i64: 3, 32>}, {pipeline_mode = #tpu.pipeline_mode<synchronous>, transform_indices = @transform_2, window_bounds = array<i64: 1, 32>}, {pipeline_mode = #tpu.pipeline_mode<synchronous>, transform_indices = @transform_3, window_bounds = array<i64: 96, 64>}, {pipeline_mode = #tpu.pipeline_mode<synchronous>, transform_indices = @transform_4, window_bounds = array<i64: 1, 64>}, {pipeline_mode = #tpu.pipeline_mode<synchronous>, transform_indices = @transform_5, window_bounds = array<i64: 192, 128>}, {pipeline_mode = #tpu.pipeline_mode<synchronous>, transform_indices = @transform_6, window_bounds = array<i64: 1, 128>}, {pipeline_mode = #tpu.pipeline_mode<synchronous>, transform_indices = @transform_7, window_bounds = array<i64: 40, 128>}]} {
    %cst = arith.constant 0.000000e+00 : f32
    %0 = vector.broadcast %cst : f32 to vector<320x32xf32>
    %c0 = arith.constant 0 : index
    %c0_0 = arith.constant 0 : index
    %1 = vector.load %arg9[%c0, %c0_0] : memref<320x32xf32, #tpu.memory_space<vmem>>, vector<320x32xf32>
    tpu.vector_store %arg9[%c0, %c0_0], %0 {strides = array<i32>} : memref<320x32xf32, #tpu.memory_space<vmem>>, vector<320x32xf32>,
    %2 = tpu.iota {dimensions = array<i32: 0>} : vector<40x1xi32>
    %c2_i32 = arith.constant 2 : i32
    %3 = vector.broadcast %c2_i32 : i32 to vector<40x1xi32>
    %4 = arith.cmpi sge, %2, %3 : vector<40x1xi32>
    %c38_i32 = arith.constant 38 : i32
    %5 = vector.broadcast %c38_i32 : i32 to vector<40x1xi32>
    %6 = arith.cmpi slt, %2, %5 : vector<40x1xi32>
    %7 = arith.andi %4, %6 : vector<40x1xi1>
    %c0_1 = arith.constant 0 : index
    %c0_2 = arith.constant 0 : index
    %8 = vector.load %arg1[%c0_1, %c0_2] : memref<40x14xf32, #tpu.memory_space<vmem>>, vector<40x1xf32>
    %c0_3 = arith.constant 0 : index
    %c0_4 = arith.constant 0 : index
    %9 = vector.load %arg2[%c0_3, %c0_4] : memref<3x32xf32, #tpu.memory_space<vmem>>, vector<1x32xf32>
    %10 = vector.broadcast %8 : vector<40x1xf32> to vector<40x32xf32>
    %11 = vector.broadcast %9 : vector<1x32xf32> to vector<40x32xf32>
    %12 = arith.mulf %10, %11 : vector<40x32xf32>
    %c0_5 = arith.constant 0 : index
    %c1 = arith.constant 1 : index
    %13 = vector.load %arg1[%c0_5, %c1] : memref<40x14xf32, #tpu.memory_space<vmem>>, vector<40x1xf32>
    %c1_6 = arith.constant 1 : index
    %c0_7 = arith.constant 0 : index
    %14 = vector.load %arg2[%c1_6, %c0_7] : memref<3x32xf32, #tpu.memory_space<vmem>>, vector<1x32xf32>
    %15 = vector.broadcast %13 : vector<40x1xf32> to vector<40x32xf32>
    %16 = vector.broadcast %14 : vector<1x32xf32> to vector<40x32xf32>
    %17 = arith.mulf %15, %16 : vector<40x32xf32>
    %18 = arith.addf %12, %17 : vector<40x32xf32>
    %c0_8 = arith.constant 0 : index
    %c2 = arith.constant 2 : index
    %19 = vector.load %arg1[%c0_8, %c2] : memref<40x14xf32, #tpu.memory_space<vmem>>, vector<40x1xf32>
    %c2_9 = arith.constant 2 : index
    %c0_10 = arith.constant 0 : index
    %20 = vector.load %arg2[%c2_9, %c0_10] : memref<3x32xf32, #tpu.memory_space<vmem>>, vector<1x32xf32>
    %21 = vector.broadcast %19 : vector<40x1xf32> to vector<40x32xf32>
    %22 = vector.broadcast %20 : vector<1x32xf32> to vector<40x32xf32>
    %23 = arith.mulf %21, %22 : vector<40x32xf32>
    %24 = arith.addf %18, %23 : vector<40x32xf32>
    %c0_11 = arith.constant 0 : index
    %c0_12 = arith.constant 0 : index
    %25 = vector.load %arg3[%c0_11, %c0_12] : memref<1x32xf32, #tpu.memory_space<vmem>>, vector<1x32xf32>
    %26 = vector.broadcast %25 : vector<1x32xf32> to vector<40x32xf32>
    %27 = arith.addf %24, %26 : vector<40x32xf32>
    %cst_13 = arith.constant 0.000000e+00 : f32
    %28 = vector.broadcast %cst_13 : f32 to vector<40x32xf32>
    %29 = arith.maximumf %27, %28 : vector<40x32xf32>
    %c0_14 = arith.constant 0 : index
    %c1_15 = arith.constant 1 : index
    %30 = vector.load %arg1[%c0_14, %c1_15] : memref<40x14xf32, #tpu.memory_space<vmem>>, vector<40x1xf32>
    %c0_16 = arith.constant 0 : index
    %c0_17 = arith.constant 0 : index
    %31 = vector.load %arg2[%c0_16, %c0_17] : memref<3x32xf32, #tpu.memory_space<vmem>>, vector<1x32xf32>
    %32 = vector.broadcast %30 : vector<40x1xf32> to vector<40x32xf32>
    %33 = vector.broadcast %31 : vector<1x32xf32> to vector<40x32xf32>
    %34 = arith.mulf %32, %33 : vector<40x32xf32>
    %c0_18 = arith.constant 0 : index
    %c2_19 = arith.constant 2 : index
    %35 = vector.load %arg1[%c0_18, %c2_19] : memref<40x14xf32, #tpu.memory_space<vmem>>, vector<40x1xf32>
    %c1_20 = arith.constant 1 : index
    %c0_21 = arith.constant 0 : index
    %36 = vector.load %arg2[%c1_20, %c0_21] : memref<3x32xf32, #tpu.memory_space<vmem>>, vector<1x32xf32>
    %37 = vector.broadcast %35 : vector<40x1xf32> to vector<40x32xf32>
    %38 = vector.broadcast %36 : vector<1x32xf32> to vector<40x32xf32>
    %39 = arith.mulf %37, %38 : vector<40x32xf32>
    %40 = arith.addf %34, %39 : vector<40x32xf32>
    %c0_22 = arith.constant 0 : index
    %c3 = arith.constant 3 : index
    %41 = vector.load %arg1[%c0_22, %c3] : memref<40x14xf32, #tpu.memory_space<vmem>>, vector<40x1xf32>
    %c2_23 = arith.constant 2 : index
    %c0_24 = arith.constant 0 : index
    %42 = vector.load %arg2[%c2_23, %c0_24] : memref<3x32xf32, #tpu.memory_space<vmem>>, vector<1x32xf32>
    %43 = vector.broadcast %41 : vector<40x1xf32> to vector<40x32xf32>
    %44 = vector.broadcast %42 : vector<1x32xf32> to vector<40x32xf32>
    %45 = arith.mulf %43, %44 : vector<40x32xf32>
    %46 = arith.addf %40, %45 : vector<40x32xf32>
    %c0_25 = arith.constant 0 : index
    %c0_26 = arith.constant 0 : index
    %47 = vector.load %arg3[%c0_25, %c0_26] : memref<1x32xf32, #tpu.memory_space<vmem>>, vector<1x32xf32>
    %48 = vector.broadcast %47 : vector<1x32xf32> to vector<40x32xf32>
    %49 = arith.addf %46, %48 : vector<40x32xf32>
    %cst_27 = arith.constant 0.000000e+00 : f32
    %50 = vector.broadcast %cst_27 : f32 to vector<40x32xf32>
    %51 = arith.maximumf %49, %50 : vector<40x32xf32>
    %52 = arith.maximumf %29, %51 : vector<40x32xf32>
    %cst_28 = arith.constant 0.000000e+00 : f32
    %53 = vector.shape_cast %7 : vector<40x1xi1> to vector<40x1xi1>
    %54 = vector.broadcast %53 : vector<40x1xi1> to vector<40x32xi1>
    %55 = vector.broadcast %cst_28 : f32 to vector<40x32xf32>
    %56 = arith.select %54, %52, %55 : vector<40x32xi1>, vector<40x32xf32>
    %c40 = arith.constant 40 : index
    %c0_29 = arith.constant 0 : index
    %57 = vector.load %arg9[%c40, %c0_29] : memref<320x32xf32, #tpu.memory_space<vmem>>, vector<40x32xf32>
    tpu.vector_store %arg9[%c40, %c0_29], %56 {strides = array<i32>} : memref<320x32xf32, #tpu.memory_space<vmem>>, vector<40x32xf32>,
    %c0_30 = arith.constant 0 : index
    %c2_31 = arith.constant 2 : index
    %58 = vector.load %arg1[%c0_30, %c2_31] : memref<40x14xf32, #tpu.memory_space<vmem>>, vector<40x1xf32>
    %c0_32 = arith.constant 0 : index
    %c0_33 = arith.constant 0 : index
    %59 = vector.load %arg2[%c0_32, %c0_33] : memref<3x32xf32, #tpu.memory_space<vmem>>, vector<1x32xf32>
    %60 = vector.broadcast %58 : vector<40x1xf32> to vector<40x32xf32>
    %61 = vector.broadcast %59 : vector<1x32xf32> to vector<40x32xf32>
    %62 = arith.mulf %60, %61 : vector<40x32xf32>
    %c0_34 = arith.constant 0 : index
    %c3_35 = arith.constant 3 : index
    %63 = vector.load %arg1[%c0_34, %c3_35] : memref<40x14xf32, #tpu.memory_space<vmem>>, vector<40x1xf32>
    %c1_36 = arith.constant 1 : index
    %c0_37 = arith.constant 0 : index
    %64 = vector.load %arg2[%c1_36, %c0_37] : memref<3x32xf32, #tpu.memory_space<vmem>>, vector<1x32xf32>
    %65 = vector.broadcast %63 : vector<40x1xf32> to vector<40x32xf32>
    %66 = vector.broadcast %64 : vector<1x32xf32> to vector<40x32xf32>
    %67 = arith.mulf %65, %66 : vector<40x32xf32>
    %68 = arith.addf %62, %67 : vector<40x32xf32>
    %c0_38 = arith.constant 0 : index
    %c4 = arith.constant 4 : index
    %69 = vector.load %arg1[%c0_38, %c4] : memref<40x14xf32, #tpu.memory_space<vmem>>, vector<40x1xf32>
    %c2_39 = arith.constant 2 : index
    %c0_40 = arith.constant 0 : index
    %70 = vector.load %arg2[%c2_39, %c0_40] : memref<3x32xf32, #tpu.memory_space<vmem>>, vector<1x32xf32>
    %71 = vector.broadcast %69 : vector<40x1xf32> to vector<40x32xf32>
    %72 = vector.broadcast %70 : vector<1x32xf32> to vector<40x32xf32>
    %73 = arith.mulf %71, %72 : vector<40x32xf32>
    %74 = arith.addf %68, %73 : vector<40x32xf32>
    %c0_41 = arith.constant 0 : index
    %c0_42 = arith.constant 0 : index
    %75 = vector.load %arg3[%c0_41, %c0_42] : memref<1x32xf32, #tpu.memory_space<vmem>>, vector<1x32xf32>
    %76 = vector.broadcast %75 : vector<1x32xf32> to vector<40x32xf32>
    %77 = arith.addf %74, %76 : vector<40x32xf32>
    %cst_43 = arith.constant 0.000000e+00 : f32
    %78 = vector.broadcast %cst_43 : f32 to vector<40x32xf32>
    %79 = arith.maximumf %77, %78 : vector<40x32xf32>
    %c0_44 = arith.constant 0 : index
    %c3_45 = arith.constant 3 : index
    %80 = vector.load %arg1[%c0_44, %c3_45] : memref<40x14xf32, #tpu.memory_space<vmem>>, vector<40x1xf32>
    %c0_46 = arith.constant 0 : index
    %c0_47 = arith.constant 0 : index
    %81 = vector.load %arg2[%c0_46, %c0_47] : memref<3x32xf32, #tpu.memory_space<vmem>>, vector<1x32xf32>
    %82 = vector.broadcast %80 : vector<40x1xf32> to vector<40x32xf32>
    %83 = vector.broadcast %81 : vector<1x32xf32> to vector<40x32xf32>
    %84 = arith.mulf %82, %83 : vector<40x32xf32>
    %c0_48 = arith.constant 0 : index
    %c4_49 = arith.constant 4 : index
    %85 = vector.load %arg1[%c0_48, %c4_49] : memref<40x14xf32, #tpu.memory_space<vmem>>, vector<40x1xf32>
    %c1_50 = arith.constant 1 : index
    %c0_51 = arith.constant 0 : index
    %86 = vector.load %arg2[%c1_50, %c0_51] : memref<3x32xf32, #tpu.memory_space<vmem>>, vector<1x32xf32>
    %87 = vector.broadcast %85 : vector<40x1xf32> to vector<40x32xf32>
    %88 = vector.broadcast %86 : vector<1x32xf32> to vector<40x32xf32>
    %89 = arith.mulf %87, %88 : vector<40x32xf32>
    %90 = arith.addf %84, %89 : vector<40x32xf32>
    %c0_52 = arith.constant 0 : index
    %c5 = arith.constant 5 : index
    %91 = vector.load %arg1[%c0_52, %c5] : memref<40x14xf32, #tpu.memory_space<vmem>>, vector<40x1xf32>
    %c2_53 = arith.constant 2 : index
    %c0_54 = arith.constant 0 : index
    %92 = vector.load %arg2[%c2_53, %c0_54] : memref<3x32xf32, #tpu.memory_space<vmem>>, vector<1x32xf32>
    %93 = vector.broadcast %91 : vector<40x1xf32> to vector<40x32xf32>
    %94 = vector.broadcast %92 : vector<1x32xf32> to vector<40x32xf32>
    %95 = arith.mulf %93, %94 : vector<40x32xf32>
    %96 = arith.addf %90, %95 : vector<40x32xf32>
    %c0_55 = arith.constant 0 : index
    %c0_56 = arith.constant 0 : index
    %97 = vector.load %arg3[%c0_55, %c0_56] : memref<1x32xf32, #tpu.memory_space<vmem>>, vector<1x32xf32>
    %98 = vector.broadcast %97 : vector<1x32xf32> to vector<40x32xf32>
    %99 = arith.addf %96, %98 : vector<40x32xf32>
    %cst_57 = arith.constant 0.000000e+00 : f32
    %100 = vector.broadcast %cst_57 : f32 to vector<40x32xf32>
    %101 = arith.maximumf %99, %100 : vector<40x32xf32>
    %102 = arith.maximumf %79, %101 : vector<40x32xf32>
    %cst_58 = arith.constant 0.000000e+00 : f32
    %103 = vector.shape_cast %7 : vector<40x1xi1> to vector<40x1xi1>
    %104 = vector.broadcast %103 : vector<40x1xi1> to vector<40x32xi1>
    %105 = vector.broadcast %cst_58 : f32 to vector<40x32xf32>
    %106 = arith.select %104, %102, %105 : vector<40x32xi1>, vector<40x32xf32>
    %c80 = arith.constant 80 : index
    %c0_59 = arith.constant 0 : index
    %107 = vector.load %arg9[%c80, %c0_59] : memref<320x32xf32, #tpu.memory_space<vmem>>, vector<40x32xf32>
    tpu.vector_store %arg9[%c80, %c0_59], %106 {strides = array<i32>} : memref<320x32xf32, #tpu.memory_space<vmem>>, vector<40x32xf32>,
    %c0_60 = arith.constant 0 : index
    %c4_61 = arith.constant 4 : index
    %108 = vector.load %arg1[%c0_60, %c4_61] : memref<40x14xf32, #tpu.memory_space<vmem>>, vector<40x1xf32>
    %c0_62 = arith.constant 0 : index
    %c0_63 = arith.constant 0 : index
    %109 = vector.load %arg2[%c0_62, %c0_63] : memref<3x32xf32, #tpu.memory_space<vmem>>, vector<1x32xf32>
    %110 = vector.broadcast %108 : vector<40x1xf32> to vector<40x32xf32>
    %111 = vector.broadcast %109 : vector<1x32xf32> to vector<40x32xf32>
    %112 = arith.mulf %110, %111 : vector<40x32xf32>
    %c0_64 = arith.constant 0 : index
    %c5_65 = arith.constant 5 : index
    %113 = vector.load %arg1[%c0_64, %c5_65] : memref<40x14xf32, #tpu.memory_space<vmem>>, vector<40x1xf32>
    %c1_66 = arith.constant 1 : index
    %c0_67 = arith.constant 0 : index
    %114 = vector.load %arg2[%c1_66, %c0_67] : memref<3x32xf32, #tpu.memory_space<vmem>>, vector<1x32xf32>
    %115 = vector.broadcast %113 : vector<40x1xf32> to vector<40x32xf32>
    %116 = vector.broadcast %114 : vector<1x32xf32> to vector<40x32xf32>
    %117 = arith.mulf %115, %116 : vector<40x32xf32>
    %118 = arith.addf %112, %117 : vector<40x32xf32>
    %c0_68 = arith.constant 0 : index
    %c6 = arith.constant 6 : index
    %119 = vector.load %arg1[%c0_68, %c6] : memref<40x14xf32, #tpu.memory_space<vmem>>, vector<40x1xf32>
    %c2_69 = arith.constant 2 : index
    %c0_70 = arith.constant 0 : index
    %120 = vector.load %arg2[%c2_69, %c0_70] : memref<3x32xf32, #tpu.memory_space<vmem>>, vector<1x32xf32>
    %121 = vector.broadcast %119 : vector<40x1xf32> to vector<40x32xf32>
    %122 = vector.broadcast %120 : vector<1x32xf32> to vector<40x32xf32>
    %123 = arith.mulf %121, %122 : vector<40x32xf32>
    %124 = arith.addf %118, %123 : vector<40x32xf32>
    %c0_71 = arith.constant 0 : index
    %c0_72 = arith.constant 0 : index
    %125 = vector.load %arg3[%c0_71, %c0_72] : memref<1x32xf32, #tpu.memory_space<vmem>>, vector<1x32xf32>
    %126 = vector.broadcast %125 : vector<1x32xf32> to vector<40x32xf32>
    %127 = arith.addf %124, %126 : vector<40x32xf32>
    %cst_73 = arith.constant 0.000000e+00 : f32
    %128 = vector.broadcast %cst_73 : f32 to vector<40x32xf32>
    %129 = arith.maximumf %127, %128 : vector<40x32xf32>
    %c0_74 = arith.constant 0 : index
    %c5_75 = arith.constant 5 : index
    %130 = vector.load %arg1[%c0_74, %c5_75] : memref<40x14xf32, #tpu.memory_space<vmem>>, vector<40x1xf32>
    %c0_76 = arith.constant 0 : index
    %c0_77 = arith.constant 0 : index
    %131 = vector.load %arg2[%c0_76, %c0_77] : memref<3x32xf32, #tpu.memory_space<vmem>>, vector<1x32xf32>
    %132 = vector.broadcast %130 : vector<40x1xf32> to vector<40x32xf32>
    %133 = vector.broadcast %131 : vector<1x32xf32> to vector<40x32xf32>
    %134 = arith.mulf %132, %133 : vector<40x32xf32>
    %c0_78 = arith.constant 0 : index
    %c6_79 = arith.constant 6 : index
    %135 = vector.load %arg1[%c0_78, %c6_79] : memref<40x14xf32, #tpu.memory_space<vmem>>, vector<40x1xf32>
    %c1_80 = arith.constant 1 : index
    %c0_81 = arith.constant 0 : index
    %136 = vector.load %arg2[%c1_80, %c0_81] : memref<3x32xf32, #tpu.memory_space<vmem>>, vector<1x32xf32>
    %137 = vector.broadcast %135 : vector<40x1xf32> to vector<40x32xf32>
    %138 = vector.broadcast %136 : vector<1x32xf32> to vector<40x32xf32>
    %139 = arith.mulf %137, %138 : vector<40x32xf32>
    %140 = arith.addf %134, %139 : vector<40x32xf32>
    %c0_82 = arith.constant 0 : index
    %c7 = arith.constant 7 : index
    %141 = vector.load %arg1[%c0_82, %c7] : memref<40x14xf32, #tpu.memory_space<vmem>>, vector<40x1xf32>
    %c2_83 = arith.constant 2 : index
    %c0_84 = arith.constant 0 : index
    %142 = vector.load %arg2[%c2_83, %c0_84] : memref<3x32xf32, #tpu.memory_space<vmem>>, vector<1x32xf32>
    %143 = vector.broadcast %141 : vector<40x1xf32> to vector<40x32xf32>
    %144 = vector.broadcast %142 : vector<1x32xf32> to vector<40x32xf32>
    %145 = arith.mulf %143, %144 : vector<40x32xf32>
    %146 = arith.addf %140, %145 : vector<40x32xf32>
    %c0_85 = arith.constant 0 : index
    %c0_86 = arith.constant 0 : index
    %147 = vector.load %arg3[%c0_85, %c0_86] : memref<1x32xf32, #tpu.memory_space<vmem>>, vector<1x32xf32>
    %148 = vector.broadcast %147 : vector<1x32xf32> to vector<40x32xf32>
    %149 = arith.addf %146, %148 : vector<40x32xf32>
    %cst_87 = arith.constant 0.000000e+00 : f32
    %150 = vector.broadcast %cst_87 : f32 to vector<40x32xf32>
    %151 = arith.maximumf %149, %150 : vector<40x32xf32>
    %152 = arith.maximumf %129, %151 : vector<40x32xf32>
    %cst_88 = arith.constant 0.000000e+00 : f32
    %153 = vector.shape_cast %7 : vector<40x1xi1> to vector<40x1xi1>
    %154 = vector.broadcast %153 : vector<40x1xi1> to vector<40x32xi1>
    %155 = vector.broadcast %cst_88 : f32 to vector<40x32xf32>
    %156 = arith.select %154, %152, %155 : vector<40x32xi1>, vector<40x32xf32>
    %c120 = arith.constant 120 : index
    %c0_89 = arith.constant 0 : index
    %157 = vector.load %arg9[%c120, %c0_89] : memref<320x32xf32, #tpu.memory_space<vmem>>, vector<40x32xf32>
    tpu.vector_store %arg9[%c120, %c0_89], %156 {strides = array<i32>} : memref<320x32xf32, #tpu.memory_space<vmem>>, vector<40x32xf32>,
    %c0_90 = arith.constant 0 : index
    %c6_91 = arith.constant 6 : index
    %158 = vector.load %arg1[%c0_90, %c6_91] : memref<40x14xf32, #tpu.memory_space<vmem>>, vector<40x1xf32>
    %c0_92 = arith.constant 0 : index
    %c0_93 = arith.constant 0 : index
    %159 = vector.load %arg2[%c0_92, %c0_93] : memref<3x32xf32, #tpu.memory_space<vmem>>, vector<1x32xf32>
    %160 = vector.broadcast %158 : vector<40x1xf32> to vector<40x32xf32>
    %161 = vector.broadcast %159 : vector<1x32xf32> to vector<40x32xf32>
    %162 = arith.mulf %160, %161 : vector<40x32xf32>
    %c0_94 = arith.constant 0 : index
    %c7_95 = arith.constant 7 : index
    %163 = vector.load %arg1[%c0_94, %c7_95] : memref<40x14xf32, #tpu.memory_space<vmem>>, vector<40x1xf32>
    %c1_96 = arith.constant 1 : index
    %c0_97 = arith.constant 0 : index
    %164 = vector.load %arg2[%c1_96, %c0_97] : memref<3x32xf32, #tpu.memory_space<vmem>>, vector<1x32xf32>
    %165 = vector.broadcast %163 : vector<40x1xf32> to vector<40x32xf32>
    %166 = vector.broadcast %164 : vector<1x32xf32> to vector<40x32xf32>
    %167 = arith.mulf %165, %166 : vector<40x32xf32>
    %168 = arith.addf %162, %167 : vector<40x32xf32>
    %c0_98 = arith.constant 0 : index
    %c8 = arith.constant 8 : index
    %169 = vector.load %arg1[%c0_98, %c8] : memref<40x14xf32, #tpu.memory_space<vmem>>, vector<40x1xf32>
    %c2_99 = arith.constant 2 : index
    %c0_100 = arith.constant 0 : index
    %170 = vector.load %arg2[%c2_99, %c0_100] : memref<3x32xf32, #tpu.memory_space<vmem>>, vector<1x32xf32>
    %171 = vector.broadcast %169 : vector<40x1xf32> to vector<40x32xf32>
    %172 = vector.broadcast %170 : vector<1x32xf32> to vector<40x32xf32>
    %173 = arith.mulf %171, %172 : vector<40x32xf32>
    %174 = arith.addf %168, %173 : vector<40x32xf32>
    %c0_101 = arith.constant 0 : index
    %c0_102 = arith.constant 0 : index
    %175 = vector.load %arg3[%c0_101, %c0_102] : memref<1x32xf32, #tpu.memory_space<vmem>>, vector<1x32xf32>
    %176 = vector.broadcast %175 : vector<1x32xf32> to vector<40x32xf32>
    %177 = arith.addf %174, %176 : vector<40x32xf32>
    %cst_103 = arith.constant 0.000000e+00 : f32
    %178 = vector.broadcast %cst_103 : f32 to vector<40x32xf32>
    %179 = arith.maximumf %177, %178 : vector<40x32xf32>
    %c0_104 = arith.constant 0 : index
    %c7_105 = arith.constant 7 : index
    %180 = vector.load %arg1[%c0_104, %c7_105] : memref<40x14xf32, #tpu.memory_space<vmem>>, vector<40x1xf32>
    %c0_106 = arith.constant 0 : index
    %c0_107 = arith.constant 0 : index
    %181 = vector.load %arg2[%c0_106, %c0_107] : memref<3x32xf32, #tpu.memory_space<vmem>>, vector<1x32xf32>
    %182 = vector.broadcast %180 : vector<40x1xf32> to vector<40x32xf32>
    %183 = vector.broadcast %181 : vector<1x32xf32> to vector<40x32xf32>
    %184 = arith.mulf %182, %183 : vector<40x32xf32>
    %c0_108 = arith.constant 0 : index
    %c8_109 = arith.constant 8 : index
    %185 = vector.load %arg1[%c0_108, %c8_109] : memref<40x14xf32, #tpu.memory_space<vmem>>, vector<40x1xf32>
    %c1_110 = arith.constant 1 : index
    %c0_111 = arith.constant 0 : index
    %186 = vector.load %arg2[%c1_110, %c0_111] : memref<3x32xf32, #tpu.memory_space<vmem>>, vector<1x32xf32>
    %187 = vector.broadcast %185 : vector<40x1xf32> to vector<40x32xf32>
    %188 = vector.broadcast %186 : vector<1x32xf32> to vector<40x32xf32>
    %189 = arith.mulf %187, %188 : vector<40x32xf32>
    %190 = arith.addf %184, %189 : vector<40x32xf32>
    %c0_112 = arith.constant 0 : index
    %c9 = arith.constant 9 : index
    %191 = vector.load %arg1[%c0_112, %c9] : memref<40x14xf32, #tpu.memory_space<vmem>>, vector<40x1xf32>
    %c2_113 = arith.constant 2 : index
    %c0_114 = arith.constant 0 : index
    %192 = vector.load %arg2[%c2_113, %c0_114] : memref<3x32xf32, #tpu.memory_space<vmem>>, vector<1x32xf32>
    %193 = vector.broadcast %191 : vector<40x1xf32> to vector<40x32xf32>
    %194 = vector.broadcast %192 : vector<1x32xf32> to vector<40x32xf32>
    %195 = arith.mulf %193, %194 : vector<40x32xf32>
    %196 = arith.addf %190, %195 : vector<40x32xf32>
    %c0_115 = arith.constant 0 : index
    %c0_116 = arith.constant 0 : index
    %197 = vector.load %arg3[%c0_115, %c0_116] : memref<1x32xf32, #tpu.memory_space<vmem>>, vector<1x32xf32>
    %198 = vector.broadcast %197 : vector<1x32xf32> to vector<40x32xf32>
    %199 = arith.addf %196, %198 : vector<40x32xf32>
    %cst_117 = arith.constant 0.000000e+00 : f32
    %200 = vector.broadcast %cst_117 : f32 to vector<40x32xf32>
    %201 = arith.maximumf %199, %200 : vector<40x32xf32>
    %202 = arith.maximumf %179, %201 : vector<40x32xf32>
    %cst_118 = arith.constant 0.000000e+00 : f32
    %203 = vector.shape_cast %7 : vector<40x1xi1> to vector<40x1xi1>
    %204 = vector.broadcast %203 : vector<40x1xi1> to vector<40x32xi1>
    %205 = vector.broadcast %cst_118 : f32 to vector<40x32xf32>
    %206 = arith.select %204, %202, %205 : vector<40x32xi1>, vector<40x32xf32>
    %c160 = arith.constant 160 : index
    %c0_119 = arith.constant 0 : index
    %207 = vector.load %arg9[%c160, %c0_119] : memref<320x32xf32, #tpu.memory_space<vmem>>, vector<40x32xf32>
    tpu.vector_store %arg9[%c160, %c0_119], %206 {strides = array<i32>} : memref<320x32xf32, #tpu.memory_space<vmem>>, vector<40x32xf32>,
    %c0_120 = arith.constant 0 : index
    %c8_121 = arith.constant 8 : index
    %208 = vector.load %arg1[%c0_120, %c8_121] : memref<40x14xf32, #tpu.memory_space<vmem>>, vector<40x1xf32>
    %c0_122 = arith.constant 0 : index
    %c0_123 = arith.constant 0 : index
    %209 = vector.load %arg2[%c0_122, %c0_123] : memref<3x32xf32, #tpu.memory_space<vmem>>, vector<1x32xf32>
    %210 = vector.broadcast %208 : vector<40x1xf32> to vector<40x32xf32>
    %211 = vector.broadcast %209 : vector<1x32xf32> to vector<40x32xf32>
    %212 = arith.mulf %210, %211 : vector<40x32xf32>
    %c0_124 = arith.constant 0 : index
    %c9_125 = arith.constant 9 : index
    %213 = vector.load %arg1[%c0_124, %c9_125] : memref<40x14xf32, #tpu.memory_space<vmem>>, vector<40x1xf32>
    %c1_126 = arith.constant 1 : index
    %c0_127 = arith.constant 0 : index
    %214 = vector.load %arg2[%c1_126, %c0_127] : memref<3x32xf32, #tpu.memory_space<vmem>>, vector<1x32xf32>
    %215 = vector.broadcast %213 : vector<40x1xf32> to vector<40x32xf32>
    %216 = vector.broadcast %214 : vector<1x32xf32> to vector<40x32xf32>
    %217 = arith.mulf %215, %216 : vector<40x32xf32>
    %218 = arith.addf %212, %217 : vector<40x32xf32>
    %c0_128 = arith.constant 0 : index
    %c10 = arith.constant 10 : index
    %219 = vector.load %arg1[%c0_128, %c10] : memref<40x14xf32, #tpu.memory_space<vmem>>, vector<40x1xf32>
    %c2_129 = arith.constant 2 : index
    %c0_130 = arith.constant 0 : index
    %220 = vector.load %arg2[%c2_129, %c0_130] : memref<3x32xf32, #tpu.memory_space<vmem>>, vector<1x32xf32>
    %221 = vector.broadcast %219 : vector<40x1xf32> to vector<40x32xf32>
    %222 = vector.broadcast %220 : vector<1x32xf32> to vector<40x32xf32>
    %223 = arith.mulf %221, %222 : vector<40x32xf32>
    %224 = arith.addf %218, %223 : vector<40x32xf32>
    %c0_131 = arith.constant 0 : index
    %c0_132 = arith.constant 0 : index
    %225 = vector.load %arg3[%c0_131, %c0_132] : memref<1x32xf32, #tpu.memory_space<vmem>>, vector<1x32xf32>
    %226 = vector.broadcast %225 : vector<1x32xf32> to vector<40x32xf32>
    %227 = arith.addf %224, %226 : vector<40x32xf32>
    %cst_133 = arith.constant 0.000000e+00 : f32
    %228 = vector.broadcast %cst_133 : f32 to vector<40x32xf32>
    %229 = arith.maximumf %227, %228 : vector<40x32xf32>
    %c0_134 = arith.constant 0 : index
    %c9_135 = arith.constant 9 : index
    %230 = vector.load %arg1[%c0_134, %c9_135] : memref<40x14xf32, #tpu.memory_space<vmem>>, vector<40x1xf32>
    %c0_136 = arith.constant 0 : index
    %c0_137 = arith.constant 0 : index
    %231 = vector.load %arg2[%c0_136, %c0_137] : memref<3x32xf32, #tpu.memory_space<vmem>>, vector<1x32xf32>
    %232 = vector.broadcast %230 : vector<40x1xf32> to vector<40x32xf32>
    %233 = vector.broadcast %231 : vector<1x32xf32> to vector<40x32xf32>
    %234 = arith.mulf %232, %233 : vector<40x32xf32>
    %c0_138 = arith.constant 0 : index
    %c10_139 = arith.constant 10 : index
    %235 = vector.load %arg1[%c0_138, %c10_139] : memref<40x14xf32, #tpu.memory_space<vmem>>, vector<40x1xf32>
    %c1_140 = arith.constant 1 : index
    %c0_141 = arith.constant 0 : index
    %236 = vector.load %arg2[%c1_140, %c0_141] : memref<3x32xf32, #tpu.memory_space<vmem>>, vector<1x32xf32>
    %237 = vector.broadcast %235 : vector<40x1xf32> to vector<40x32xf32>
    %238 = vector.broadcast %236 : vector<1x32xf32> to vector<40x32xf32>
    %239 = arith.mulf %237, %238 : vector<40x32xf32>
    %240 = arith.addf %234, %239 : vector<40x32xf32>
    %c0_142 = arith.constant 0 : index
    %c11 = arith.constant 11 : index
    %241 = vector.load %arg1[%c0_142, %c11] : memref<40x14xf32, #tpu.memory_space<vmem>>, vector<40x1xf32>
    %c2_143 = arith.constant 2 : index
    %c0_144 = arith.constant 0 : index
    %242 = vector.load %arg2[%c2_143, %c0_144] : memref<3x32xf32, #tpu.memory_space<vmem>>, vector<1x32xf32>
    %243 = vector.broadcast %241 : vector<40x1xf32> to vector<40x32xf32>
    %244 = vector.broadcast %242 : vector<1x32xf32> to vector<40x32xf32>
    %245 = arith.mulf %243, %244 : vector<40x32xf32>
    %246 = arith.addf %240, %245 : vector<40x32xf32>
    %c0_145 = arith.constant 0 : index
    %c0_146 = arith.constant 0 : index
    %247 = vector.load %arg3[%c0_145, %c0_146] : memref<1x32xf32, #tpu.memory_space<vmem>>, vector<1x32xf32>
    %248 = vector.broadcast %247 : vector<1x32xf32> to vector<40x32xf32>
    %249 = arith.addf %246, %248 : vector<40x32xf32>
    %cst_147 = arith.constant 0.000000e+00 : f32
    %250 = vector.broadcast %cst_147 : f32 to vector<40x32xf32>
    %251 = arith.maximumf %249, %250 : vector<40x32xf32>
    %252 = arith.maximumf %229, %251 : vector<40x32xf32>
    %cst_148 = arith.constant 0.000000e+00 : f32
    %253 = vector.shape_cast %7 : vector<40x1xi1> to vector<40x1xi1>
    %254 = vector.broadcast %253 : vector<40x1xi1> to vector<40x32xi1>
    %255 = vector.broadcast %cst_148 : f32 to vector<40x32xf32>
    %256 = arith.select %254, %252, %255 : vector<40x32xi1>, vector<40x32xf32>
    %c200 = arith.constant 200 : index
    %c0_149 = arith.constant 0 : index
    %257 = vector.load %arg9[%c200, %c0_149] : memref<320x32xf32, #tpu.memory_space<vmem>>, vector<40x32xf32>
    tpu.vector_store %arg9[%c200, %c0_149], %256 {strides = array<i32>} : memref<320x32xf32, #tpu.memory_space<vmem>>, vector<40x32xf32>,
    %c0_150 = arith.constant 0 : index
    %c10_151 = arith.constant 10 : index
    %258 = vector.load %arg1[%c0_150, %c10_151] : memref<40x14xf32, #tpu.memory_space<vmem>>, vector<40x1xf32>
    %c0_152 = arith.constant 0 : index
    %c0_153 = arith.constant 0 : index
    %259 = vector.load %arg2[%c0_152, %c0_153] : memref<3x32xf32, #tpu.memory_space<vmem>>, vector<1x32xf32>
    %260 = vector.broadcast %258 : vector<40x1xf32> to vector<40x32xf32>
    %261 = vector.broadcast %259 : vector<1x32xf32> to vector<40x32xf32>
    %262 = arith.mulf %260, %261 : vector<40x32xf32>
    %c0_154 = arith.constant 0 : index
    %c11_155 = arith.constant 11 : index
    %263 = vector.load %arg1[%c0_154, %c11_155] : memref<40x14xf32, #tpu.memory_space<vmem>>, vector<40x1xf32>
    %c1_156 = arith.constant 1 : index
    %c0_157 = arith.constant 0 : index
    %264 = vector.load %arg2[%c1_156, %c0_157] : memref<3x32xf32, #tpu.memory_space<vmem>>, vector<1x32xf32>
    %265 = vector.broadcast %263 : vector<40x1xf32> to vector<40x32xf32>
    %266 = vector.broadcast %264 : vector<1x32xf32> to vector<40x32xf32>
    %267 = arith.mulf %265, %266 : vector<40x32xf32>
    %268 = arith.addf %262, %267 : vector<40x32xf32>
    %c0_158 = arith.constant 0 : index
    %c12 = arith.constant 12 : index
    %269 = vector.load %arg1[%c0_158, %c12] : memref<40x14xf32, #tpu.memory_space<vmem>>, vector<40x1xf32>
    %c2_159 = arith.constant 2 : index
    %c0_160 = arith.constant 0 : index
    %270 = vector.load %arg2[%c2_159, %c0_160] : memref<3x32xf32, #tpu.memory_space<vmem>>, vector<1x32xf32>
    %271 = vector.broadcast %269 : vector<40x1xf32> to vector<40x32xf32>
    %272 = vector.broadcast %270 : vector<1x32xf32> to vector<40x32xf32>
    %273 = arith.mulf %271, %272 : vector<40x32xf32>
    %274 = arith.addf %268, %273 : vector<40x32xf32>
    %c0_161 = arith.constant 0 : index
    %c0_162 = arith.constant 0 : index
    %275 = vector.load %arg3[%c0_161, %c0_162] : memref<1x32xf32, #tpu.memory_space<vmem>>, vector<1x32xf32>
    %276 = vector.broadcast %275 : vector<1x32xf32> to vector<40x32xf32>
    %277 = arith.addf %274, %276 : vector<40x32xf32>
    %cst_163 = arith.constant 0.000000e+00 : f32
    %278 = vector.broadcast %cst_163 : f32 to vector<40x32xf32>
    %279 = arith.maximumf %277, %278 : vector<40x32xf32>
    %c0_164 = arith.constant 0 : index
    %c11_165 = arith.constant 11 : index
    %280 = vector.load %arg1[%c0_164, %c11_165] : memref<40x14xf32, #tpu.memory_space<vmem>>, vector<40x1xf32>
    %c0_166 = arith.constant 0 : index
    %c0_167 = arith.constant 0 : index
    %281 = vector.load %arg2[%c0_166, %c0_167] : memref<3x32xf32, #tpu.memory_space<vmem>>, vector<1x32xf32>
    %282 = vector.broadcast %280 : vector<40x1xf32> to vector<40x32xf32>
    %283 = vector.broadcast %281 : vector<1x32xf32> to vector<40x32xf32>
    %284 = arith.mulf %282, %283 : vector<40x32xf32>
    %c0_168 = arith.constant 0 : index
    %c12_169 = arith.constant 12 : index
    %285 = vector.load %arg1[%c0_168, %c12_169] : memref<40x14xf32, #tpu.memory_space<vmem>>, vector<40x1xf32>
    %c1_170 = arith.constant 1 : index
    %c0_171 = arith.constant 0 : index
    %286 = vector.load %arg2[%c1_170, %c0_171] : memref<3x32xf32, #tpu.memory_space<vmem>>, vector<1x32xf32>
    %287 = vector.broadcast %285 : vector<40x1xf32> to vector<40x32xf32>
    %288 = vector.broadcast %286 : vector<1x32xf32> to vector<40x32xf32>
    %289 = arith.mulf %287, %288 : vector<40x32xf32>
    %290 = arith.addf %284, %289 : vector<40x32xf32>
    %c0_172 = arith.constant 0 : index
    %c13 = arith.constant 13 : index
    %291 = vector.load %arg1[%c0_172, %c13] : memref<40x14xf32, #tpu.memory_space<vmem>>, vector<40x1xf32>
    %c2_173 = arith.constant 2 : index
    %c0_174 = arith.constant 0 : index
    %292 = vector.load %arg2[%c2_173, %c0_174] : memref<3x32xf32, #tpu.memory_space<vmem>>, vector<1x32xf32>
    %293 = vector.broadcast %291 : vector<40x1xf32> to vector<40x32xf32>
    %294 = vector.broadcast %292 : vector<1x32xf32> to vector<40x32xf32>
    %295 = arith.mulf %293, %294 : vector<40x32xf32>
    %296 = arith.addf %290, %295 : vector<40x32xf32>
    %c0_175 = arith.constant 0 : index
    %c0_176 = arith.constant 0 : index
    %297 = vector.load %arg3[%c0_175, %c0_176] : memref<1x32xf32, #tpu.memory_space<vmem>>, vector<1x32xf32>
    %298 = vector.broadcast %297 : vector<1x32xf32> to vector<40x32xf32>
    %299 = arith.addf %296, %298 : vector<40x32xf32>
    %cst_177 = arith.constant 0.000000e+00 : f32
    %300 = vector.broadcast %cst_177 : f32 to vector<40x32xf32>
    %301 = arith.maximumf %299, %300 : vector<40x32xf32>
    %302 = arith.maximumf %279, %301 : vector<40x32xf32>
    %cst_178 = arith.constant 0.000000e+00 : f32
    %303 = vector.shape_cast %7 : vector<40x1xi1> to vector<40x1xi1>
    %304 = vector.broadcast %303 : vector<40x1xi1> to vector<40x32xi1>
    %305 = vector.broadcast %cst_178 : f32 to vector<40x32xf32>
    %306 = arith.select %304, %302, %305 : vector<40x32xi1>, vector<40x32xf32>
    %c240 = arith.constant 240 : index
    %c0_179 = arith.constant 0 : index
    %307 = vector.load %arg9[%c240, %c0_179] : memref<320x32xf32, #tpu.memory_space<vmem>>, vector<40x32xf32>
    tpu.vector_store %arg9[%c240, %c0_179], %306 {strides = array<i32>} : memref<320x32xf32, #tpu.memory_space<vmem>>, vector<40x32xf32>,
    %c0_180 = arith.constant 0 : index
    %c0_181 = arith.constant 0 : index
    %308 = vector.load %arg9[%c0_180, %c0_181] : memref<320x32xf32, #tpu.memory_space<vmem>>, vector<240x32xf32>
    %c0_182 = arith.constant 0 : index
    %c0_183 = arith.constant 0 : index
    %309 = vector.load %arg4[%c0_182, %c0_183] : memref<96x64xf32, #tpu.memory_space<vmem>>, vector<32x64xf32>
    %cst_184 = arith.constant dense<0.000000e+00> : vector<240x64xf32>
    %310 = tpu.matmul %308, %309, %cst_184 {dimension_numbers = #tpu.dot_dimension_numbers<[1], [0], [0], [1], [0, 0, 1, 1], [], []>} : vector<240x32xf32>, vector<32x64xf32>, vector<240x64xf32> -> vector<240x64xf32>
    %c40_185 = arith.constant 40 : index
    %c0_186 = arith.constant 0 : index
    %311 = vector.load %arg9[%c40_185, %c0_186] : memref<320x32xf32, #tpu.memory_space<vmem>>, vector<240x32xf32>
    %c32 = arith.constant 32 : index
    %c0_187 = arith.constant 0 : index
    %312 = vector.load %arg4[%c32, %c0_187] : memref<96x64xf32, #tpu.memory_space<vmem>>, vector<32x64xf32>
    %cst_188 = arith.constant dense<0.000000e+00> : vector<240x64xf32>
    %313 = tpu.matmul %311, %312, %cst_188 {dimension_numbers = #tpu.dot_dimension_numbers<[1], [0], [0], [1], [0, 0, 1, 1], [], []>} : vector<240x32xf32>, vector<32x64xf32>, vector<240x64xf32> -> vector<240x64xf32>
    %314 = arith.addf %310, %313 : vector<240x64xf32>
    %c80_189 = arith.constant 80 : index
    %c0_190 = arith.constant 0 : index
    %315 = vector.load %arg9[%c80_189, %c0_190] : memref<320x32xf32, #tpu.memory_space<vmem>>, vector<240x32xf32>
    %c64 = arith.constant 64 : index
    %c0_191 = arith.constant 0 : index
    %316 = vector.load %arg4[%c64, %c0_191] : memref<96x64xf32, #tpu.memory_space<vmem>>, vector<32x64xf32>
    %cst_192 = arith.constant dense<0.000000e+00> : vector<240x64xf32>
    %317 = tpu.matmul %315, %316, %cst_192 {dimension_numbers = #tpu.dot_dimension_numbers<[1], [0], [0], [1], [0, 0, 1, 1], [], []>} : vector<240x32xf32>, vector<32x64xf32>, vector<240x64xf32> -> vector<240x64xf32>
    %318 = arith.addf %314, %317 : vector<240x64xf32>
    %c0_193 = arith.constant 0 : index
    %c0_194 = arith.constant 0 : index
    %319 = vector.load %arg5[%c0_193, %c0_194] : memref<1x64xf32, #tpu.memory_space<vmem>>, vector<1x64xf32>
    %320 = vector.broadcast %319 : vector<1x64xf32> to vector<240x64xf32>
    %321 = arith.addf %318, %320 : vector<240x64xf32>
    %cst_195 = arith.constant 0.000000e+00 : f32
    %322 = vector.broadcast %cst_195 : f32 to vector<240x64xf32>
    %323 = arith.maximumf %321, %322 : vector<240x64xf32>
    %c0_196 = arith.constant 0 : index
    %c0_197 = arith.constant 0 : index
    %324 = vector.load %arg10[%c0_196, %c0_197] : memref<240x64xf32, #tpu.memory_space<vmem>>, vector<240x64xf32>
    tpu.vector_store %arg10[%c0_196, %c0_197], %323 {strides = array<i32>} : memref<240x64xf32, #tpu.memory_space<vmem>>, vector<240x64xf32>,
    %c0_198 = arith.constant 0 : index
    %c0_199 = arith.constant 0 : index
    %325 = vector.load %arg10[%c0_198, %c0_199] : memref<240x64xf32, #tpu.memory_space<vmem>>, vector<40x64xf32>
    %c40_200 = arith.constant 40 : index
    %c0_201 = arith.constant 0 : index
    %326 = vector.load %arg10[%c40_200, %c0_201] : memref<240x64xf32, #tpu.memory_space<vmem>>, vector<40x64xf32>
    %327 = arith.maximumf %325, %326 : vector<40x64xf32>
    %c0_202 = arith.constant 0 : index
    %c0_203 = arith.constant 0 : index
    %328 = vector.load %arg6[%c0_202, %c0_203] : memref<192x128xf32, #tpu.memory_space<vmem>>, vector<64x128xf32>
    %cst_204 = arith.constant dense<0.000000e+00> : vector<40x128xf32>
    %329 = tpu.matmul %327, %328, %cst_204 {dimension_numbers = #tpu.dot_dimension_numbers<[1], [0], [0], [1], [0, 0, 1, 1], [], []>} : vector<40x64xf32>, vector<64x128xf32>, vector<40x128xf32> -> vector<40x128xf32>
    %c80_205 = arith.constant 80 : index
    %c0_206 = arith.constant 0 : index
    %330 = vector.load %arg10[%c80_205, %c0_206] : memref<240x64xf32, #tpu.memory_space<vmem>>, vector<40x64xf32>
    %c120_207 = arith.constant 120 : index
    %c0_208 = arith.constant 0 : index
    %331 = vector.load %arg10[%c120_207, %c0_208] : memref<240x64xf32, #tpu.memory_space<vmem>>, vector<40x64xf32>
    %332 = arith.maximumf %330, %331 : vector<40x64xf32>
    %c64_209 = arith.constant 64 : index
    %c0_210 = arith.constant 0 : index
    %333 = vector.load %arg6[%c64_209, %c0_210] : memref<192x128xf32, #tpu.memory_space<vmem>>, vector<64x128xf32>
    %cst_211 = arith.constant dense<0.000000e+00> : vector<40x128xf32>
    %334 = tpu.matmul %332, %333, %cst_211 {dimension_numbers = #tpu.dot_dimension_numbers<[1], [0], [0], [1], [0, 0, 1, 1], [], []>} : vector<40x64xf32>, vector<64x128xf32>, vector<40x128xf32> -> vector<40x128xf32>
    %335 = arith.addf %329, %334 : vector<40x128xf32>
    %c160_212 = arith.constant 160 : index
    %c0_213 = arith.constant 0 : index
    %336 = vector.load %arg10[%c160_212, %c0_213] : memref<240x64xf32, #tpu.memory_space<vmem>>, vector<40x64xf32>
    %c200_214 = arith.constant 200 : index
    %c0_215 = arith.constant 0 : index
    %337 = vector.load %arg10[%c200_214, %c0_215] : memref<240x64xf32, #tpu.memory_space<vmem>>, vector<40x64xf32>
    %338 = arith.maximumf %336, %337 : vector<40x64xf32>
    %c128 = arith.constant 128 : index
    %c0_216 = arith.constant 0 : index
    %339 = vector.load %arg6[%c128, %c0_216] : memref<192x128xf32, #tpu.memory_space<vmem>>, vector<64x128xf32>
    %cst_217 = arith.constant dense<0.000000e+00> : vector<40x128xf32>
    %340 = tpu.matmul %338, %339, %cst_217 {dimension_numbers = #tpu.dot_dimension_numbers<[1], [0], [0], [1], [0, 0, 1, 1], [], []>} : vector<40x64xf32>, vector<64x128xf32>, vector<40x128xf32> -> vector<40x128xf32>
    %341 = arith.addf %335, %340 : vector<40x128xf32>
    %c0_218 = arith.constant 0 : index
    %c0_219 = arith.constant 0 : index
    %342 = vector.load %arg7[%c0_218, %c0_219] : memref<1x128xf32, #tpu.memory_space<vmem>>, vector<1x128xf32>
    %343 = vector.broadcast %342 : vector<1x128xf32> to vector<40x128xf32>
    %344 = arith.addf %341, %343 : vector<40x128xf32>
    %c0_220 = arith.constant 0 : index
    %c0_221 = arith.constant 0 : index
    %345 = vector.load %arg8[%c0_220, %c0_221] : memref<40x128xf32, #tpu.memory_space<vmem>>, vector<40x128xf32>
    tpu.vector_store %arg8[%c0_220, %c0_221], %344 {strides = array<i32>} : memref<40x128xf32, #tpu.memory_space<vmem>>, vector<40x128xf32>,
    return
  }
  func.func @transform_0(%arg0: i32) -> (i32, i32) {
    %c0_i32 = arith.constant 0 : i32
    %c0_i32_0 = arith.constant 0 : i32
    %c0_i32_1 = arith.constant 0 : i32
    return %c0_i32, %c0_i32_0 : i32, i32
  }
  func.func @transform_1(%arg0: i32) -> (i32, i32) {
    %c0_i32 = arith.constant 0 : i32
    %c0_i32_0 = arith.constant 0 : i32
    %c0_i32_1 = arith.constant 0 : i32
    return %c0_i32, %c0_i32_0 : i32, i32
  }
  func.func @transform_2(%arg0: i32) -> (i32, i32) {
    %c0_i32 = arith.constant 0 : i32
    %c0_i32_0 = arith.constant 0 : i32
    %c0_i32_1 = arith.constant 0 : i32
    return %c0_i32, %c0_i32_0 : i32, i32
  }
  func.func @transform_3(%arg0: i32) -> (i32, i32) {
    %c0_i32 = arith.constant 0 : i32
    %c0_i32_0 = arith.constant 0 : i32
    %c0_i32_1 = arith.constant 0 : i32
    return %c0_i32, %c0_i32_0 : i32, i32
  }
  func.func @transform_4(%arg0: i32) -> (i32, i32) {
    %c0_i32 = arith.constant 0 : i32
    %c0_i32_0 = arith.constant 0 : i32
    %c0_i32_1 = arith.constant 0 : i32
    return %c0_i32, %c0_i32_0 : i32, i32
  }
  func.func @transform_5(%arg0: i32) -> (i32, i32) {
    %c0_i32 = arith.constant 0 : i32
    %c0_i32_0 = arith.constant 0 : i32
    %c0_i32_1 = arith.constant 0 : i32
    return %c0_i32, %c0_i32_0 : i32, i32
  }
  func.func @transform_6(%arg0: i32) -> (i32, i32) {
    %c0_i32 = arith.constant 0 : i32
    %c0_i32_0 = arith.constant 0 : i32
    %c0_i32_1 = arith.constant 0 : i32
    return %c0_i32, %c0_i32_0 : i32, i32
  }
  func.func @transform_7(%arg0: i32) -> (i32, i32) {
    %c0_i32 = arith.constant 0 : i32
    %c0_i32_0 = arith.constant 0 : i32
    %c0_i32_1 = arith.constant 0 : i32
    return %c0_i32, %c0_i32_0 : i32, i32
  }
}

</mosaic_0001>

<bundles_post_ra>
// kernel: phase_two_forward.1
= control target key start
LH: loop header
LB: loop body
LE: loop exit
PB: predicated region body
PF: predicated region fallthrough
CT: control target
= control target key end

     0   :  { %v2418_v0 = vmov 0   ;;  %v2419_v6 = vmov 1   ;;  %v2420_v7 = vmov 2   ;;  %v2421_v8 = vmov 3   ;;  %s3692_s0 = inlined_call_operand.vmem [shape: f32[40,14], index: 0, kind: input, shape index: {}]   ;;  %s3693_s1 = inlined_call_operand.vmem [shape: f32[3,32], index: 1, kind: input, shape index: {}]   ;;  %s3694_s2 = inlined_call_operand.vmem [shape: f32[1,32], index: 2, kind: input, shape index: {}]   ;;  %s3695_s3 = inlined_call_operand.vmem [shape: f32[96,64], index: 3, kind: input, shape index: {}]   ;;  %s3696_s4 = inlined_call_operand.vmem [shape: f32[1,64], index: 4, kind: input, shape index: {}]   ;;  %s3697_s5 = inlined_call_operand.vmem [shape: f32[192,128], index: 5, kind: input, shape index: {}]   ;;  %s3698_s6 = inlined_call_operand.vmem [shape: f32[1,128], index: 6, kind: input, shape index: {}]   ;;  %s3699_s7 = inlined_call_operand.vmem [shape: f32[40,128], index: 7, kind: output, shape index: {}]  }
   0x1   :  { %2293 = vset.pattern.permute.xlu2 %v2418_v0  ;;  %2292 = vset.pattern.permute.xlu1 %v2418_v0  ;;  %v2476_v1 = vld [vmem:[%s3692_s0 + $0x20] sm:$0xff]  ;;  %v2481_v2 = vld [vmem:[%s3692_s0 + $0x10] sm:$0xff]  ;;  %v2494_v4 = vld [vmem:[%s3692_s0 + $0x18] sm:$0xff]  ;;  %v2422_v9 = vmov 5   ;;  %vm26_vm0 = vcmask 261120   ;;  %v2423_v12 = vmov 0.0   ;;  %v67_v51 = vlaneseq }
   0x2   :  { %v2486_v3 = vld [vmem:[%s3692_s0] sm:$0xff]  ;;  %2291 = vset.pattern.permute.xlu0 %v2418_v0  ;;  %116 = vperm.xlu2 %2293, %v2476_v1   ;;  %v2499_v5 = vld [vmem:[%s3692_s0 + $0x8] sm:$0xff]  ;;  %v2532_v10 = vld [vmem:[%s3695_s3 + $0x18] sm:$0xff]  ;;  %27 = vst.msk [vmem:[#allocation2] sm:$0xff] %vm26_vm0, %v2423_v12  ;;  %v2424_v13 = vmov 4   ;;  %v2425_v19 = vmov 7  }
   0x3   :  { %106 = vperm.xlu1 %2292, %v2481_v2   ;;  %96 = vperm.xlu0 %2291, %v2486_v3   ;;  %v2537_v11 = vld [vmem:[%s3695_s3 + $0x10] sm:$0xff]  ;;  %28 = vst.msk [vmem:[#allocation2 + $0x8] sm:$0xff] %vm26_vm0, %v2423_v12  ;;  %v2550_v14 = vld [vmem:[%s3695_s3 + $0x8] sm:$0xff]  ;;  %v2566_v15 = vld [vmem:[%s3695_s3] sm:$0xff]  ;;  %v2426_v24 = vmov 8   ;;  %v2427_v33 = vmov 6  }
   0x4   :  { %1475 = vmatpush.msra.mxu1 %v2532_v10  ;;  %29 = vst.msk [vmem:[#allocation2 + $0x10] sm:$0xff] %vm26_vm0, %v2423_v12  ;;  %v1250_v28 = vld [vmem:[%s3695_s3 + $0x38] sm:$0xff]  ;;  %v1249_v30 = vld [vmem:[%s3695_s3 + $0x30] sm:$0xff]  ;;  %v1248_v31 = vld [vmem:[%s3695_s3 + $0x28] sm:$0xff]  ;;  %v2731_v60 = vshrl.u32 %v67_v51, 7  ;;  %vm1895_vm3 = vcmask 523264  }
   0x5   :  { %30 = vst.msk [vmem:[#allocation2 + $0x18] sm:$0xff] %vm26_vm0, %v2423_v12  ;;  %1353 = vmatpush.msra.mxu0 %v1250_v28  ;;  %2264 = vmatpush.msra.mxu3 %v1250_v28  ;;  %v1247_v32 = vld [vmem:[%s3695_s3 + $0x20] sm:$0xff] }
   0x6   :  { %1476 = vmatpush.msra.mxu1 %v2537_v11  ;;  %31 = vst.msk [vmem:[#allocation2 + $0x20] sm:$0xff] %vm26_vm0, %v2423_v12  ;;  %v2690_v34 = vld [vmem:[%s3693_s1] ss:$0 sm:$0xff]  ;;  %v2695_v35 = vld [vmem:[%s3693_s1 + $0x1] ss:$0 sm:$0xff]  ;;  %vm73_vm1 = vcmp.ge.s32.totalorder %v2731_v60, 2 }
   0x7   :  { %32 = vst.msk [vmem:[#allocation2 + $0x28] sm:$0xff] %vm26_vm0, %v2423_v12  ;;  %1354 = vmatpush.msra.mxu0 %v1249_v30  ;;  %2265 = vmatpush.msra.mxu3 %v1249_v30  ;;  %v2704_v41 = vld [vmem:[%s3693_s1 + $0x2] ss:$0 sm:$0xff]  ;;  %v2726_v54 = vld [vmem:[%s3694_s2] ss:$0 sm:$0xff] }
   0x8   :  { %1477 = vmatpush.msra.mxu1 %v2550_v14  ;;  %33 = vst.msk [vmem:[#allocation2 + $0x30] sm:$0xff] %vm26_vm0, %v2423_v12 }
   0x9   :  { %v1208_v16 = vld [vmem:[#allocation2] sm:$0xff]  ;;  %34 = vst.msk [vmem:[#allocation2 + $0x38] sm:$0xff] %vm26_vm0, %v2423_v12  ;;  %1355 = vmatpush.msra.mxu0 %v1248_v31  ;;  %2266 = vmatpush.msra.mxu3 %v1248_v31 }
   0xa   :  { %2294 = vset.pattern.permute.xlu2 %v2419_v6  ;;  %1478 = vmatpush.msra.mxu1 %v2566_v15  ;;  %35 = vst.msk [vmem:[#allocation2 + $0x40] sm:$0xff] %vm26_vm0, %v2423_v12  ;;  %v1209_v18 = vld [vmem:[#allocation2 + $0x8] sm:$0xff] }
   0xb   :  { %111 = vperm.xlu1 %2292, %v2494_v4   ;;  %101 = vperm.xlu0 %2291, %v2499_v5   ;;  %36 = vst.msk [vmem:[#allocation2 + $0x48] sm:$0xff] %vm26_vm0, %v2423_v12  ;;  %v1210_v20 = vld [vmem:[#allocation2 + $0x10] sm:$0xff] }
   0xc   :  { %127 = vperm.xlu2 %2294, %v2486_v3   ;;  %2189 = vmatmul.msk.f32.vlgmr.msra.gmra.mxu1 %vm26_vm0, %v1208_v16  ;;  %37 = vst.msk [vmem:[#allocation2 + $0x50] sm:$0xff] %vm26_vm0, %v2423_v12  ;;  %v1211_v22 = vld [vmem:[#allocation2 + $0x18] sm:$0xff] }
   0xd   :  { %38 = vst.msk [vmem:[#allocation2 + $0x58] sm:$0xff] %vm26_vm0, %v2423_v12  ;;  %v1212_v25 = vld [vmem:[#allocation2 + $0x20] sm:$0xff]  ;;  %1356 = vmatpush.msra.mxu0 %v1247_v32  ;;  %2267 = vmatpush.msra.mxu3 %v1247_v32 }
   0xe   :  { %39 = vst.msk [vmem:[#allocation2 + $0x60] sm:$0xff] %vm26_vm0, %v2423_v12 }
   0xf   :  { %40 = vst.msk [vmem:[#allocation2 + $0x68] sm:$0xff] %vm26_vm0, %v2423_v12  ;;  %2268 = vmatpush.msrb.mxu3 %v2532_v10 }
  0x10   :  { %41 = vst.msk [vmem:[#allocation2 + $0x70] sm:$0xff] %vm26_vm0, %v2423_v12 }
  0x11   :  { %42 = vst.msk [vmem:[#allocation2 + $0x78] sm:$0xff] %vm26_vm0, %v2423_v12  ;;  %2269 = vmatpush.msrb.mxu3 %v2537_v11 }
  0x12   :  { %43 = vst.msk [vmem:[#allocation2 + $0x80] sm:$0xff] %vm26_vm0, %v2423_v12 }
  0x13   :  { %2296 = vset.pattern.permute.xlu1 %v2419_v6  ;;  %2295 = vset.pattern.permute.xlu0 %v2419_v6  ;;  %44 = vst.msk [vmem:[#allocation2 + $0x88] sm:$0xff] %vm26_vm0, %v2423_v12 }
  0x14   :  { %135 = vperm.xlu1 %2296, %v2481_v2   ;;  %139 = vperm.xlu2 %2294, %v2494_v4   ;;  %45 = vst.msk [vmem:[#allocation2 + $0x90] sm:$0xff] %vm26_vm0, %v2423_v12 }
  0x15   :  { %131 = vperm.xlu0 %2295, %v2499_v5   ;;  %2190 = vmatmul.msk.f32.gmra.mxu1 %vm26_vm0, %v1209_v18  ;;  %46 = vst.msk [vmem:[#allocation2 + $0x98] sm:$0xff] %vm26_vm0, %v2423_v12 }
  0x16   :  { %47 = vst.msk [vmem:[#allocation2 + $0xa0] sm:$0xff] %vm26_vm0, %v2423_v12  ;;  %2270 = vmatpush.msrb.mxu3 %v2550_v14 }
  0x17   :  { %48 = vst.msk [vmem:[#allocation2 + $0xa8] sm:$0xff] %vm26_vm0, %v2423_v12 }
  0x18   :  { %49 = vst.msk [vmem:[#allocation2 + $0xb0] sm:$0xff] %vm26_vm0, %v2423_v12  ;;  %2271 = vmatpush.msrb.mxu3 %v2566_v15 }
  0x19   :  { %50 = vst.msk [vmem:[#allocation2 + $0xb8] sm:$0xff] %vm26_vm0, %v2423_v12 }
  0x1a   :  { %51 = vst.msk [vmem:[#allocation2 + $0xc0] sm:$0xff] %vm26_vm0, %v2423_v12 }
  0x1b   :  { %52 = vst.msk [vmem:[#allocation2 + $0xc8] sm:$0xff] %vm26_vm0, %v2423_v12 }
  0x1c   :  { %143 = vperm.xlu1 %2296, %v2476_v1   ;;  %2297 = vset.pattern.permute.xlu2 %v2420_v7  ;;  %53 = vst.msk [vmem:[#allocation2 + $0xd0] sm:$0xff] %vm26_vm0, %v2423_v12 }
  0x1d   :  { %2300 = vset.pattern.permute.xlu0 %v2421_v8  ;;  %159 = vperm.xlu2 %2297, %v2486_v3   ;;  %54 = vst.msk [vmem:[#allocation2 + $0xd8] sm:$0xff] %vm26_vm0, %v2423_v12 }
  0x1e   :  { %223 = vperm.xlu0 %2300, %v2499_v5   ;;  %2191 = vmatmul.msk.f32.gmra.mxu1 %vm26_vm0, %v1210_v20  ;;  %55 = vst.msk [vmem:[#allocation2 + $0xe0] sm:$0xff] %vm26_vm0, %v2423_v12 }
  0x1f   :  { %56 = vst.msk [vmem:[#allocation2 + $0xe8] sm:$0xff] %vm26_vm0, %v2423_v12 }
  0x20   :  { %57 = vst.msk [vmem:[#allocation2 + $0xf0] sm:$0xff] %vm26_vm0, %v2423_v12 }
  0x21   :  { %58 = vst.msk [vmem:[#allocation2 + $0xf8] sm:$0xff] %vm26_vm0, %v2423_v12 }
  0x22   :  { %59 = vst.msk [vmem:[#allocation2 + $0x100] sm:$0xff] %vm26_vm0, %v2423_v12 }
  0x23   :  { %60 = vst.msk [vmem:[#allocation2 + $0x108] sm:$0xff] %vm26_vm0, %v2423_v12 }
  0x24   :  { %2298 = vset.pattern.permute.xlu1 %v2420_v7  ;;  %61 = vst.msk [vmem:[#allocation2 + $0x110] sm:$0xff] %vm26_vm0, %v2423_v12 }
  0x25   :  { %167 = vperm.xlu1 %2298, %v2481_v2   ;;  %171 = vperm.xlu2 %2297, %v2494_v4   ;;  %62 = vst.msk [vmem:[#allocation2 + $0x118] sm:$0xff] %vm26_vm0, %v2423_v12 }
  0x26   :  { %2301 = vset.pattern.permute.xlu0 %v2420_v7  ;;  %2192 = vmatmul.msk.f32.gmra.mxu1 %vm26_vm0, %v1211_v22  ;;  %63 = vst.msk [vmem:[#allocation2 + $0x120] sm:$0xff] %vm26_vm0, %v2423_v12 }
  0x27   :  { %163 = vperm.xlu0 %2301, %v2499_v5   ;;  %64 = vst.msk [vmem:[#allocation2 + $0x128] sm:$0xff] %vm26_vm0, %v2423_v12 }
  0x28   :  { %65 = vst.msk [vmem:[#allocation2 + $0x130] sm:$0xff] %vm26_vm0, %v2423_v12 }
  0x29   :  { %66 = vst.msk [vmem:[#allocation2 + $0x138] sm:$0xff] %vm26_vm0, %v2423_v12 }
  0x2d   :  { %175 = vperm.xlu1 %2298, %v2476_v1   ;;  %2299 = vset.pattern.permute.xlu2 %v2421_v8 }
  0x2e   :  { %219 = vperm.xlu2 %2299, %v2486_v3   ;;  %2193 = vmatmul.msk.f32.gmra.mxu1 %vm26_vm0, %v1212_v25 }
  0x2f   :  { %296 = vperm.xlu0 %2301, %v2499_v5  }
  0x35   :  { %2302 = vset.pattern.permute.xlu1 %v2421_v8 }
  0x36   :  { %227 = vperm.xlu1 %2302, %v2481_v2   ;;  %231 = vperm.xlu2 %2299, %v2494_v4  }
  0x37   :  { %311 = vperm.xlu0 %2301, %v2476_v1  }
  0x3e   :  { %235 = vperm.xlu1 %2302, %v2476_v1   ;;  %2303 = vset.pattern.permute.xlu2 %v2420_v7 }
  0x3f   :  { %2311 = vset.pattern.permute.xlu0 %v2422_v9  ;;  %291 = vperm.xlu2 %2303, %v2486_v3  }
  0x40   :  { %414 = vperm.xlu0 %2311, %v2486_v3  }
  0x46   :  { %2304 = vset.pattern.permute.xlu1 %v2420_v7 }
  0x47   :  { %301 = vperm.xlu1 %2304, %v2481_v2   ;;  %306 = vperm.xlu2 %2303, %v2494_v4  }
  0x48   :  { %507 = vperm.xlu0 %2311, %v2486_v3  }
  0x4f   :  { %2305 = vset.pattern.permute.xlu1 %v2421_v8  ;;  %2306 = vset.pattern.permute.xlu2 %v2424_v13 }
  0x50   :  { %2315 = vset.pattern.permute.xlu0 %v2424_v13  ;;  %322 = vperm.xlu1 %2305, %v2486_v3  }
  0x51   :  { %354 = vperm.xlu2 %2306, %v2486_v3   ;;  %362 = vperm.xlu0 %2315, %v2481_v2  }
  0x58   :  { %326 = vperm.xlu1 %2305, %v2499_v5  }
  0x59   :  { %358 = vperm.xlu2 %2306, %v2499_v5   ;;  %496 = vperm.xlu0 %2315, %v2476_v1  }
  0x5c   :  { %v2593_v17 = vpop.permute.xlu2 %116 }
  0x60   :  { %2307 = vset.pattern.permute.xlu1 %v2422_v9 }
  0x61   :  { %2308 = vset.pattern.permute.xlu2 %v2421_v8  ;;  %418 = vperm.xlu1 %2307, %v2499_v5  }
  0x62   :  { %330 = vperm.xlu2 %2308, %v2481_v2   ;;  %2328 = vset.pattern.permute.xlu0 %v2425_v19 }
  0x63   :  { %607 = vperm.xlu0 %2328, %v2481_v2  }
  0x66   :  { %v2623_v21 = vpop.permute.xlu2 %127 }
  0x67   :  { %v147_v38 = vmul.f32 %v2695_v35, %v2623_v21  ;;  %v203_v44 = vmul.f32 %v2690_v34, %v2623_v21 }
  0x69   :  { %422 = vperm.xlu1 %2307, %v2481_v2  }
  0x6a   :  { %334 = vperm.xlu2 %2308, %v2494_v4  }
  0x6b   :  { %692 = vperm.xlu0 %2328, %v2486_v3  }
  0x6e   :  { %v2645_v23 = vpop.permute.xlu2 %139 }
  0x6f   :  { %v150_v47 = vmul.f32 %v2695_v35, %v2645_v23  ;;  %v206_v61 = vmul.f32 %v2690_v34, %v2645_v23 }
  0x71   :  { %2309 = vset.pattern.permute.xlu1 %v2424_v13 }
  0x72   :  { %366 = vperm.xlu1 %2309, %v2494_v4   ;;  %2310 = vset.pattern.permute.xlu2 %v2422_v9 }
  0x73   :  { %426 = vperm.xlu2 %2310, %v2494_v4   ;;  %2336 = vset.pattern.permute.xlu0 %v2426_v24 }
  0x74   :  { %728 = vperm.xlu0 %2336, %v2499_v5  }
  0x75   :  { %v2667_v26 = vpop.permute.xlu1 %106  ;;  %v97_v27 = vpop.permute.xlu0 %96 }
  0x76   :  { %v120_v39 = vmul.f32 %v2690_v34, %v97_v27 }
  0x77   :  { %v160_v29 = vpop.permute.xlu2 %159 }
  0x78   :  { %v179_v42 = vmul.f32 %v2704_v41, %v160_v29  ;;  %v152_v43 = vadd.f32 %v147_v38, %v120_v39  ;;  %v208_v45 = vmul.f32 %v2695_v35, %v160_v29 }
  0x7a   :  { %2312 = vset.pattern.permute.xlu1 %v2421_v8  ;;  %v184_v48 = vadd.f32 %v179_v42, %v152_v43  ;;  %v213_v53 = vadd.f32 %v208_v45, %v203_v44 }
  0x7b   :  { %338 = vperm.xlu1 %2312, %v2476_v1   ;;  %2313 = vset.pattern.permute.xlu2 %v2424_v13 }
  0x7c   :  { %370 = vperm.xlu2 %2313, %v2476_v1   ;;  %2337 = vset.pattern.permute.xlu0 %v2427_v33  ;;  %v193_v56 = vadd.f32 %v2726_v54, %v184_v48 }
  0x7d   :  { %v112_v36 = vpop.permute.xlu1 %111  ;;  %v102_v37 = vpop.permute.xlu0 %101  ;;  %543 = vperm.xlu0 %2337, %v2499_v5  }
  0x7e   :  { %v123_v49 = vmul.f32 %v2690_v34, %v112_v36  ;;  %v198_v6 = vmax.f32 %v193_v56, 0.0  ;;  %v121_v21 = vmul.f32 %v2690_v34, %v102_v37 }
  0x7f   :  { %v172_v40 = vpop.permute.xlu2 %171 }
  0x80   :  { %v155_v57 = vadd.f32 %v150_v47, %v123_v49  ;;  %v182_v58 = vmul.f32 %v2704_v41, %v172_v40  ;;  %v211_v62 = vmul.f32 %v2695_v35, %v172_v40 }
  0x82   :  { %v187_v7 = vadd.f32 %v182_v58, %v155_v57  ;;  %v216_v12 = vadd.f32 %v211_v62, %v206_v61 }
  0x83   :  { %2314 = vset.pattern.permute.xlu1 %v2422_v9 }
  0x84   :  { %430 = vperm.xlu1 %2314, %v2476_v1   ;;  %476 = vperm.xlu2 %2313, %v2486_v3   ;;  %v196_v16 = vadd.f32 %v2726_v54, %v187_v7  ;;  %v124_v7 = vmul.f32 %v2690_v34, %v2593_v17 }
  0x85   :  { %681 = vperm.xlu0 %2337, %v2476_v1  }
  0x86   :  { %v2717_v46 = vpop.permute.xlu1 %135  ;;  %v201_v25 = vmax.f32 %v196_v16, 0.0 }
  0x87   :  { %v132_v50 = vpop.permute.xlu0 %131 }
  0x88   :  { %v220_v52 = vpop.permute.xlu2 %219  ;;  %v148_v22 = vmul.f32 %v2695_v35, %v132_v50  ;;  %v204_v30 = vmul.f32 %v2690_v34, %v132_v50  ;;  %v149_v50 = vmul.f32 %v2695_v35, %v2717_v46 }
  0x89   :  { %v238_v55 = vmul.f32 %v2704_v41, %v220_v52 }
  0x8a   :  { %v153_v29 = vadd.f32 %v148_v22, %v121_v21 }
  0x8b   :  { %v243_v59 = vadd.f32 %v238_v55, %v213_v53  ;;  %v122_v53 = vmul.f32 %v2690_v34, %v2667_v26 }
  0x8c   :  { %2316 = vset.pattern.permute.xlu1 %v2427_v33  ;;  %2317 = vset.pattern.permute.xlu2 %v2425_v19 }
  0x8d   :  { %v248_v63 = vadd.f32 %v2726_v54, %v243_v59  ;;  %539 = vperm.xlu1 %2316, %v2486_v3   ;;  %599 = vperm.xlu2 %2317, %v2486_v3   ;;  %v154_v57 = vadd.f32 %v149_v50, %v122_v53  ;;  %v205_v59 = vmul.f32 %v2690_v34, %v2717_v46 }
  0x8e   :  { %v2741_v0 = vpop.permute.xlu1 %143 }
  0x8f   :  { %v253_v8 = vmax.f32 %v248_v63, 0.0  ;;  %v151_v26 = vmul.f32 %v2695_v35, %v2741_v0  ;;  %v207_v17 = vmul.f32 %v2690_v34, %v2741_v0  ;;  %v1603_v34 = vld [vmem:[%s3695_s3 + $0x58] sm:$0xff] }
  0x90   :  { %v232_v10 = vpop.permute.xlu2 %231  ;;  %v224_v11 = vpop.permute.xlu0 %223  ;;  %1706 = vmatpush.msra.mxu2 %v1603_v34 }
  0x91   :  { %v258_v14 = vmax.f32 %v198_v6, %v253_v8  ;;  %v241_v15 = vmul.f32 %v2704_v41, %v232_v10  ;;  %v239_v37 = vmul.f32 %v2704_v41, %v224_v11 }
  0x93   :  { %v273_v18 = vsel %vm73_vm1, %v258_v14, 0.0  ;;  %v246_v20 = vadd.f32 %v241_v15, %v216_v12  ;;  %v156_v14 = vadd.f32 %v151_v26, %v124_v7 }
  0x94   :  { %278 = vst.msk [vmem:[#allocation2 + $0x28] sm:$0xff] %vm26_vm0, %v273_v18 }
  0x95   :  { %v251_v23 = vadd.f32 %v2726_v54, %v246_v20  ;;  %2318 = vset.pattern.permute.xlu1 %v2424_v13  ;;  %2319 = vset.pattern.permute.xlu2 %v2422_v9 }
  0x96   :  { %481 = vperm.xlu1 %2318, %v2499_v5   ;;  %511 = vperm.xlu2 %2319, %v2499_v5  }
  0x97   :  { %v256_v27 = vmax.f32 %v251_v23, 0.0  ;;  %v168_v28 = vpop.permute.xlu1 %167 }
  0x98   :  { %v181_v55 = vmul.f32 %v2704_v41, %v168_v28  ;;  %v210_v58 = vmul.f32 %v2695_v35, %v168_v28 }
  0x99   :  { %v261_v31 = vmax.f32 %v201_v25, %v256_v27  ;;  %v164_v32 = vpop.permute.xlu0 %163  ;;  %v2757_v36 = vpop.permute.xlu2 %291 }
  0x9a   :  { %v180_v38 = vmul.f32 %v2704_v41, %v164_v32  ;;  %v209_v39 = vmul.f32 %v2695_v35, %v164_v32  ;;  %v186_v61 = vadd.f32 %v181_v55, %v154_v57  ;;  %v215_v63 = vadd.f32 %v210_v58, %v205_v59  ;;  %v1601_v32 = vld [vmem:[%s3695_s3 + $0x48] sm:$0xff] }
  0x9b   :  { %281 = vst.msk [vmem:[#allocation2 + $0x40] sm:$0xff] %vm26_vm0, %v261_v31  ;;  %v1213_v40 = vld [vmem:[#allocation2 + $0x28] sm:$0xff] }
  0x9c   :  { %v185_v42 = vadd.f32 %v180_v38, %v153_v29  ;;  %v214_v43 = vadd.f32 %v209_v39, %v204_v30  ;;  %2159 = vmatmul.msk.f32.vlgmr.msra.gmra.mxu0 %vm26_vm0, %v1213_v40  ;;  %2194 = vmatmul.msk.f32.gmra.mxu1 %vm26_vm0, %v1213_v40  ;;  %v195_v46 = vadd.f32 %v2726_v54, %v186_v61  ;;  %v2817_v29 = vadd.s32 32, %v2731_v60  ;;  %v1600_v39 = vld [vmem:[%s3695_s3 + $0x40] sm:$0xff] }
  0x9e   :  { %v194_v44 = vadd.f32 %v2726_v54, %v185_v42  ;;  %v244_v45 = vadd.f32 %v239_v37, %v214_v43  ;;  %2320 = vset.pattern.permute.xlu1 %v2425_v19  ;;  %2321 = vset.pattern.permute.xlu2 %v2424_v13  ;;  %v200_v20 = vmax.f32 %v195_v46, 0.0  ;;  %vm82_vm2 = vcmp.lt.s32.totalorder %v2817_v29, 38 }
  0x9f   :  { %603 = vperm.xlu1 %2320, %v2499_v5   ;;  %v176_v47 = vpop.permute.xlu1 %175  ;;  %486 = vperm.xlu2 %2321, %v2481_v2  }
  0xa0   :  { %v199_v48 = vmax.f32 %v194_v44, 0.0  ;;  %v249_v49 = vadd.f32 %v2726_v54, %v244_v45  ;;  %v183_v8 = vmul.f32 %v2704_v41, %v176_v47  ;;  %v212_v15 = vmul.f32 %v2695_v35, %v176_v47  ;;  %v2843_v45 = vld [vmem:[%s3693_s1] ss:$0 sm:$0xff]  ;;  %v2848_v47 = vld [vmem:[%s3693_s1 + $0x1] ss:$0 sm:$0xff] }
  0xa1   :  { %v2773_v51 = vpop.permute.xlu2 %306  ;;  %v2793_v10 = vpop.permute.xlu0 %296 }
  0xa2   :  { %v254_v52 = vmax.f32 %v249_v49, 0.0  ;;  %v188_v21 = vadd.f32 %v183_v8, %v156_v14  ;;  %v217_v25 = vadd.f32 %v212_v15, %v207_v17  ;;  %v2853_v49 = vld [vmem:[%s3693_s1 + $0x2] ss:$0 sm:$0xff] }
  0xa4   :  { %v259_v56 = vmax.f32 %v199_v48, %v254_v52  ;;  %v197_v0 = vadd.f32 %v2726_v54, %v188_v21  ;;  %v315_v52 = vmul.f32 %v2843_v45, %v2757_v36 }
  0xa6   :  { %279 = vst.msk [vmem:[#allocation2 + $0x30] sm:$0xff] %vm26_vm0, %v259_v56  ;;  %v202_v37 = vmax.f32 %v197_v0, 0.0  ;;  %v1216_v56 = vld [vmem:[#allocation2 + $0x40] sm:$0xff] }
  0xa7   :  { %2322 = vset.pattern.permute.xlu1 %v2422_v9  ;;  %2323 = vset.pattern.permute.xlu2 %v2427_v33 }
  0xa8   :  { %515 = vperm.xlu1 %2322, %v2481_v2   ;;  %v228_v62 = vpop.permute.xlu1 %227  ;;  %547 = vperm.xlu2 %2323, %v2481_v2  }
  0xa9   :  { %v240_v6 = vmul.f32 %v2704_v41, %v228_v62  ;;  %v2819_v30 = vpop.permute.xlu0 %311  ;;  %v2873_v62 = vld [vmem:[%s3694_s2] ss:$0 sm:$0xff] }
  0xab   :  { %v245_v11 = vadd.f32 %v240_v6, %v215_v63  ;;  %v355_v12 = vpop.permute.xlu2 %354  ;;  %v2428_v6 = vmov 9  }
  0xac   :  { %v403_v50 = vmul.f32 %v2848_v47, %v355_v12  ;;  %v374_v53 = vmul.f32 %v2853_v49, %v355_v12  ;;  %2346 = vset.pattern.permute.xlu0 %v2428_v6 }
  0xad   :  { %v250_v16 = vadd.f32 %v2726_v54, %v245_v11  ;;  %v1214_v18 = vld [vmem:[#allocation2 + $0x30] sm:$0xff]  ;;  %792 = vperm.xlu0 %2346, %v2481_v2   ;;  %v316_v11 = vmul.f32 %v2843_v45, %v2793_v10 }
  0xae   :  { %2160 = vmatmul.msk.f32.gmra.mxu0 %vm26_vm0, %v1214_v18  ;;  %2195 = vmatmul.msk.f32.gmra.mxu1 %vm26_vm0, %v1214_v18 }
  0xaf   :  { %v255_v22 = vmax.f32 %v250_v16, 0.0 }
  0xb0   :  { %2324 = vset.pattern.permute.xlu1 %v2424_v13  ;;  %v236_v23 = vpop.permute.xlu1 %235  ;;  %2325 = vset.pattern.permute.xlu2 %v2422_v9 }
  0xb1   :  { %v260_v35 = vmax.f32 %v200_v20, %v255_v22  ;;  %v242_v27 = vmul.f32 %v2704_v41, %v236_v23  ;;  %491 = vperm.xlu1 %2324, %v2494_v4   ;;  %519 = vperm.xlu2 %2325, %v2494_v4   ;;  %v1602_v41 = vld [vmem:[%s3695_s3 + $0x50] sm:$0xff] }
  0xb2   :  { %1707 = vmatpush.msra.mxu2 %v1602_v41  ;;  %v415_v48 = vpop.permute.xlu0 %414 }
  0xb3   :  { %280 = vst.msk [vmem:[#allocation2 + $0x38] sm:$0xff] %vm26_vm0, %v260_v35  ;;  %v247_v13 = vadd.f32 %v242_v27, %v217_v25  ;;  %v2811_v28 = vpop.permute.xlu2 %358  ;;  %v433_v57 = vmul.f32 %v2853_v49, %v415_v48 }
  0xb4   :  { %1708 = vmatpush.msra.mxu2 %v1601_v32  ;;  %v375_v22 = vmul.f32 %v2853_v49, %v2811_v28  ;;  %v404_v25 = vmul.f32 %v2848_v47, %v2811_v28 }
  0xb5   :  { %v252_v31 = vadd.f32 %v2726_v54, %v247_v13 }
  0xb6   :  { %1709 = vmatpush.msra.mxu2 %v1600_v39 }
  0xb7   :  { %v257_v38 = vmax.f32 %v252_v31, 0.0 }
  0xb9   :  { %v262_v40 = vmax.f32 %v202_v37, %v257_v38  ;;  %2326 = vset.pattern.permute.xlu1 %v2427_v33  ;;  %v2830_v42 = vpop.permute.xlu1 %301  ;;  %2327 = vset.pattern.permute.xlu2 %v2425_v19 }
  0xba   :  { %551 = vperm.xlu1 %2326, %v2494_v4   ;;  %v1215_v54 = vld [vmem:[#allocation2 + $0x38] sm:$0xff]  ;;  %611 = vperm.xlu2 %2327, %v2494_v4   ;;  %v2877_v7 = vpop.permute.xlu0 %507  ;;  %v317_v41 = vmul.f32 %v2843_v45, %v2830_v42 }
  0xbb   :  { %v277_v43 = vsel %vm82_vm2, %v262_v40, 0.0  ;;  %2161 = vmatmul.msk.f32.gmra.mxu0 %vm26_vm0, %v1215_v54  ;;  %2196 = vmatmul.msk.f32.gmra.mxu1 %vm26_vm0, %v1215_v54 }
  0xbc   :  { %282 = vst.msk [vmem:[#allocation2 + $0x48] sm:$0xff] %vm26_vm0, %v277_v43  ;;  %v331_v44 = vpop.permute.xlu2 %330 }
  0xbd   :  { %v344_v34 = vmul.f32 %v2848_v47, %v331_v44  ;;  %v400_v31 = vmul.f32 %v2843_v45, %v331_v44 }
  0xbf   :  { %v349_v54 = vadd.f32 %v344_v34, %v317_v41 }
  0xc2   :  { %2329 = vset.pattern.permute.xlu1 %v2422_v9  ;;  %v323_v55 = vpop.permute.xlu1 %322  ;;  %2330 = vset.pattern.permute.xlu2 %v2427_v33 }
  0xc3   :  { %v342_v58 = vmul.f32 %v2848_v47, %v323_v55  ;;  %v398_v59 = vmul.f32 %v2843_v45, %v323_v55  ;;  %523 = vperm.xlu1 %2329, %v2476_v1   ;;  %2162 = vmatmul.msk.f32.gmra.mxu0 %vm26_vm0, %v1216_v56  ;;  %v1217_v14 = vld [vmem:[#allocation2 + $0x48] sm:$0xff] }
  0xc4   :  { %2197 = vmatmul.msk.f32.gmra.mxu1 %vm26_vm0, %v1216_v56  ;;  %555 = vperm.xlu2 %2330, %v2476_v1   ;;  %v2868_v61 = vpop.permute.xlu2 %334 }
  0xc5   :  { %v347_v36 = vadd.f32 %v342_v58, %v315_v52  ;;  %v408_v9 = vadd.f32 %v403_v50, %v398_v59  ;;  %v345_v59 = vmul.f32 %v2848_v47, %v2868_v61 }
  0xc7   :  { %v379_v26 = vadd.f32 %v374_v53, %v347_v36  ;;  %v438_v63 = vadd.f32 %v433_v57, %v408_v9 }
  0xc9   :  { %v388_v46 = vadd.f32 %v2873_v62, %v379_v26  ;;  %v443_v8 = vadd.f32 %v2873_v62, %v438_v63  ;;  %v318_v63 = vmul.f32 %v2843_v45, %v2773_v51 }
  0xca   :  { %v327_v12 = vpop.permute.xlu1 %326 }
  0xcb   :  { %v393_v15 = vmax.f32 %v388_v46, 0.0  ;;  %v448_v16 = vmax.f32 %v443_v8, 0.0  ;;  %v343_v18 = vmul.f32 %v2848_v47, %v327_v12  ;;  %2331 = vset.pattern.permute.xlu1 %v2425_v19  ;;  %2163 = vmatmul.msk.f32.gmra.mxu0 %vm26_vm0, %v1217_v14  ;;  %v399_v23 = vmul.f32 %v2843_v45, %v327_v12 }
  0xcc   :  { %2198 = vmatmul.msk.f32.gmra.mxu1 %vm26_vm0, %v1217_v14  ;;  %615 = vperm.xlu1 %2331, %v2476_v1   ;;  %v363_v1 = vpop.permute.xlu0 %362  ;;  %v401_v46 = vmul.f32 %v2843_v45, %v2868_v61  ;;  %v350_v12 = vadd.f32 %v345_v59, %v318_v63  ;;  %v3015_v59 = vld [vmem:[%s3694_s2] ss:$0 sm:$0xff] }
  0xcd   :  { %v453_v17 = vmax.f32 %v393_v15, %v448_v16  ;;  %661 = vperm.xlu2 %2330, %v2486_v3   ;;  %v427_v20 = vpop.permute.xlu2 %426  ;;  %v348_v21 = vadd.f32 %v343_v18, %v316_v11  ;;  %v409_v0 = vadd.f32 %v404_v25, %v399_v23  ;;  %v376_v28 = vmul.f32 %v2853_v49, %v363_v1 }
  0xce   :  { %v405_v32 = vmul.f32 %v2848_v47, %v363_v1  ;;  %v436_v14 = vmul.f32 %v2853_v49, %v427_v20  ;;  %v319_v23 = vmul.f32 %v2843_v45, %v2819_v30 }
  0xcf   :  { %v458_v10 = vsel %vm73_vm1, %v453_v17, 0.0  ;;  %v380_v35 = vadd.f32 %v375_v22, %v348_v21  ;;  %v381_v43 = vadd.f32 %v376_v28, %v349_v54 }
  0xd0   :  { %463 = vst.msk [vmem:[#allocation2 + $0x50] sm:$0xff] %vm26_vm0, %v458_v10  ;;  %v410_v44 = vadd.f32 %v405_v32, %v400_v31 }
  0xd1   :  { %v389_v37 = vadd.f32 %v2873_v62, %v380_v35  ;;  %v390_v55 = vadd.f32 %v2873_v62, %v381_v43 }
  0xd3   :  { %v419_v27 = vpop.permute.xlu1 %418  ;;  %v394_v48 = vmax.f32 %v389_v37, 0.0  ;;  %v395_v9 = vmax.f32 %v390_v55, 0.0 }
  0xd4   :  { %v434_v13 = vmul.f32 %v2853_v49, %v419_v27  ;;  %2332 = vset.pattern.permute.xlu1 %v2426_v24  ;;  %v2927_v36 = vpop.permute.xlu0 %496 }
  0xd5   :  { %724 = vperm.xlu1 %2332, %v2486_v3   ;;  %2333 = vset.pattern.permute.xlu2 %v2428_v6 }
  0xd6   :  { %v439_v38 = vadd.f32 %v434_v13, %v409_v0  ;;  %784 = vperm.xlu2 %2333, %v2486_v3   ;;  %v2909_v39 = vpop.permute.xlu2 %370  ;;  %v2960_v0 = vld [vmem:[%s3692_s0] sm:$0xff] }
  0xd7   :  { %v1218_v40 = vld [vmem:[#allocation2 + $0x50] sm:$0xff]  ;;  %v378_v30 = vmul.f32 %v2853_v49, %v2909_v39  ;;  %877 = vperm.xlu0 %2346, %v2960_v0   ;;  %v407_v31 = vmul.f32 %v2848_v47, %v2909_v39 }
  0xd8   :  { %v444_v42 = vadd.f32 %v2873_v62, %v439_v38  ;;  %2164 = vmatmul.msk.f32.gmra.mxu0 %vm26_vm0, %v1218_v40  ;;  %2199 = vmatmul.msk.f32.gmra.mxu1 %vm26_vm0, %v1218_v40 }
  0xd9   :  { %2219 = vmatmul.msk.f32.vlgmr.msra.gmra.mxu2 %vm26_vm0, %v1218_v40 }
  0xda   :  { %v449_v50 = vmax.f32 %v444_v42, 0.0  ;;  %v2980_v42 = vld [vmem:[%s3693_s1] ss:$0 sm:$0xff] }
  0xdb   :  { %v423_v52 = vpop.permute.xlu1 %422 }
  0xdc   :  { %v454_v53 = vmax.f32 %v394_v48, %v449_v50  ;;  %v435_v3 = vmul.f32 %v2853_v49, %v423_v52  ;;  %v2948_v22 = vpop.permute.xlu0 %607 }
  0xdd   :  { %2334 = vset.pattern.permute.xlu1 %v2427_v33 }
  0xde   :  { %464 = vst.msk [vmem:[#allocation2 + $0x58] sm:$0xff] %vm26_vm0, %v454_v53  ;;  %v440_v56 = vadd.f32 %v435_v3, %v410_v44  ;;  %666 = vperm.xlu1 %2334, %v2499_v5   ;;  %2335 = vset.pattern.permute.xlu2 %v2425_v19  ;;  %v2922_v57 = vpop.permute.xlu2 %476  ;;  %v2429_v53 = vmov 10  }
  0xdf   :  { %696 = vperm.xlu2 %2335, %v2499_v5   ;;  %v500_v48 = vmul.f32 %v2980_v42, %v2922_v57  ;;  %2354 = vset.pattern.permute.xlu0 %v2429_v53 }
  0xe0   :  { %v445_v58 = vadd.f32 %v2873_v62, %v440_v56 }
  0xe2   :  { %v450_v26 = vmax.f32 %v445_v58, 0.0 }
  0xe4   :  { %v455_v8 = vmax.f32 %v395_v9, %v450_v26  ;;  %v367_v11 = vpop.permute.xlu1 %366  ;;  %v2974_v37 = vpop.permute.xlu0 %692 }
  0xe5   :  { %v377_v15 = vmul.f32 %v2853_v49, %v367_v11  ;;  %v406_v16 = vmul.f32 %v2848_v47, %v367_v11  ;;  %v1219_v18 = vld [vmem:[#allocation2 + $0x58] sm:$0xff] }
  0xe6   :  { %465 = vst.msk [vmem:[#allocation2 + $0x60] sm:$0xff] %vm26_vm0, %v455_v8  ;;  %2338 = vset.pattern.permute.xlu1 %v2428_v6  ;;  %2165 = vmatmul.msk.f32.gmra.mxu0 %vm26_vm0, %v1219_v18 }
  0xe7   :  { %v382_v51 = vadd.f32 %v377_v15, %v350_v12  ;;  %v411_v17 = vadd.f32 %v406_v16, %v401_v46  ;;  %2200 = vmatmul.msk.f32.gmra.mxu1 %vm26_vm0, %v1219_v18  ;;  %2220 = vmatmul.msk.f32.gmra.mxu2 %vm26_vm0, %v1219_v18  ;;  %v2941_v61 = vpop.permute.xlu2 %599  ;;  %v3035_v16 = vld [vmem:[%s3692_s0 + $0x8] sm:$0xff] }
  0xe8   :  { %788 = vperm.xlu1 %2338, %v2499_v5   ;;  %2339 = vset.pattern.permute.xlu2 %v2427_v33 }
  0xe9   :  { %v391_v20 = vadd.f32 %v2873_v62, %v382_v51  ;;  %v441_v21 = vadd.f32 %v436_v14, %v411_v17  ;;  %671 = vperm.xlu2 %2339, %v2481_v2   ;;  %v2411_v14 = vld [vmem:[%s3692_s0 + $0x18] sm:$0xff]  ;;  %913 = vperm.xlu0 %2354, %v3035_v16  }
  0xeb   :  { %v446_v10 = vadd.f32 %v2873_v62, %v441_v21  ;;  %v396_v25 = vmax.f32 %v391_v20, 0.0 }
  0xec   :  { %v3010_v56 = vpop.permute.xlu0 %728 }
  0xed   :  { %v451_v35 = vmax.f32 %v446_v10, 0.0  ;;  %v339_v1 = vpop.permute.xlu1 %338  ;;  %v1220_v27 = vld [vmem:[#allocation2 + $0x60] sm:$0xff] }
  0xee   :  { %v346_v5 = vmul.f32 %v2848_v47, %v339_v1  ;;  %2166 = vmatmul.msk.f32.gmra.mxu0 %vm26_vm0, %v1220_v27  ;;  %v402_v28 = vmul.f32 %v2843_v45, %v339_v1 }
  0xef   :  { %v456_v34 = vmax.f32 %v396_v25, %v451_v35  ;;  %2201 = vmatmul.msk.f32.gmra.mxu1 %vm26_vm0, %v1220_v27  ;;  %2221 = vmatmul.msk.f32.gmra.mxu2 %vm26_vm0, %v1220_v27  ;;  %v2412_v27 = vld [vmem:[%s3692_s0 + $0x20] sm:$0xff] }
  0xf0   :  { %2340 = vset.pattern.permute.xlu1 %v2425_v19  ;;  %v351_v13 = vadd.f32 %v346_v5, %v319_v23  ;;  %v2967_v41 = vpop.permute.xlu2 %511  ;;  %v412_v40 = vadd.f32 %v407_v31, %v402_v28  ;;  %v3063_v28 = vld [vmem:[%s3692_s0 + $0x20] sm:$0xff] }
  0xf1   :  { %466 = vst.msk [vmem:[#allocation2 + $0x68] sm:$0xff] %vm26_vm0, %v456_v34  ;;  %700 = vperm.xlu1 %2340, %v2481_v2   ;;  %2341 = vset.pattern.permute.xlu2 %v2426_v24 }
  0xf2   :  { %732 = vperm.xlu2 %2341, %v2481_v2   ;;  %v383_v32 = vadd.f32 %v378_v30, %v351_v13  ;;  %v2985_v2 = vld [vmem:[%s3693_s1 + $0x1] ss:$0 sm:$0xff]  ;;  %2363 = vset.pattern.permute.xlu0 %v2426_v24 }
  0xf3   :  { %v527_v44 = vmul.f32 %v2985_v2, %v2877_v7  ;;  %v528_v17 = vmul.f32 %v2985_v2, %v2967_v41  ;;  %866 = vperm.xlu0 %2363, %v3063_v28  }
  0xf4   :  { %v392_v45 = vadd.f32 %v2873_v62, %v383_v32  ;;  %v544_v21 = vpop.permute.xlu0 %543 }
  0xf5   :  { %v532_v58 = vadd.f32 %v527_v44, %v500_v48  ;;  %v589_v5 = vmul.f32 %v2985_v2, %v544_v21 }
  0xf6   :  { %v431_v38 = vpop.permute.xlu1 %430  ;;  %v397_v50 = vmax.f32 %v392_v45, 0.0 }
  0xf7   :  { %v437_v54 = vmul.f32 %v2853_v49, %v431_v38 }
  0xf8   :  { %v1221_v47 = vld [vmem:[#allocation2 + $0x68] sm:$0xff] }
  0xf9   :  { %v442_v39 = vadd.f32 %v437_v54, %v412_v40  ;;  %2342 = vset.pattern.permute.xlu1 %v2427_v33  ;;  %2167 = vmatmul.msk.f32.gmra.mxu0 %vm26_vm0, %v1221_v47  ;;  %v2990_v43 = vpop.permute.xlu2 %486  ;;  %v3002_v33 = vld [vmem:[%s3693_s1 + $0x2] ss:$0 sm:$0xff] }
  0xfa   :  { %676 = vperm.xlu1 %2342, %v2494_v4   ;;  %2202 = vmatmul.msk.f32.gmra.mxu1 %vm26_vm0, %v1221_v47  ;;  %v560_v1 = vmul.f32 %v3002_v33, %v544_v21 }
  0xfb   :  { %v447_v49 = vadd.f32 %v2873_v62, %v442_v39  ;;  %2222 = vmatmul.msk.f32.gmra.mxu2 %vm26_vm0, %v1221_v47  ;;  %2343 = vset.pattern.permute.xlu2 %v2425_v19  ;;  %v583_v62 = vmul.f32 %v2980_v42, %v2877_v7  ;;  %v618_v7 = vmul.f32 %v3002_v33, %v2941_v61 }
  0xfc   :  { %704 = vperm.xlu2 %2343, %v2494_v4  }
  0xfd   :  { %v452_v52 = vmax.f32 %v447_v49, 0.0  ;;  %v620_v49 = vmul.f32 %v3002_v33, %v2948_v22 }
  0xff   :  { %v457_v3 = vmax.f32 %v397_v50, %v452_v52  ;;  %v540_v55 = vpop.permute.xlu1 %539  ;;  %v502_v50 = vmul.f32 %v2980_v42, %v2990_v43 }
 0x100   :  { %v559_v57 = vmul.f32 %v3002_v33, %v540_v55  ;;  %v588_v9 = vmul.f32 %v2985_v2, %v540_v55  ;;  %v3084_v55 = vld [vmem:[%s3692_s0 + $0x10] sm:$0xff] }
 0x101   :  { %v462_v26 = vsel %vm82_vm2, %v457_v3, 0.0 }
 0x102   :  { %467 = vst.msk [vmem:[#allocation2 + $0x70] sm:$0xff] %vm26_vm0, %v462_v26  ;;  %v564_v63 = vadd.f32 %v559_v57, %v532_v58  ;;  %v593_v46 = vadd.f32 %v588_v9, %v583_v62  ;;  %2344 = vset.pattern.permute.xlu1 %v2426_v24  ;;  %v548_v8 = vpop.permute.xlu2 %547  ;;  %v2430_v58 = vmov 11  }
 0x103   :  { %736 = vperm.xlu1 %2344, %v2494_v4   ;;  %v590_v39 = vmul.f32 %v2985_v2, %v548_v8  ;;  %v561_v3 = vmul.f32 %v3002_v33, %v548_v8  ;;  %2364 = vset.pattern.permute.xlu0 %v2430_v58 }
 0x104   :  { %v573_v11 = vadd.f32 %v3015_v59, %v564_v63  ;;  %v623_v12 = vadd.f32 %v618_v7, %v593_v46  ;;  %2345 = vset.pattern.permute.xlu2 %v2428_v6  ;;  %977 = vperm.xlu0 %2364, %v3084_v55  }
 0x105   :  { %796 = vperm.xlu2 %2345, %v2411_v14  }
 0x106   :  { %v628_v15 = vadd.f32 %v3015_v59, %v623_v12  ;;  %v578_v18 = vmax.f32 %v573_v11, 0.0 }
 0x108   :  { %v633_v51 = vmax.f32 %v628_v15, 0.0  ;;  %v482_v4 = vpop.permute.xlu1 %481 }
 0x109   :  { %v501_v61 = vmul.f32 %v2980_v42, %v482_v4  ;;  %v1222_v20 = vld [vmem:[#allocation2 + $0x70] sm:$0xff] }
 0x10a   :  { %v638_v10 = vmax.f32 %v578_v18, %v633_v51  ;;  %2168 = vmatmul.msk.f32.gmra.mxu0 %vm26_vm0, %v1222_v20  ;;  %2203 = vmatmul.msk.f32.gmra.mxu1 %vm26_vm0, %v1222_v20 }
 0x10b   :  { %2347 = vset.pattern.permute.xlu1 %v2425_v19  ;;  %2223 = vmatmul.msk.f32.gmra.mxu2 %vm26_vm0, %v1222_v20  ;;  %v3045_v23 = vpop.permute.xlu2 %519  ;;  %v533_v35 = vadd.f32 %v528_v17, %v501_v61  ;;  %v584_v19 = vmul.f32 %v2980_v42, %v2967_v41 }
 0x10c   :  { %v643_v25 = vsel %vm73_vm1, %v638_v10, 0.0  ;;  %708 = vperm.xlu1 %2347, %v2412_v27   ;;  %1062 = vperm.xlu0 %2364, %v2960_v0   ;;  %v530_v18 = vmul.f32 %v2985_v2, %v3045_v23  ;;  %v586_v4 = vmul.f32 %v2980_v42, %v3045_v23 }
 0x10d   :  { %648 = vst.msk [vmem:[#allocation2 + $0x78] sm:$0xff] %vm26_vm0, %v643_v25  ;;  %2348 = vset.pattern.permute.xlu2 %v2426_v24  ;;  %v565_v34 = vadd.f32 %v560_v1, %v533_v35  ;;  %v594_v13 = vadd.f32 %v589_v5, %v584_v19 }
 0x10e   :  { %740 = vperm.xlu2 %2348, %v2412_v27  }
 0x10f   :  { %v574_v32 = vadd.f32 %v3015_v59, %v565_v34  ;;  %v504_v34 = vmul.f32 %v2980_v42, %v2927_v36 }
 0x111   :  { %v604_v30 = vpop.permute.xlu1 %603  ;;  %v579_v47 = vmax.f32 %v574_v32, 0.0 }
 0x112   :  { %v619_v31 = vmul.f32 %v3002_v33, %v604_v30 }
 0x114   :  { %v624_v41 = vadd.f32 %v619_v31, %v594_v13  ;;  %2349 = vset.pattern.permute.xlu1 %v2428_v6  ;;  %v1223_v38 = vld [vmem:[#allocation2 + $0x78] sm:$0xff]  ;;  %v612_v40 = vpop.permute.xlu2 %611  ;;  %1066 = vperm.xlu0 %2364, %v3035_v16  }
 0x115   :  { %800 = vperm.xlu1 %2349, %v2412_v27   ;;  %2169 = vmatmul.msk.f32.gmra.mxu0 %vm26_vm0, %v1223_v38  ;;  %v621_v20 = vmul.f32 %v3002_v33, %v612_v40 }
 0x116   :  { %v629_v54 = vadd.f32 %v3015_v59, %v624_v41  ;;  %2204 = vmatmul.msk.f32.gmra.mxu1 %vm26_vm0, %v1223_v38  ;;  %2224 = vmatmul.msk.f32.gmra.mxu2 %vm26_vm0, %v1223_v38 }
 0x117   :  { %846 = vperm.xlu2 %2348, %v2960_v0  }
 0x118   :  { %v634_v45 = vmax.f32 %v629_v54, 0.0 }
 0x11a   :  { %v639_v44 = vmax.f32 %v579_v47, %v634_v45  ;;  %v516_v48 = vpop.permute.xlu1 %515 }
 0x11b   :  { %v529_v52 = vmul.f32 %v2985_v2, %v516_v48  ;;  %v585_v62 = vmul.f32 %v2980_v42, %v516_v48  ;;  %v3139_v48 = vld [vmem:[%s3692_s0 + $0x18] sm:$0xff] }
 0x11c   :  { %649 = vst.msk [vmem:[#allocation2 + $0x80] sm:$0xff] %vm26_vm0, %v639_v44 }
 0x11d   :  { %v534_v22 = vadd.f32 %v529_v52, %v502_v50  ;;  %v595_v43 = vadd.f32 %v590_v39, %v585_v62  ;;  %2350 = vset.pattern.permute.xlu1 %v2429_v53  ;;  %v3144_v50 = vld [vmem:[%s3693_s1] ss:$0 sm:$0xff] }
 0x11e   :  { %909 = vperm.xlu1 %2350, %v2960_v0   ;;  %v556_v57 = vpop.permute.xlu2 %555 }
 0x11f   :  { %v566_v9 = vadd.f32 %v561_v3, %v534_v22  ;;  %v625_v7 = vadd.f32 %v620_v49, %v595_v43  ;;  %2351 = vset.pattern.permute.xlu2 %v2430_v58  ;;  %v563_v38 = vmul.f32 %v3002_v33, %v556_v57  ;;  %v592_v36 = vmul.f32 %v2985_v2, %v556_v57 }
 0x120   :  { %969 = vperm.xlu2 %2351, %v2960_v0  }
 0x121   :  { %v575_v26 = vadd.f32 %v3015_v59, %v566_v9  ;;  %v630_v63 = vadd.f32 %v3015_v59, %v625_v7  ;;  %v768_v9 = vmul.f32 %v3144_v50, %v2974_v37  ;;  %v2431_v7 = vmov 12  }
 0x122   :  { %2374 = vset.pattern.permute.xlu0 %v2431_v7 }
 0x123   :  { %v580_v46 = vmax.f32 %v575_v26, 0.0  ;;  %v635_v8 = vmax.f32 %v630_v63, 0.0  ;;  %v492_v11 = vpop.permute.xlu1 %491  ;;  %v1224_v12 = vld [vmem:[#allocation2 + $0x80] sm:$0xff]  ;;  %1102 = vperm.xlu0 %2374, %v3084_v55  }
 0x124   :  { %2170 = vmatmul.msk.f32.gmra.mxu0 %vm26_vm0, %v1224_v12  ;;  %2205 = vmatmul.msk.f32.gmra.mxu1 %vm26_vm0, %v1224_v12  ;;  %v503_v51 = vmul.f32 %v2980_v42, %v492_v11 }
 0x125   :  { %v640_v14 = vmax.f32 %v580_v46, %v635_v8  ;;  %2225 = vmatmul.msk.f32.gmra.mxu2 %vm26_vm0, %v1224_v12  ;;  %v3177_v8 = vld [vmem:[%s3694_s2] ss:$0 sm:$0xff] }
 0x126   :  { %2352 = vset.pattern.permute.xlu1 %v2426_v24  ;;  %v535_v61 = vadd.f32 %v530_v18, %v503_v51 }
 0x127   :  { %650 = vst.msk [vmem:[#allocation2 + $0x88] sm:$0xff] %vm26_vm0, %v640_v14  ;;  %851 = vperm.xlu1 %2352, %v3035_v16   ;;  %v662_v15 = vpop.permute.xlu2 %661 }
 0x128   :  { %2353 = vset.pattern.permute.xlu2 %v2428_v6  ;;  %v685_v43 = vmul.f32 %v3144_v50, %v662_v15 }
 0x129   :  { %881 = vperm.xlu2 %2353, %v3035_v16  }
 0x12b   :  { %1106 = vperm.xlu0 %2374, %v3139_v48  }
 0x12c   :  { %v552_v17 = vpop.permute.xlu1 %551 }
 0x12d   :  { %v562_v21 = vmul.f32 %v3002_v33, %v552_v17  ;;  %v591_v10 = vmul.f32 %v2985_v2, %v552_v17 }
 0x12e   :  { %v1225_v25 = vld [vmem:[#allocation2 + $0x88] sm:$0xff] }
 0x12f   :  { %v567_v35 = vadd.f32 %v562_v21, %v535_v61  ;;  %v596_v1 = vadd.f32 %v591_v10, %v586_v4  ;;  %2355 = vset.pattern.permute.xlu1 %v2430_v58  ;;  %2171 = vmatmul.msk.f32.gmra.mxu0 %vm26_vm0, %v1225_v25 }
 0x130   :  { %973 = vperm.xlu1 %2355, %v3035_v16   ;;  %2206 = vmatmul.msk.f32.gmra.mxu1 %vm26_vm0, %v1225_v25  ;;  %v785_v23 = vpop.permute.xlu2 %784 }
 0x131   :  { %v576_v27 = vadd.f32 %v3015_v59, %v567_v35  ;;  %v626_v19 = vadd.f32 %v621_v20, %v596_v1  ;;  %2226 = vmatmul.msk.f32.gmra.mxu2 %vm26_vm0, %v1225_v25  ;;  %2356 = vset.pattern.permute.xlu2 %v2426_v24 }
 0x132   :  { %856 = vperm.xlu2 %2356, %v3084_v55  }
 0x133   :  { %v631_v5 = vadd.f32 %v3015_v59, %v626_v19  ;;  %v581_v30 = vmax.f32 %v576_v27, 0.0  ;;  %2381 = vset.pattern.permute.xlu0 %v2430_v58 }
 0x134   :  { %1078 = vperm.xlu0 %2381, %v3063_v28  }
 0x135   :  { %v636_v13 = vmax.f32 %v631_v5, 0.0  ;;  %v524_v31 = vpop.permute.xlu1 %523 }
 0x136   :  { %v531_v32 = vmul.f32 %v2985_v2, %v524_v31  ;;  %v587_v47 = vmul.f32 %v2980_v42, %v524_v31  ;;  %v3149_v42 = vld [vmem:[%s3693_s1 + $0x1] ss:$0 sm:$0xff]  ;;  %v1358_v31 = vpop.f32.mrf.mxu0 }
 0x137   :  { %v641_v41 = vmax.f32 %v581_v30, %v636_v13  ;;  %v712_v22 = vmul.f32 %v3149_v42, %v2974_v37  ;;  %v3215_v13 = vpop.permute.xlu0 %681 }
 0x138   :  { %2357 = vset.pattern.permute.xlu1 %v2428_v6  ;;  %v536_v40 = vadd.f32 %v531_v32, %v504_v34  ;;  %v597_v49 = vadd.f32 %v592_v36, %v587_v47 }
 0x139   :  { %651 = vst.msk [vmem:[#allocation2 + $0x90] sm:$0xff] %vm26_vm0, %v641_v41  ;;  %885 = vperm.xlu1 %2357, %v3084_v55   ;;  %v3129_v54 = vpop.permute.xlu2 %696  ;;  %v717_v46 = vadd.f32 %v712_v22, %v685_v43  ;;  %v1480_v41 = vpop.f32.mrf.mxu1 }
 0x13a   :  { %2358 = vset.pattern.permute.xlu2 %v2429_v53  ;;  %v568_v45 = vadd.f32 %v563_v38, %v536_v40  ;;  %v713_v35 = vmul.f32 %v3149_v42, %v3129_v54  ;;  %v769_v30 = vmul.f32 %v3144_v50, %v3129_v54  ;;  %v1481_v40 = vadd.f32 %v1480_v41, %v1358_v31 }
 0x13b   :  { %917 = vperm.xlu2 %2358, %v3084_v55  }
 0x13c   :  { %v577_v52 = vadd.f32 %v3015_v59, %v568_v45 }
 0x13e   :  { %v616_v39 = vpop.permute.xlu1 %615  ;;  %v582_v57 = vmax.f32 %v577_v52, 0.0 }
 0x13f   :  { %v622_v44 = vmul.f32 %v3002_v33, %v616_v39 }
 0x140   :  { %v1226_v2 = vld [vmem:[#allocation2 + $0x90] sm:$0xff] }
 0x141   :  { %v627_v62 = vadd.f32 %v622_v44, %v597_v49  ;;  %2359 = vset.pattern.permute.xlu1 %v2426_v24  ;;  %2172 = vmatmul.msk.f32.gmra.mxu0 %vm26_vm0, %v1226_v2  ;;  %v3166_v24 = vld [vmem:[%s3693_s1 + $0x2] ss:$0 sm:$0xff] }
 0x142   :  { %861 = vperm.xlu1 %2359, %v3139_v48   ;;  %2207 = vmatmul.msk.f32.gmra.mxu1 %vm26_vm0, %v1226_v2  ;;  %v803_v14 = vmul.f32 %v3166_v24, %v785_v23  ;;  %v745_v19 = vmul.f32 %v3166_v24, %v3010_v56 }
 0x143   :  { %v632_v33 = vadd.f32 %v3015_v59, %v627_v62  ;;  %2227 = vmatmul.msk.f32.gmra.mxu2 %vm26_vm0, %v1226_v2  ;;  %2360 = vset.pattern.permute.xlu2 %v2428_v6  ;;  %v3159_v3 = vpop.permute.xlu2 %671 }
 0x144   :  { %889 = vperm.xlu2 %2360, %v3139_v48  }
 0x145   :  { %v637_v59 = vmax.f32 %v632_v33, 0.0  ;;  %v2432_v33 = vmov 13  }
 0x146   :  { %2384 = vset.pattern.permute.xlu0 %v2432_v33 }
 0x147   :  { %v642_v26 = vmax.f32 %v582_v57, %v637_v59  ;;  %v725_v63 = vpop.permute.xlu1 %724  ;;  %v793_v59 = vpop.permute.xlu0 %792 }
 0x148   :  { %v744_v11 = vmul.f32 %v3166_v24, %v725_v63  ;;  %v773_v12 = vmul.f32 %v3149_v42, %v725_v63  ;;  %v687_v63 = vmul.f32 %v3144_v50, %v3159_v3 }
 0x149   :  { %v647_v37 = vsel %vm82_vm2, %v642_v26, 0.0 }
 0x14a   :  { %652 = vst.msk [vmem:[#allocation2 + $0x98] sm:$0xff] %vm26_vm0, %v647_v37  ;;  %v749_v15 = vadd.f32 %v744_v11, %v717_v46  ;;  %v778_v18 = vadd.f32 %v773_v12, %v768_v9  ;;  %2361 = vset.pattern.permute.xlu1 %v2429_v53  ;;  %v1361_v11 = vpop.f32.mrf.mxu0 }
 0x14b   :  { %921 = vperm.xlu1 %2361, %v3139_v48  }
 0x14c   :  { %v758_v51 = vadd.f32 %v3177_v8, %v749_v15  ;;  %v808_v4 = vadd.f32 %v803_v14, %v778_v18  ;;  %2362 = vset.pattern.permute.xlu2 %v2430_v58  ;;  %v3189_v17 = vpop.permute.xlu2 %732  ;;  %v805_v15 = vmul.f32 %v3166_v24, %v793_v59  ;;  %v1483_v18 = vpop.f32.mrf.mxu1 }
 0x14d   :  { %981 = vperm.xlu2 %2362, %v3139_v48   ;;  %v775_v9 = vmul.f32 %v3149_v42, %v3189_v17  ;;  %v746_v12 = vmul.f32 %v3166_v24, %v3189_v17 }
 0x14e   :  { %v813_v61 = vadd.f32 %v3177_v8, %v808_v4  ;;  %v763_v20 = vmax.f32 %v758_v51, 0.0  ;;  %v1484_v4 = vadd.f32 %v1483_v18, %v1361_v11 }
 0x150   :  { %v818_v21 = vmax.f32 %v813_v61, 0.0  ;;  %v667_v10 = vpop.permute.xlu1 %666 }
 0x151   :  { %v686_v25 = vmul.f32 %v3144_v50, %v667_v10  ;;  %v1227_v1 = vld [vmem:[#allocation2 + $0x98] sm:$0xff] }
 0x152   :  { %v823_v23 = vmax.f32 %v763_v20, %v818_v21  ;;  %2173 = vmatmul.msk.f32.gmra.mxu0 %vm26_vm0, %v1227_v1  ;;  %2208 = vmatmul.msk.f32.gmra.mxu1 %vm26_vm0, %v1227_v1 }
 0x153   :  { %2365 = vset.pattern.permute.xlu1 %v2428_v6  ;;  %2228 = vmatmul.msk.f32.gmra.mxu2 %vm26_vm0, %v1227_v1  ;;  %v718_v5 = vadd.f32 %v713_v35, %v686_v25  ;;  %v774_v6 = vmul.f32 %v3149_v42, %v3010_v56  ;;  %v3223_v56 = vld [vmem:[%s3696_s4] ss:$0 sm:$0xff] }
 0x154   :  { %v828_v27 = vsel %vm73_vm1, %v823_v23, 0.0  ;;  %893 = vperm.xlu1 %2365, %v3063_v28   ;;  %v1486_v31 = vpop.f32.mrf.mxu1 }
 0x155   :  { %833 = vst.msk [vmem:[#allocation2 + $0xa0] sm:$0xff] %vm26_vm0, %v828_v27  ;;  %2366 = vset.pattern.permute.xlu2 %v2429_v53  ;;  %v750_v32 = vadd.f32 %v745_v19, %v718_v5  ;;  %v779_v36 = vadd.f32 %v774_v6, %v769_v30  ;;  %v1364_v6 = vpop.f32.mrf.mxu0 }
 0x156   :  { %925 = vperm.xlu2 %2366, %v3063_v28   ;;  %v3209_v34 = vpop.permute.xlu2 %704 }
 0x157   :  { %v759_v39 = vadd.f32 %v3177_v8, %v750_v32  ;;  %v1487_v32 = vadd.f32 %v1486_v31, %v1364_v6  ;;  %v715_v41 = vmul.f32 %v3149_v42, %v3209_v34 }
 0x159   :  { %v764_v22 = vmax.f32 %v759_v39, 0.0 }
 0x15a   :  { %v789_v38 = vpop.permute.xlu1 %788 }
 0x15b   :  { %v804_v47 = vmul.f32 %v3166_v24, %v789_v38 }
 0x15c   :  { %2367 = vset.pattern.permute.xlu1 %v2430_v58  ;;  %v1711_v54 = vpop.f32.mrf.mxu2  ;;  %v1228_v45 = vld [vmem:[#allocation2 + $0xa0] sm:$0xff] }
 0x15d   :  { %v809_v49 = vadd.f32 %v804_v47, %v779_v36  ;;  %v1801_v44 = vadd.f32 %v1711_v54, %v1481_v40  ;;  %985 = vperm.xlu1 %2367, %v3063_v28   ;;  %2174 = vmatmul.msk.f32.gmra.mxu0 %vm26_vm0, %v1228_v45  ;;  %v771_v54 = vmul.f32 %v3144_v50, %v3209_v34  ;;  %v1367_v34 = vpop.f32.mrf.mxu0 }
 0x15e   :  { %2209 = vmatmul.msk.f32.gmra.mxu1 %vm26_vm0, %v1228_v45  ;;  %2229 = vmatmul.msk.f32.gmra.mxu2 %vm26_vm0, %v1228_v45 }
 0x15f   :  { %v814_v2 = vadd.f32 %v3177_v8, %v809_v49  ;;  %v1835_v52 = vadd.f32 %v3223_v56, %v1801_v44  ;;  %1031 = vperm.xlu2 %2366, %v2960_v0   ;;  %v797_v62 = vpop.permute.xlu2 %796 }
 0x160   :  { %v806_v44 = vmul.f32 %v3166_v24, %v797_v62 }
 0x161   :  { %v819_v43 = vmax.f32 %v814_v2, 0.0  ;;  %v1865_v57 = vmax.f32 %v1835_v52, 0.0 }
 0x163   :  { %v824_v26 = vmax.f32 %v764_v22, %v819_v43  ;;  %1896 = vst.msk [vmem:[#allocation3] sm:$0xff] %vm1895_vm3, %v1865_v57  ;;  %v701_v46 = vpop.permute.xlu1 %700 }
 0x164   :  { %v714_v14 = vmul.f32 %v3149_v42, %v701_v46  ;;  %v770_v37 = vmul.f32 %v3144_v50, %v701_v46 }
 0x165   :  { %834 = vst.msk [vmem:[#allocation2 + $0xa8] sm:$0xff] %vm26_vm0, %v824_v26  ;;  %2368 = vset.pattern.permute.xlu1 %v2431_v7  ;;  %v1489_v26 = vpop.f32.mrf.mxu1 }
 0x166   :  { %v719_v51 = vadd.f32 %v714_v14, %v687_v63  ;;  %v780_v3 = vadd.f32 %v775_v9, %v770_v37  ;;  %1094 = vperm.xlu1 %2368, %v2960_v0   ;;  %v1490_v11 = vadd.f32 %v1489_v26, %v1367_v34 }
 0x167   :  { %2369 = vset.pattern.permute.xlu2 %v2432_v33 }
 0x168   :  { %v751_v61 = vadd.f32 %v746_v12, %v719_v51  ;;  %v810_v17 = vadd.f32 %v805_v15, %v780_v3  ;;  %1154 = vperm.xlu2 %2369, %v2960_v0   ;;  %v3252_v25 = vpop.permute.xlu2 %740  ;;  %v689_v12 = vmul.f32 %v3144_v50, %v3215_v13 }
 0x16a   :  { %v760_v20 = vadd.f32 %v3177_v8, %v751_v61  ;;  %v815_v21 = vadd.f32 %v3177_v8, %v810_v17  ;;  %v1714_v10 = vpop.f32.mrf.mxu2  ;;  %v748_v17 = vmul.f32 %v3166_v24, %v3252_v25 }
 0x16b   :  { %v1802_v35 = vadd.f32 %v1714_v10, %v1484_v4 }
 0x16c   :  { %v765_v1 = vmax.f32 %v760_v20, 0.0  ;;  %v820_v23 = vmax.f32 %v815_v21, 0.0  ;;  %v677_v27 = vpop.permute.xlu1 %676  ;;  %v1229_v19 = vld [vmem:[#allocation2 + $0xa8] sm:$0xff]  ;;  %v777_v21 = vmul.f32 %v3149_v42, %v3252_v25 }
 0x16d   :  { %v1836_v5 = vadd.f32 %v3223_v56, %v1802_v35  ;;  %2175 = vmatmul.msk.f32.gmra.mxu0 %vm26_vm0, %v1229_v19  ;;  %2210 = vmatmul.msk.f32.gmra.mxu1 %vm26_vm0, %v1229_v19  ;;  %v688_v38 = vmul.f32 %v3144_v50, %v677_v27  ;;  %v3305_v27 = vld [vmem:[%s3693_s1] ss:$0 sm:$0xff] }
 0x16e   :  { %v825_v0 = vmax.f32 %v765_v1, %v820_v23  ;;  %2230 = vmatmul.msk.f32.gmra.mxu2 %vm26_vm0, %v1229_v19  ;;  %2370 = vset.pattern.permute.xlu1 %v2429_v53  ;;  %v1370_v19 = vpop.f32.mrf.mxu0 }
 0x16f   :  { %v1866_v30 = vmax.f32 %v1836_v5, 0.0  ;;  %1036 = vperm.xlu1 %2370, %v3035_v16   ;;  %v720_v49 = vadd.f32 %v715_v41, %v688_v38  ;;  %v3327_v41 = vld [vmem:[%s3693_s1 + $0x2] ss:$0 sm:$0xff] }
 0x170   :  { %835 = vst.msk [vmem:[#allocation2 + $0xb0] sm:$0xff] %vm26_vm0, %v825_v0  ;;  %2371 = vset.pattern.permute.xlu2 %v2429_v53  ;;  %v1492_v0 = vpop.f32.mrf.mxu1 }
 0x171   :  { %1897 = vst.msk [vmem:[#allocation3 + $0x8] sm:$0xff] %vm1895_vm3, %v1866_v30  ;;  %1041 = vperm.xlu2 %2371, %v3084_v55   ;;  %v3267_v47 = vpop.permute.xlu2 %846 }
 0x172   :  { %v1717_v40 = vpop.f32.mrf.mxu2 }
 0x173   :  { %v1803_v36 = vadd.f32 %v1717_v40, %v1487_v32  ;;  %v1493_v32 = vadd.f32 %v1492_v0, %v1370_v19 }
 0x175   :  { %v1837_v45 = vadd.f32 %v3223_v56, %v1803_v36  ;;  %v737_v39 = vpop.permute.xlu1 %736 }
 0x176   :  { %v747_v2 = vmul.f32 %v3166_v24, %v737_v39  ;;  %v776_v52 = vmul.f32 %v3149_v42, %v737_v39 }
 0x177   :  { %v1867_v22 = vmax.f32 %v1837_v45, 0.0  ;;  %2372 = vset.pattern.permute.xlu1 %v2430_v58  ;;  %v1230_v43 = vld [vmem:[#allocation2 + $0xb0] sm:$0xff] }
 0x178   :  { %v752_v57 = vadd.f32 %v747_v2, %v720_v49  ;;  %v781_v59 = vadd.f32 %v776_v52, %v771_v54  ;;  %1070 = vperm.xlu1 %2372, %v3084_v55   ;;  %2176 = vmatmul.msk.f32.gmra.mxu0 %vm26_vm0, %v1230_v43 }
 0x179   :  { %1898 = vst.msk [vmem:[#allocation3 + $0x10] sm:$0xff] %vm1895_vm3, %v1867_v22  ;;  %2211 = vmatmul.msk.f32.gmra.mxu1 %vm26_vm0, %v1230_v43  ;;  %2231 = vmatmul.msk.f32.gmra.mxu2 %vm26_vm0, %v1230_v43 }
 0x17a   :  { %v761_v62 = vadd.f32 %v3177_v8, %v752_v57  ;;  %v811_v9 = vadd.f32 %v806_v44, %v781_v59  ;;  %2373 = vset.pattern.permute.xlu2 %v2431_v7  ;;  %v970_v46 = vpop.permute.xlu2 %969  ;;  %v3337_v44 = vld [vmem:[%s3694_s2] ss:$0 sm:$0xff] }
 0x17b   :  { %1098 = vperm.xlu2 %2373, %v3035_v16   ;;  %v988_v22 = vmul.f32 %v3327_v41, %v970_v46 }
 0x17c   :  { %v816_v63 = vadd.f32 %v3177_v8, %v811_v9  ;;  %v766_v14 = vmax.f32 %v761_v62, 0.0  ;;  %v1373_v62 = vpop.f32.mrf.mxu0 }
 0x17e   :  { %v821_v37 = vmax.f32 %v816_v63, 0.0  ;;  %v1720_v15 = vpop.f32.mrf.mxu2  ;;  %v709_v18 = vpop.permute.xlu1 %708 }
 0x17f   :  { %v1804_v51 = vadd.f32 %v1720_v15, %v1490_v11  ;;  %v716_v3 = vmul.f32 %v3149_v42, %v709_v18  ;;  %v772_v10 = vmul.f32 %v3144_v50, %v709_v18  ;;  %v3310_v42 = vld [vmem:[%s3693_s1 + $0x1] ss:$0 sm:$0xff]  ;;  %v1495_v63 = vpop.f32.mrf.mxu1 }
 0x180   :  { %v826_v4 = vmax.f32 %v766_v14, %v821_v37  ;;  %2375 = vset.pattern.permute.xlu1 %v2432_v33 }
 0x181   :  { %v1838_v61 = vadd.f32 %v3223_v56, %v1804_v51  ;;  %1158 = vperm.xlu1 %2375, %v3035_v16   ;;  %v721_v13 = vadd.f32 %v716_v3, %v689_v12  ;;  %v782_v23 = vadd.f32 %v777_v21, %v772_v10  ;;  %v1496_v12 = vadd.f32 %v1495_v63, %v1373_v62 }
 0x182   :  { %836 = vst.msk [vmem:[#allocation2 + $0xb8] sm:$0xff] %vm26_vm0, %v826_v4 }
 0x183   :  { %v1868_v20 = vmax.f32 %v1838_v61, 0.0  ;;  %2376 = vset.pattern.permute.xlu2 %v2432_v33  ;;  %v753_v35 = vadd.f32 %v748_v17, %v721_v13  ;;  %v3300_v16 = vpop.permute.xlu2 %881 }
 0x184   :  { %1162 = vperm.xlu2 %2376, %v3084_v55   ;;  %v878_v55 = vpop.permute.xlu0 %877  ;;  %v1376_v19 = vpop.f32.mrf.mxu0 }
 0x185   :  { %1899 = vst.msk [vmem:[#allocation3 + $0x18] sm:$0xff] %vm1895_vm3, %v1868_v20  ;;  %v762_v5 = vadd.f32 %v3177_v8, %v753_v35  ;;  %v897_v30 = vmul.f32 %v3310_v42, %v878_v55  ;;  %v953_v54 = vmul.f32 %v3305_v27, %v878_v55 }
 0x187   :  { %v801_v1 = vpop.permute.xlu1 %800  ;;  %v767_v38 = vmax.f32 %v762_v5, 0.0 }
 0x188   :  { %v807_v50 = vmul.f32 %v3166_v24, %v801_v1  ;;  %v870_v24 = vmul.f32 %v3305_v27, %v3267_v47 }
 0x189   :  { %2377 = vset.pattern.permute.xlu1 %v2429_v53  ;;  %v1231_v25 = vld [vmem:[#allocation2 + $0xb8] sm:$0xff] }
 0x18a   :  { %v812_v6 = vadd.f32 %v807_v50, %v782_v23  ;;  %1046 = vperm.xlu1 %2377, %v3139_v48   ;;  %2177 = vmatmul.msk.f32.gmra.mxu0 %vm26_vm0, %v1231_v25  ;;  %v902_v45 = vadd.f32 %v897_v30, %v870_v24 }
 0x18b   :  { %2212 = vmatmul.msk.f32.gmra.mxu1 %vm26_vm0, %v1231_v25  ;;  %2232 = vmatmul.msk.f32.gmra.mxu2 %vm26_vm0, %v1231_v25 }
 0x18c   :  { %v817_v31 = vadd.f32 %v3177_v8, %v812_v6  ;;  %2378 = vset.pattern.permute.xlu2 %v2430_v58  ;;  %v3331_v8 = vpop.permute.xlu2 %856  ;;  %v914_v11 = vpop.permute.xlu0 %913 }
 0x18d   :  { %1074 = vperm.xlu2 %2378, %v3139_v48   ;;  %v930_v21 = vmul.f32 %v3327_v41, %v914_v11  ;;  %v959_v35 = vmul.f32 %v3310_v42, %v914_v11 }
 0x18e   :  { %v822_v40 = vmax.f32 %v817_v31, 0.0  ;;  %v1723_v36 = vpop.f32.mrf.mxu2 }
 0x18f   :  { %v1805_v47 = vadd.f32 %v1723_v36, %v1493_v32 }
 0x190   :  { %v827_v39 = vmax.f32 %v767_v38, %v822_v40  ;;  %v910_v49 = vpop.permute.xlu1 %909 }
 0x191   :  { %v1839_v58 = vadd.f32 %v3223_v56, %v1805_v47  ;;  %v929_v2 = vmul.f32 %v3327_v41, %v910_v49  ;;  %v958_v52 = vmul.f32 %v3310_v42, %v910_v49 }
 0x192   :  { %v832_v43 = vsel %vm82_vm2, %v827_v39, 0.0  ;;  %2379 = vset.pattern.permute.xlu1 %v2432_v33 }
 0x193   :  { %837 = vst.msk [vmem:[#allocation2 + $0xc0] sm:$0xff] %vm26_vm0, %v832_v43  ;;  %v1869_v57 = vmax.f32 %v1839_v58, 0.0  ;;  %v934_v59 = vadd.f32 %v929_v2, %v902_v45  ;;  %v963_v34 = vadd.f32 %v958_v52, %v953_v54  ;;  %1166 = vperm.xlu1 %2379, %v3139_v48   ;;  %v898_v48 = vmul.f32 %v3310_v42, %v3300_v16 }
 0x194   :  { %v3369_v1 = vpop.permute.xlu0 %866  ;;  %v872_v54 = vmul.f32 %v3305_v27, %v3331_v8  ;;  %v1379_v8 = vpop.f32.mrf.mxu0 }
 0x195   :  { %1900 = vst.msk [vmem:[#allocation3 + $0x20] sm:$0xff] %vm1895_vm3, %v1869_v57  ;;  %v943_v9 = vadd.f32 %v3337_v44, %v934_v59  ;;  %v993_v26 = vadd.f32 %v988_v22, %v963_v34  ;;  %2380 = vset.pattern.permute.xlu2 %v2429_v53  ;;  %v918_v61 = vpop.permute.xlu2 %917 }
 0x196   :  { %1051 = vperm.xlu2 %2380, %v3063_v28   ;;  %v960_v36 = vmul.f32 %v3310_v42, %v918_v61  ;;  %v931_v49 = vmul.f32 %v3327_v41, %v918_v61 }
 0x197   :  { %v998_v46 = vadd.f32 %v3337_v44, %v993_v26  ;;  %v948_v14 = vmax.f32 %v943_v9, 0.0 }
 0x199   :  { %v1003_v37 = vmax.f32 %v998_v46, 0.0  ;;  %v852_v15 = vpop.permute.xlu1 %851  ;;  %v1726_v18 = vpop.f32.mrf.mxu2 }
 0x19a   :  { %v871_v51 = vmul.f32 %v3305_v27, %v852_v15  ;;  %v1806_v3 = vadd.f32 %v1726_v18, %v1496_v12  ;;  %v1232_v4 = vld [vmem:[#allocation2 + $0xc0] sm:$0xff] }
 0x19b   :  { %v1008_v53 = vmax.f32 %v948_v14, %v1003_v37  ;;  %2382 = vset.pattern.permute.xlu1 %v2431_v7  ;;  %2178 = vmatmul.msk.f32.gmra.mxu0 %vm26_vm0, %v1232_v4  ;;  %v954_v7 = vmul.f32 %v3305_v27, %v3300_v16  ;;  %v1498_v16 = vpop.f32.mrf.mxu1 }
 0x19c   :  { %v1840_v17 = vadd.f32 %v3223_v56, %v1806_v3  ;;  %2213 = vmatmul.msk.f32.gmra.mxu1 %vm26_vm0, %v1232_v4  ;;  %2233 = vmatmul.msk.f32.gmra.mxu2 %vm26_vm0, %v1232_v4  ;;  %v903_v20 = vadd.f32 %v898_v48, %v871_v51  ;;  %v1499_v24 = vadd.f32 %v1498_v16, %v1376_v19  ;;  %v978_v40 = vpop.permute.xlu0 %977 }
 0x19d   :  { %v1013_v13 = vsel %vm73_vm1, %v1008_v53, 0.0  ;;  %1110 = vperm.xlu1 %2382, %v3063_v28   ;;  %v964_v55 = vadd.f32 %v959_v35, %v954_v7  ;;  %v990_v52 = vmul.f32 %v3327_v41, %v978_v40  ;;  %v874_v16 = vmul.f32 %v3305_v27, %v3369_v1 }
 0x19e   :  { %1018 = vst.msk [vmem:[#allocation2 + $0xc8] sm:$0xff] %vm26_vm0, %v1013_v13  ;;  %v1870_v10 = vmax.f32 %v1840_v17, 0.0  ;;  %2383 = vset.pattern.permute.xlu2 %v2432_v33  ;;  %v935_v23 = vadd.f32 %v930_v21, %v903_v20  ;;  %v890_v5 = vpop.permute.xlu2 %889 }
 0x19f   :  { %1170 = vperm.xlu2 %2383, %v3063_v28   ;;  %v900_v61 = vmul.f32 %v3310_v42, %v890_v5  ;;  %v956_v17 = vmul.f32 %v3305_v27, %v890_v5 }
 0x1a0   :  { %1901 = vst.msk [vmem:[#allocation3 + $0x28] sm:$0xff] %vm1895_vm3, %v1870_v10  ;;  %v944_v33 = vadd.f32 %v3337_v44, %v935_v23 }
 0x1a2   :  { %v974_v50 = vpop.permute.xlu1 %973  ;;  %v949_v31 = vmax.f32 %v944_v33, 0.0 }
 0x1a3   :  { %v989_v25 = vmul.f32 %v3327_v41, %v974_v50  ;;  %v1501_v9 = vpop.f32.mrf.mxu1 }
 0x1a4   :  { %v1502_v46 = vadd.f32 %v1501_v9, %v1379_v8 }
 0x1a5   :  { %v994_v6 = vadd.f32 %v989_v25, %v964_v55  ;;  %v1233_v0 = vld [vmem:[#allocation2 + $0xc8] sm:$0xff]  ;;  %v1382_v55 = vpop.f32.mrf.mxu0 }
 0x1a6   :  { %2179 = vmatmul.msk.f32.gmra.mxu0 %vm26_vm0, %v1233_v0  ;;  %2214 = vmatmul.msk.f32.gmra.mxu1 %vm26_vm0, %v1233_v0 }
 0x1a7   :  { %v999_v28 = vadd.f32 %v3337_v44, %v994_v6  ;;  %2234 = vmatmul.msk.f32.gmra.mxu2 %vm26_vm0, %v1233_v0  ;;  %v982_v59 = vpop.permute.xlu2 %981 }
 0x1a8   :  { %v1729_v30 = vpop.f32.mrf.mxu2  ;;  %v991_v21 = vmul.f32 %v3327_v41, %v982_v59 }
 0x1a9   :  { %v1004_v32 = vmax.f32 %v999_v28, 0.0  ;;  %v1807_v38 = vadd.f32 %v1729_v30, %v1499_v24 }
 0x1ab   :  { %v1009_v47 = vmax.f32 %v949_v31, %v1004_v32  ;;  %v1841_v45 = vadd.f32 %v3223_v56, %v1807_v38  ;;  %v886_v39 = vpop.permute.xlu1 %885  ;;  %v1504_v33 = vpop.f32.mrf.mxu1 }
 0x1ac   :  { %v899_v58 = vmul.f32 %v3310_v42, %v886_v39  ;;  %v955_v2 = vmul.f32 %v3305_v27, %v886_v39  ;;  %v1505_v0 = vadd.f32 %v1504_v33, %v1382_v55 }
 0x1ad   :  { %1019 = vst.msk [vmem:[#allocation2 + $0xd0] sm:$0xff] %vm26_vm0, %v1009_v47  ;;  %v1871_v22 = vmax.f32 %v1841_v45, 0.0  ;;  %v1385_v59 = vpop.f32.mrf.mxu0 }
 0x1ae   :  { %v904_v43 = vadd.f32 %v899_v58, %v872_v54  ;;  %v965_v57 = vadd.f32 %v960_v36, %v955_v2 }
 0x1af   :  { %1902 = vst.msk [vmem:[#allocation3 + $0x30] sm:$0xff] %vm1895_vm3, %v1871_v22  ;;  %v3423_v22 = vld [vmem:[%s3693_s1] ss:$0 sm:$0xff] }
 0x1b0   :  { %v936_v34 = vadd.f32 %v931_v49, %v904_v43  ;;  %v995_v62 = vadd.f32 %v990_v52, %v965_v57  ;;  %v926_v3 = vpop.permute.xlu2 %925  ;;  %v3428_v43 = vld [vmem:[%s3693_s1 + $0x1] ss:$0 sm:$0xff]  ;;  %v1063_v57 = vpop.permute.xlu0 %1062 }
 0x1b1   :  { %v933_v54 = vmul.f32 %v3327_v41, %v926_v3  ;;  %v962_v39 = vmul.f32 %v3310_v42, %v926_v3 }
 0x1b2   :  { %v945_v26 = vadd.f32 %v3337_v44, %v936_v34  ;;  %v1000_v63 = vadd.f32 %v3337_v44, %v995_v62 }
 0x1b3   :  { %v1507_v62 = vpop.f32.mrf.mxu1 }
 0x1b4   :  { %v950_v11 = vmax.f32 %v945_v26, 0.0  ;;  %v1005_v12 = vmax.f32 %v1000_v63, 0.0  ;;  %v1732_v14 = vpop.f32.mrf.mxu2  ;;  %v862_v37 = vpop.permute.xlu1 %861  ;;  %v1234_v15 = vld [vmem:[#allocation2 + $0xd0] sm:$0xff]  ;;  %v1082_v26 = vmul.f32 %v3428_v43, %v1063_v57  ;;  %v1508_v63 = vadd.f32 %v1507_v62, %v1385_v59 }
 0x1b5   :  { %v1808_v48 = vadd.f32 %v1732_v14, %v1502_v46  ;;  %2180 = vmatmul.msk.f32.gmra.mxu0 %vm26_vm0, %v1234_v15  ;;  %2215 = vmatmul.msk.f32.gmra.mxu1 %vm26_vm0, %v1234_v15  ;;  %v873_v53 = vmul.f32 %v3305_v27, %v862_v37  ;;  %v3444_v46 = vld [vmem:[%s3693_s1 + $0x2] ss:$0 sm:$0xff] }
 0x1b6   :  { %v1010_v18 = vmax.f32 %v950_v11, %v1005_v12  ;;  %2235 = vmatmul.msk.f32.gmra.mxu2 %vm26_vm0, %v1234_v15  ;;  %v1138_v15 = vmul.f32 %v3423_v22, %v1063_v57 }
 0x1b7   :  { %v1842_v51 = vadd.f32 %v3223_v56, %v1808_v48  ;;  %v905_v20 = vadd.f32 %v900_v61, %v873_v53  ;;  %v3452_v61 = vld [vmem:[%s3694_s2] ss:$0 sm:$0xff] }
 0x1b8   :  { %1020 = vst.msk [vmem:[#allocation2 + $0xd8] sm:$0xff] %vm26_vm0, %v1010_v18 }
 0x1b9   :  { %v1872_v4 = vmax.f32 %v1842_v51, 0.0  ;;  %v1032_v5 = vpop.permute.xlu2 %1031 }
 0x1ba   :  { %v1055_v9 = vmul.f32 %v3423_v22, %v1032_v5 }
 0x1bb   :  { %1903 = vst.msk [vmem:[#allocation3 + $0x38] sm:$0xff] %vm1895_vm3, %v1872_v4 }
 0x1bc   :  { %v1087_v18 = vadd.f32 %v1082_v26, %v1055_v9 }
 0x1bd   :  { %v922_v13 = vpop.permute.xlu1 %921 }
 0x1be   :  { %v932_v10 = vmul.f32 %v3327_v41, %v922_v13  ;;  %v961_v7 = vmul.f32 %v3310_v42, %v922_v13 }
 0x1bf   :  { %v3403_v35 = vld [vmem:[#allocation2 + $0xd8] sm:$0xff] }
 0x1c0   :  { %v937_v23 = vadd.f32 %v932_v10, %v905_v20  ;;  %v966_v50 = vadd.f32 %v961_v7, %v956_v17  ;;  %2181 = vmatmul.msk.f32.gmra.mxu0 %vm26_vm0, %v3403_v35  ;;  %2236 = vmatmul.msk.f32.gmra.mxu2 %vm26_vm0, %v3403_v35  ;;  %v1067_v7 = vpop.permute.xlu0 %1066 }
 0x1c2   :  { %v946_v25 = vadd.f32 %v3337_v44, %v937_v23  ;;  %v996_v19 = vadd.f32 %v991_v21, %v966_v50  ;;  %v1155_v49 = vpop.permute.xlu2 %1154  ;;  %v1388_v23 = vpop.f32.mrf.mxu0 }
 0x1c3   :  { %v1173_v4 = vmul.f32 %v3444_v46, %v1155_v49 }
 0x1c4   :  { %v1001_v6 = vadd.f32 %v3337_v44, %v996_v19  ;;  %v951_v24 = vmax.f32 %v946_v25, 0.0  ;;  %v1510_v25 = vpop.f32.mrf.mxu1 }
 0x1c5   :  { %v1511_v5 = vadd.f32 %v1510_v25, %v1388_v23 }
 0x1c6   :  { %v1006_v28 = vmax.f32 %v1001_v6, 0.0  ;;  %v1735_v30 = vpop.f32.mrf.mxu2  ;;  %v894_v31 = vpop.permute.xlu1 %893 }
 0x1c7   :  { %v1809_v32 = vadd.f32 %v1735_v30, %v1505_v0  ;;  %v901_v38 = vmul.f32 %v3310_v42, %v894_v31  ;;  %v957_v1 = vmul.f32 %v3305_v27, %v894_v31 }
 0x1c8   :  { %v1011_v40 = vmax.f32 %v951_v24, %v1006_v28 }
 0x1c9   :  { %v1843_v36 = vadd.f32 %v3223_v56, %v1809_v32  ;;  %v906_v47 = vadd.f32 %v901_v38, %v874_v16  ;;  %v967_v52 = vadd.f32 %v962_v39, %v957_v1  ;;  %v1083_v1 = vmul.f32 %v3428_v43, %v1067_v7 }
 0x1ca   :  { %1021 = vst.msk [vmem:[#allocation2 + $0xe0] sm:$0xff] %vm26_vm0, %v1011_v40 }
 0x1cb   :  { %v1873_v45 = vmax.f32 %v1843_v36, 0.0  ;;  %v938_v58 = vadd.f32 %v933_v54, %v906_v47  ;;  %v1042_v37 = vpop.permute.xlu2 %1041  ;;  %v1103_v36 = vpop.permute.xlu0 %1102 }
 0x1cc   :  { %v1145_v47 = vmul.f32 %v3428_v43, %v1103_v36  ;;  %v1513_v9 = vpop.f32.mrf.mxu1 }
 0x1cd   :  { %1904 = vst.msk [vmem:[#allocation3 + $0x40] sm:$0xff] %vm1895_vm3, %v1873_v45  ;;  %v947_v8 = vadd.f32 %v3337_v44, %v938_v58  ;;  %v1057_v45 = vmul.f32 %v3423_v22, %v1042_v37 }
 0x1cf   :  { %v986_v2 = vpop.permute.xlu1 %985  ;;  %v952_v11 = vmax.f32 %v947_v8, 0.0 }
 0x1d0   :  { %v992_v42 = vmul.f32 %v3327_v41, %v986_v2  ;;  %v1116_v2 = vmul.f32 %v3444_v46, %v1103_v36 }
 0x1d1   :  { %v3431_v27 = vld [vmem:[#allocation2 + $0xe0] sm:$0xff] }
 0x1d2   :  { %v997_v34 = vadd.f32 %v992_v42, %v967_v52  ;;  %2182 = vmatmul.msk.f32.gmra.mxu0 %vm26_vm0, %v3431_v27  ;;  %2237 = vmatmul.msk.f32.gmra.mxu2 %vm26_vm0, %v3431_v27  ;;  %v1391_v42 = vpop.f32.mrf.mxu0 }
 0x1d4   :  { %v1002_v41 = vadd.f32 %v3337_v44, %v997_v34 }
 0x1d5   :  { %v1099_v33 = vpop.permute.xlu2 %1098 }
 0x1d6   :  { %v1007_v12 = vmax.f32 %v1002_v41, 0.0  ;;  %v1738_v14 = vpop.f32.mrf.mxu2  ;;  %v1115_v34 = vmul.f32 %v3444_v46, %v1099_v33 }
 0x1d7   :  { %v1810_v48 = vadd.f32 %v1738_v14, %v1508_v63  ;;  %v1514_v63 = vadd.f32 %v1513_v9, %v1391_v42 }
 0x1d8   :  { %v1012_v51 = vmax.f32 %v952_v11, %v1007_v12  ;;  %v1095_v3 = vpop.permute.xlu1 %1094  ;;  %v1144_v11 = vmul.f32 %v3428_v43, %v1099_v33  ;;  %v1139_v12 = vmul.f32 %v3423_v22, %v1067_v7 }
 0x1d9   :  { %v1844_v44 = vadd.f32 %v3223_v56, %v1810_v48  ;;  %v1114_v53 = vmul.f32 %v3444_v46, %v1095_v3  ;;  %v1143_v17 = vmul.f32 %v3428_v43, %v1095_v3 }
 0x1da   :  { %v1017_v13 = vsel %vm82_vm2, %v1012_v51, 0.0  ;;  %v1394_v7 = vpop.f32.mrf.mxu0 }
 0x1db   :  { %1022 = vst.msk [vmem:[#allocation2 + $0xe8] sm:$0xff] %vm26_vm0, %v1017_v13  ;;  %v1874_v20 = vmax.f32 %v1844_v44, 0.0  ;;  %v1119_v21 = vadd.f32 %v1114_v53, %v1087_v18  ;;  %v1148_v10 = vadd.f32 %v1143_v17, %v1138_v15  ;;  %v1149_v44 = vadd.f32 %v1144_v11, %v1139_v12 }
 0x1dd   :  { %1905 = vst.msk [vmem:[#allocation3 + $0x48] sm:$0xff] %vm1895_vm3, %v1874_v20  ;;  %v1128_v50 = vadd.f32 %v3452_v61, %v1119_v21  ;;  %v1178_v55 = vadd.f32 %v1173_v4, %v1148_v10 }
 0x1de   :  { %v1163_v54 = vpop.permute.xlu2 %1162 }
 0x1df   :  { %v1183_v19 = vadd.f32 %v3452_v61, %v1178_v55  ;;  %v1133_v6 = vmax.f32 %v1128_v50, 0.0  ;;  %v1175_v52 = vmul.f32 %v3444_v46, %v1163_v54  ;;  %v1516_v55 = vpop.f32.mrf.mxu1  ;;  %v2413_v54 = vld [vmem:[%s3695_s3 + $0x58] sm:$0xff] }
 0x1e1   :  { %v1188_v0 = vmax.f32 %v1183_v19, 0.0  ;;  %v1037_v16 = vpop.permute.xlu1 %1036  ;;  %v1741_v24 = vpop.f32.mrf.mxu2 }
 0x1e2   :  { %v1811_v28 = vadd.f32 %v1741_v24, %v1511_v5  ;;  %v3462_v30 = vld [vmem:[#allocation2 + $0xe8] sm:$0xff]  ;;  %v1056_v39 = vmul.f32 %v3423_v22, %v1037_v16  ;;  %v1517_v5 = vadd.f32 %v1516_v55, %v1394_v7  ;;  %v1397_v9 = vpop.f32.mrf.mxu0 }
 0x1e3   :  { %v1193_v31 = vmax.f32 %v1133_v6, %v1188_v0  ;;  %2183 = vmatmul.msk.f32.gmra.mxu0 %vm26_vm0, %v3462_v30  ;;  %2238 = vmatmul.msk.f32.gmra.mxu2 %vm26_vm0, %v3462_v30 }
 0x1e4   :  { %v1845_v32 = vadd.f32 %v3223_v56, %v1811_v28  ;;  %v1088_v62 = vadd.f32 %v1083_v1, %v1056_v39  ;;  %v2414_v1 = vld [vmem:[%s3695_s3 + $0x50] sm:$0xff] }
 0x1e5   :  { %v1198_v38 = vsel %vm73_vm1, %v1193_v31, 0.0  ;;  %v1107_v31 = vpop.permute.xlu0 %1106 }
 0x1e6   :  { %1203 = vst.msk [vmem:[#allocation2 + $0xf0] sm:$0xff] %vm26_vm0, %v1198_v38  ;;  %v1875_v40 = vmax.f32 %v1845_v32, 0.0  ;;  %v1120_v48 = vadd.f32 %v1115_v34, %v1088_v62  ;;  %v1117_v36 = vmul.f32 %v3444_v46, %v1107_v31  ;;  %v1146_v39 = vmul.f32 %v3428_v43, %v1107_v31 }
 0x1e7   :  { %v1075_v50 = vpop.permute.xlu2 %1074 }
 0x1e8   :  { %1906 = vst.msk [vmem:[#allocation3 + $0x50] sm:$0xff] %vm1895_vm3, %v1875_v40  ;;  %v1129_v20 = vadd.f32 %v3452_v61, %v1120_v48  ;;  %v1085_v16 = vmul.f32 %v3428_v43, %v1075_v50 }
 0x1ea   :  { %v1071_v49 = vpop.permute.xlu1 %1070  ;;  %v1134_v25 = vmax.f32 %v1129_v20, 0.0 }
 0x1eb   :  { %v1084_v58 = vmul.f32 %v3428_v43, %v1071_v49  ;;  %v1140_v60 = vmul.f32 %v3423_v22, %v1071_v49 }
 0x1ed   :  { %v1089_v57 = vadd.f32 %v1084_v58, %v1057_v45  ;;  %v1150_v59 = vadd.f32 %v1145_v47, %v1140_v60  ;;  %v1242_v8 = vld [vmem:[#allocation2 + $0xf0] sm:$0xff]  ;;  %v1141_v45 = vmul.f32 %v3423_v22, %v1075_v50  ;;  %v2415_v60 = vld [vmem:[%s3695_s3 + $0x48] sm:$0xff]  ;;  %v1079_v62 = vpop.permute.xlu0 %1078 }
 0x1ee   :  { %2184 = vmatmul.msk.f32.gmra.mxu0 %vm26_vm0, %v1242_v8  ;;  %2239 = vmatmul.msk.f32.gmra.mxu2 %vm26_vm0, %v1242_v8 }
 0x1ef   :  { %v1121_v26 = vadd.f32 %v1116_v2, %v1089_v57  ;;  %v1180_v41 = vadd.f32 %v1175_v52, %v1150_v59  ;;  %v1151_v42 = vadd.f32 %v1146_v39, %v1141_v45  ;;  %v2416_v59 = vld [vmem:[%s3695_s3 + $0x40] sm:$0xff]  ;;  %v1970_v39 = vld [vmem:[%s3697_s5 + $0x70] sm:$0xff] }
 0x1f0   :  { %v1052_v49 = vpop.permute.xlu2 %1051 }
 0x1f1   :  { %v1130_v14 = vadd.f32 %v3452_v61, %v1121_v26  ;;  %v1185_v37 = vadd.f32 %v3452_v61, %v1180_v41  ;;  %v1744_v15 = vpop.f32.mrf.mxu2  ;;  %v1519_v41 = vpop.f32.mrf.mxu1  ;;  %v1059_v12 = vmul.f32 %v3423_v22, %v1052_v49 }
 0x1f2   :  { %v1812_v18 = vadd.f32 %v1744_v15, %v1514_v63 }
 0x1f3   :  { %v1135_v51 = vmax.f32 %v1130_v14, 0.0  ;;  %v1190_v3 = vmax.f32 %v1185_v37, 0.0  ;;  %v1159_v4 = vpop.permute.xlu1 %1158  ;;  %v1086_v14 = vmul.f32 %v3428_v43, %v1079_v62  ;;  %v1520_v37 = vadd.f32 %v1519_v41, %v1397_v9 }
 0x1f4   :  { %v1846_v53 = vadd.f32 %v3223_v56, %v1812_v18  ;;  %v1174_v17 = vmul.f32 %v3444_v46, %v1159_v4  ;;  %v1142_v18 = vmul.f32 %v3423_v22, %v1079_v62 }
 0x1f5   :  { %v1195_v13 = vmax.f32 %v1135_v51, %v1190_v3 }
 0x1f6   :  { %v1876_v21 = vmax.f32 %v1846_v53, 0.0  ;;  %v1179_v10 = vadd.f32 %v1174_v17, %v1149_v44  ;;  %v1091_v44 = vadd.f32 %v1086_v14, %v1059_v12 }
 0x1f7   :  { %1205 = vst.msk [vmem:[#allocation2 + $0x100] sm:$0xff] %vm26_vm0, %v1195_v13 }
 0x1f8   :  { %1907 = vst.msk [vmem:[#allocation3 + $0x58] sm:$0xff] %vm1895_vm3, %v1876_v21  ;;  %v1184_v23 = vadd.f32 %v3452_v61, %v1179_v10 }
 0x1f9   :  { %v1171_v15 = vpop.permute.xlu2 %1170 }
 0x1fa   :  { %v1189_v19 = vmax.f32 %v1184_v23, 0.0  ;;  %v1177_v13 = vmul.f32 %v3444_v46, %v1171_v15  ;;  %v1598_v15 = vld [vmem:[#allocation2 + $0x130] sm:$0xff] }
 0x1fc   :  { %v1194_v33 = vmax.f32 %v1134_v25, %v1189_v19  ;;  %v1747_v6 = vpop.f32.mrf.mxu2  ;;  %v1047_v0 = vpop.permute.xlu1 %1046 }
 0x1fd   :  { %v1813_v24 = vadd.f32 %v1747_v6, %v1517_v5  ;;  %v1058_v28 = vmul.f32 %v3423_v22, %v1047_v0 }
 0x1fe   :  { %1204 = vst.msk [vmem:[#allocation2 + $0xf8] sm:$0xff] %vm26_vm0, %v1194_v33  ;;  %v1244_v32 = vld [vmem:[#allocation2 + $0x100] sm:$0xff]  ;;  %v1522_v33 = vpop.f32.mrf.mxu1 }
 0x1ff   :  { %v1847_v38 = vadd.f32 %v3223_v56, %v1813_v24  ;;  %2186 = vmatmul.msk.f32.vlgmr.msra.gmra.mxu3 %vm26_vm0, %v1244_v32  ;;  %v1090_v40 = vadd.f32 %v1085_v16, %v1058_v28 }
 0x200   :  { %2272 = vmatpush.msra.mxu3 %v2413_v54 }
 0x201   :  { %v1877_v47 = vmax.f32 %v1847_v38, 0.0  ;;  %v1122_v58 = vadd.f32 %v1117_v36, %v1090_v40  ;;  %v1595_v40 = vld [vmem:[#allocation2 + $0x118] sm:$0xff] }
 0x202   :  { %2273 = vmatpush.msra.mxu3 %v2414_v1  ;;  %v1596_v1 = vld [vmem:[#allocation2 + $0x120] sm:$0xff] }
 0x203   :  { %1908 = vst.msk [vmem:[#allocation3 + $0x60] sm:$0xff] %vm1895_vm3, %v1877_v47  ;;  %v1131_v8 = vadd.f32 %v3452_v61, %v1122_v58  ;;  %v1971_v47 = vld [vmem:[%s3697_s5 + $0x78] sm:$0xff] }
 0x204   :  { %2274 = vmatpush.msra.mxu3 %v2415_v60  ;;  %v1967_v58 = vld [vmem:[%s3697_s5 + $0x58] sm:$0xff] }
 0x205   :  { %v1167_v2 = vpop.permute.xlu1 %1166  ;;  %v1243_v52 = vld [vmem:[#allocation2 + $0xf8] sm:$0xff]  ;;  %v1136_v63 = vmax.f32 %v1131_v8, 0.0  ;;  %v3576_v8 = vld [vmem:[%s3696_s4] ss:$0 sm:$0xff] }
 0x206   :  { %v1176_v57 = vmul.f32 %v3444_v46, %v1167_v2  ;;  %2185 = vmatmul.msk.f32.gmra.mxu0 %vm26_vm0, %v1243_v52  ;;  %2240 = vmatmul.msk.f32.gmra.mxu2 %vm26_vm0, %v1243_v52  ;;  %v1966_v2 = vld [vmem:[%s3697_s5 + $0x50] sm:$0xff] }
 0x207   :  { %2275 = vmatpush.msra.mxu3 %v2416_v59  ;;  %v1964_v59 = vld [vmem:[%s3697_s5 + $0x40] sm:$0xff] }
 0x208   :  { %v1181_v34 = vadd.f32 %v1176_v57, %v1151_v42  ;;  %v1965_v57 = vld [vmem:[%s3697_s5 + $0x48] sm:$0xff] }
 0x20a   :  { %v1186_v26 = vadd.f32 %v3452_v61, %v1181_v34 }
 0x20c   :  { %v1191_v11 = vmax.f32 %v1186_v26, 0.0 }
 0x20e   :  { %v1196_v48 = vmax.f32 %v1136_v63, %v1191_v11  ;;  %v1750_v51 = vpop.f32.mrf.mxu2  ;;  %2241 = vmatmul.msk.f32.gmra.mxu2 %vm26_vm0, %v1244_v32  ;;  %v1525_v32 = vpop.f32.mrf.mxu1  ;;  %v1597_v63 = vld [vmem:[#allocation2 + $0x128] sm:$0xff] }
 0x20f   :  { %v1814_v3 = vadd.f32 %v1750_v51, %v1520_v37  ;;  %v1111_v4 = vpop.permute.xlu1 %1110 }
 0x210   :  { %1206 = vst.msk [vmem:[#allocation2 + $0x108] sm:$0xff] %vm26_vm0, %v1196_v48  ;;  %v1118_v53 = vmul.f32 %v3444_v46, %v1111_v4  ;;  %v1147_v17 = vmul.f32 %v3428_v43, %v1111_v4  ;;  %v1400_v46 = vpop.f32.mrf.mxu0  ;;  %v1599_v48 = vld [vmem:[#allocation2 + $0x138] sm:$0xff] }
 0x211   :  { %v1848_v20 = vadd.f32 %v3223_v56, %v1814_v3  ;;  %v1523_v6 = vadd.f32 %v1522_v33, %v1400_v46  ;;  %v1948_v4 = vld [vmem:[%s3697_s5 + $0x38] sm:$0xff] }
 0x212   :  { %v1123_v21 = vadd.f32 %v1118_v53, %v1091_v44  ;;  %v1152_v10 = vadd.f32 %v1147_v17, %v1142_v18  ;;  %v1947_v53 = vld [vmem:[%s3697_s5 + $0x30] sm:$0xff] }
 0x213   :  { %v1878_v7 = vmax.f32 %v1848_v20, 0.0  ;;  %v1946_v20 = vld [vmem:[%s3697_s5 + $0x28] sm:$0xff] }
 0x214   :  { %v1132_v22 = vadd.f32 %v3452_v61, %v1123_v21  ;;  %v1182_v23 = vadd.f32 %v1177_v13, %v1152_v10  ;;  %v1945_v21 = vld [vmem:[%s3697_s5 + $0x20] sm:$0xff] }
 0x215   :  { %1909 = vst.msk [vmem:[#allocation3 + $0x68] sm:$0xff] %vm1895_vm3, %v1878_v7  ;;  %v1949_v7 = vld [vmem:[#allocation3 + $0x50] sm:$0xff] }
 0x216   :  { %v1187_v50 = vadd.f32 %v3452_v61, %v1182_v23  ;;  %v1137_v25 = vmax.f32 %v1132_v22, 0.0  ;;  %v1528_v60 = vpop.f32.mrf.mxu1  ;;  %v1944_v23 = vld [vmem:[%s3697_s5 + $0x18] sm:$0xff] }
 0x217   :  { %v1245_v55 = vld [vmem:[#allocation2 + $0x108] sm:$0xff] }
 0x218   :  { %v1192_v19 = vmax.f32 %v1187_v50, 0.0  ;;  %2187 = vmatmul.msk.f32.gmra.mxu3 %vm26_vm0, %v1245_v55  ;;  %2242 = vmatmul.msk.f32.gmra.mxu2 %vm26_vm0, %v1245_v55  ;;  %v1403_v31 = vpop.f32.mrf.mxu0  ;;  %v1943_v50 = vld [vmem:[%s3697_s5 + $0x10] sm:$0xff]  ;;  %v1942_v55 = vld [vmem:[%s3697_s5 + $0x8] sm:$0xff] }
 0x219   :  { %v1526_v29 = vadd.f32 %v1525_v32, %v1403_v31 }
 0x21a   :  { %v1197_v43 = vmax.f32 %v1137_v25, %v1192_v19 }
 0x21c   :  { %v1202_v5 = vsel %vm82_vm2, %v1197_v43, 0.0  ;;  %v1950_v43 = vld [vmem:[#allocation3 + $0x58] sm:$0xff] }
 0x21d   :  { %1207 = vst.msk [vmem:[#allocation2 + $0x110] sm:$0xff] %vm26_vm0, %v1202_v5  ;;  %v1941_v5 = vld [vmem:[%s3697_s5] sm:$0xff] }
 0x21e   :  { %v1531_v26 = vpop.f32.mrf.mxu1 }
 0x21f   :  { %v1753_v0 = vpop.f32.mrf.mxu2 }
 0x220   :  { %v1815_v16 = vadd.f32 %v1753_v0, %v1523_v6  ;;  %v1406_v49 = vpop.f32.mrf.mxu0 }
 0x221   :  { %v1529_v52 = vadd.f32 %v1528_v60, %v1406_v49  ;;  %v1931_v60 = vld [vmem:[#allocation3 + $0x28] sm:$0xff] }
 0x222   :  { %v1849_v61 = vadd.f32 %v3223_v56, %v1815_v16 }
 0x224   :  { %v1879_v24 = vmax.f32 %v1849_v61, 0.0  ;;  %v1246_v28 = vld [vmem:[#allocation2 + $0x110] sm:$0xff] }
 0x225   :  { %2188 = vmatmul.msk.f32.gmra.mxu3 %vm26_vm0, %v1246_v28  ;;  %2243 = vmatmul.msk.f32.gmra.mxu2 %vm26_vm0, %v1246_v28  ;;  %v1951_v28 = vld [vmem:[#allocation3 + $0x60] sm:$0xff] }
 0x226   :  { %1910 = vst.msk [vmem:[#allocation3 + $0x70] sm:$0xff] %vm1895_vm3, %v1879_v24  ;;  %v1534_v18 = vpop.f32.mrf.mxu1 }
 0x228   :  { %v1409_v9 = vpop.f32.mrf.mxu0 }
 0x229   :  { %v1532_v41 = vadd.f32 %v1531_v26, %v1409_v9 }
 0x22a   :  { %v1756_v38 = vpop.f32.mrf.mxu2 }
 0x22b   :  { %v1816_v36 = vadd.f32 %v1756_v38, %v1526_v29 }
 0x22d   :  { %v1850_v54 = vadd.f32 %v3223_v56, %v1816_v36  ;;  %2216 = vmatmul.msk.f32.vlgmr.msrb.gmra.mxu3 %vm26_vm0, %v3403_v35  ;;  %2244 = vmatmul.msk.f32.gmra.mxu2 %vm26_vm0, %v1595_v40  ;;  %v1969_v56 = vld [vmem:[%s3697_s5 + $0x68] sm:$0xff]  ;;  %v1968_v35 = vld [vmem:[%s3697_s5 + $0x60] sm:$0xff]  ;;  %v1953_v49 = vld [vmem:[#allocation3 + $0x70] sm:$0xff] }
 0x22e   :  { %1995 = vmatpush.msrb.mxu3 %v1971_v47  ;;  %v1537_v33 = vpop.f32.mrf.mxu1 }
 0x22f   :  { %v1880_v45 = vmax.f32 %v1850_v54, 0.0 }
 0x230   :  { %1996 = vmatpush.msrb.mxu3 %v1970_v39 }
 0x231   :  { %1911 = vst.msk [vmem:[#allocation3 + $0x78] sm:$0xff] %vm1895_vm3, %v1880_v45  ;;  %v1952_v45 = vld [vmem:[#allocation3 + $0x68] sm:$0xff] }
 0x232   :  { %1997 = vmatpush.msrb.mxu3 %v1969_v56 }
 0x234   :  { %1998 = vmatpush.msrb.mxu3 %v1968_v35 }
 0x235   :  { %2217 = vmatmul.msk.f32.gmra.mxu3 %vm26_vm0, %v3431_v27  ;;  %2245 = vmatmul.msk.f32.gmra.mxu2 %vm26_vm0, %v1596_v1 }
 0x236   :  { %1999 = vmatpush.msrb.mxu3 %v1967_v58  ;;  %v1540_v38 = vpop.f32.mrf.mxu1 }
 0x238   :  { %2000 = vmatpush.msrb.mxu3 %v1966_v2  ;;  %v1954_v13 = vld [vmem:[#allocation3 + $0x78] sm:$0xff]  ;;  %v1926_v2 = vld [vmem:[#allocation3] sm:$0xff] }
 0x239   :  { %v1759_v42 = vpop.f32.mrf.mxu2  ;;  %v1959_v22 = vmax.f32 %v1949_v7, %v1954_v13  ;;  %v2085_v13 = vld [vmem:[%s3697_s5 + $0xa0] sm:$0xff] }
 0x23a   :  { %v1817_v27 = vadd.f32 %v1759_v42, %v1529_v52  ;;  %2001 = vmatpush.msrb.mxu3 %v1965_v57  ;;  %v2088_v52 = vld [vmem:[%s3697_s5 + $0xb8] sm:$0xff]  ;;  %v1936_v42 = vmax.f32 %v1926_v2, %v1931_v60 }
 0x23c   :  { %v1851_v34 = vadd.f32 %v3576_v8, %v1817_v27  ;;  %2002 = vmatpush.msrb.mxu3 %v1964_v59  ;;  %v2087_v27 = vld [vmem:[%s3697_s5 + $0xb0] sm:$0xff] }
 0x23d   :  { %2218 = vmatmul.msk.f32.gmra.mxu3 %vm26_vm0, %v3462_v30  ;;  %v1412_v30 = vpop.f32.mrf.mxu0 }
 0x23e   :  { %v1881_v62 = vmax.f32 %v1851_v34, 0.0  ;;  %v1535_v51 = vadd.f32 %v1534_v18, %v1412_v30  ;;  %v1543_v59 = vpop.f32.mrf.mxu1 }
 0x240   :  { %1912 = vst.msk [vmem:[#allocation3 + $0x80] sm:$0xff] %vm1895_vm3, %v1881_v62  ;;  %v1932_v62 = vld [vmem:[#allocation3 + $0x30] sm:$0xff] }
 0x243   :  { %v1762_v11 = vpop.f32.mrf.mxu2 }
 0x244   :  { %v1818_v12 = vadd.f32 %v1762_v11, %v1532_v41  ;;  %v1927_v41 = vld [vmem:[#allocation3 + $0x8] sm:$0xff] }
 0x245   :  { %2246 = vmatmul.msk.f32.vlgmr.msra.gmra.mxu3 %vm26_vm0, %v1597_v63  ;;  %v1415_v19 = vpop.f32.mrf.mxu0  ;;  %v1937_v63 = vmax.f32 %v1927_v41, %v1932_v62 }
 0x246   :  { %v1852_v14 = vadd.f32 %v3576_v8, %v1818_v12  ;;  %2042 = vmatpush.msra.mxu3 %v1948_v4  ;;  %v1538_v6 = vadd.f32 %v1537_v33, %v1415_v19 }
 0x247   :  { %v1955_v25 = vld [vmem:[#allocation3 + $0x80] sm:$0xff] }
 0x248   :  { %v1882_v37 = vmax.f32 %v1852_v14, 0.0  ;;  %2043 = vmatpush.msra.mxu3 %v1947_v53  ;;  %v1960_v46 = vmax.f32 %v1950_v43, %v1955_v25  ;;  %v2083_v25 = vld [vmem:[%s3697_s5 + $0x90] sm:$0xff]  ;;  %v2082_v43 = vld [vmem:[%s3697_s5 + $0x88] sm:$0xff] }
 0x24a   :  { %1913 = vst.msk [vmem:[#allocation3 + $0x88] sm:$0xff] %vm1895_vm3, %v1882_v37  ;;  %2044 = vmatpush.msra.mxu3 %v1946_v20  ;;  %v1546_v37 = vpop.f32.mrf.mxu1  ;;  %v2084_v20 = vld [vmem:[%s3697_s5 + $0x98] sm:$0xff] }
 0x24c   :  { %2045 = vmatpush.msra.mxu3 %v1945_v21 }
 0x24d   :  { %2247 = vmatmul.msk.f32.gmra.mxu3 %vm26_vm0, %v1598_v15  ;;  %v1418_v29 = vpop.f32.mrf.mxu0  ;;  %v2086_v15 = vld [vmem:[%s3697_s5 + $0xa8] sm:$0xff] }
 0x24e   :  { %2046 = vmatpush.msra.mxu3 %v1944_v23  ;;  %v1541_v40 = vadd.f32 %v1540_v38, %v1418_v29  ;;  %v1929_v23 = vld [vmem:[#allocation3 + $0x18] sm:$0xff] }
 0x250   :  { %2047 = vmatpush.msra.mxu3 %v1943_v50 }
 0x251   :  { %v1956_v61 = vld [vmem:[#allocation3 + $0x88] sm:$0xff] }
 0x252   :  { %2048 = vmatpush.msra.mxu3 %v1942_v55  ;;  %v1961_v32 = vmax.f32 %v1951_v28, %v1956_v61  ;;  %v1549_v7 = vpop.f32.mrf.mxu1 }
 0x254   :  { %2049 = vmatpush.msra.mxu3 %v1941_v5  ;;  %v2081_v5 = vld [vmem:[%s3697_s5 + $0x80] sm:$0xff] }
 0x255   :  { %2248 = vmatmul.msk.f32.gmra.mxu3 %vm26_vm0, %v1599_v48  ;;  %v1765_v3 = vpop.f32.mrf.mxu2  ;;  %v1421_v57 = vpop.f32.mrf.mxu0  ;;  %v1933_v48 = vld [vmem:[#allocation3 + $0x38] sm:$0xff] }
 0x256   :  { %v1819_v44 = vadd.f32 %v1765_v3, %v1535_v51  ;;  %v1544_v34 = vadd.f32 %v1543_v59, %v1421_v57  ;;  %v1928_v3 = vld [vmem:[#allocation3 + $0x10] sm:$0xff] }
 0x257   :  { %v1938_v4 = vmax.f32 %v1928_v3, %v1933_v48 }
 0x258   :  { %v1853_v17 = vadd.f32 %v3576_v8, %v1819_v44 }
 0x25a   :  { %v1883_v10 = vmax.f32 %v1853_v17, 0.0  ;;  %v1552_v28 = vpop.f32.mrf.mxu1 }
 0x25c   :  { %1914 = vst.msk [vmem:[#allocation3 + $0x90] sm:$0xff] %vm1895_vm3, %v1883_v10  ;;  %v1934_v10 = vld [vmem:[#allocation3 + $0x40] sm:$0xff] }
 0x25d   :  { %2249 = vmatmul.msk.f32.vlgmr.msrb.gmra.mxu3 %vm1895_vm3, %v1959_v22  ;;  %v1424_v12 = vpop.f32.mrf.mxu0  ;;  %v1939_v55 = vmax.f32 %v1929_v23, %v1934_v10 }
 0x25e   :  { %2112 = vmatpush.msrb.mxu3 %v2088_v52  ;;  %v1547_v30 = vadd.f32 %v1546_v37, %v1424_v12 }
 0x260   :  { %2113 = vmatpush.msrb.mxu3 %v2087_v27 }
 0x262   :  { %2114 = vmatpush.msrb.mxu3 %v2086_v15 }
 0x263   :  { %v1957_v36 = vld [vmem:[#allocation3 + $0x90] sm:$0xff] }
 0x264   :  { %v1962_v39 = vmax.f32 %v1952_v45, %v1957_v36  ;;  %2115 = vmatpush.msrb.mxu3 %v2085_v13 }
 0x265   :  { %2250 = vmatmul.msk.f32.gmra.mxu3 %vm1895_vm3, %v1960_v46  ;;  %v1427_v17 = vpop.f32.mrf.mxu0 }
 0x266   :  { %v1768_v0 = vpop.f32.mrf.mxu2  ;;  %v1550_v22 = vadd.f32 %v1549_v7, %v1427_v17  ;;  %2116 = vmatpush.msrb.mxu3 %v2084_v20 }
 0x267   :  { %v1820_v16 = vadd.f32 %v1768_v0, %v1538_v6  ;;  %v1935_v0 = vld [vmem:[#allocation3 + $0x48] sm:$0xff] }
 0x268   :  { %2117 = vmatpush.msrb.mxu3 %v2083_v25 }
 0x269   :  { %v1854_v24 = vadd.f32 %v3576_v8, %v1820_v16  ;;  %v1930_v16 = vld [vmem:[#allocation3 + $0x20] sm:$0xff] }
 0x26a   :  { %2118 = vmatpush.msrb.mxu3 %v2082_v43  ;;  %v1940_v61 = vmax.f32 %v1930_v16, %v1935_v0 }
 0x26b   :  { %v1884_v31 = vmax.f32 %v1854_v24, 0.0 }
 0x26c   :  { %2119 = vmatpush.msrb.mxu3 %v2081_v5 }
 0x26d   :  { %1915 = vst.msk [vmem:[#allocation3 + $0x98] sm:$0xff] %vm1895_vm3, %v1884_v31  ;;  %2251 = vmatmul.msk.f32.gmra.mxu3 %vm1895_vm3, %v1961_v32  ;;  %v1430_v24 = vpop.f32.mrf.mxu0 }
 0x26e   :  { %v1553_v31 = vadd.f32 %v1552_v28, %v1430_v24 }
 0x271   :  { %v1771_v54 = vpop.f32.mrf.mxu2 }
 0x272   :  { %v1821_v47 = vadd.f32 %v1771_v54, %v1541_v40 }
 0x274   :  { %v1855_v56 = vadd.f32 %v3576_v8, %v1821_v47  ;;  %v1958_v1 = vld [vmem:[#allocation3 + $0x98] sm:$0xff]  ;;  %v1555_v47 = vpop.f32.mrf.mxu1 }
 0x275   :  { %2252 = vmatmul.msk.f32.gmra.mxu3 %vm1895_vm3, %v1962_v39  ;;  %v1963_v58 = vmax.f32 %v1953_v49, %v1958_v1  ;;  %v1433_v36 = vpop.f32.mrf.mxu0 }
 0x276   :  { %v1885_v35 = vmax.f32 %v1855_v56, 0.0  ;;  %v1556_v45 = vadd.f32 %v1555_v47, %v1433_v36 }
 0x278   :  { %1916 = vst.msk [vmem:[#allocation3 + $0xa0] sm:$0xff] %vm1895_vm3, %v1885_v35 }
 0x27c   :  { %v1558_v60 = vpop.f32.mrf.mxu1 }
 0x27d   :  { %2253 = vmatmul.msk.f32.gmra.mxu3 %vm1895_vm3, %v1963_v58 }
 0x282   :  { %v1439_v21 = vpop.f32.mrf.mxu3 }
 0x283   :  { %v1436_v49 = vpop.f32.mrf.mxu0 }
 0x284   :  { %v1559_v2 = vadd.f32 %v1558_v60, %v1436_v49 }
 0x285   :  { %2254 = vmatmul.msk.f32.vlgmr.msra.gmra.mxu3 %vm1895_vm3, %v1936_v42 }
 0x289   :  { %v1774_v9 = vpop.f32.mrf.mxu2 }
 0x28a   :  { %v1822_v26 = vadd.f32 %v1774_v9, %v1544_v34  ;;  %v2066_v34 = vld [vmem:[#allocation3 + $0xa0] sm:$0xff] }
 0x28c   :  { %v1856_v11 = vadd.f32 %v3576_v8, %v1822_v26 }
 0x28d   :  { %2255 = vmatmul.msk.f32.gmra.mxu3 %vm1895_vm3, %v1937_v63 }
 0x28e   :  { %v1886_v14 = vmax.f32 %v1856_v11, 0.0 }
 0x290   :  { %1917 = vst.msk [vmem:[#allocation3 + $0xa8] sm:$0xff] %vm1895_vm3, %v1886_v14 }
 0x291   :  { %v1777_v18 = vpop.f32.mrf.mxu2 }
 0x292   :  { %v1823_v51 = vadd.f32 %v1777_v18, %v1547_v30 }
 0x294   :  { %v1857_v44 = vadd.f32 %v3576_v8, %v1823_v51 }
 0x295   :  { %2256 = vmatmul.msk.f32.gmra.mxu3 %vm1895_vm3, %v1938_v4 }
 0x296   :  { %v1887_v53 = vmax.f32 %v1857_v44, 0.0 }
 0x297   :  { %v2067_v41 = vld [vmem:[#allocation3 + $0xa8] sm:$0xff] }
 0x298   :  { %1918 = vst.msk [vmem:[#allocation3 + $0xb0] sm:$0xff] %vm1895_vm3, %v1887_v53 }
 0x29b   :  { %v1780_v50 = vpop.f32.mrf.mxu2  ;;  %v1442_v33 = vpop.f32.mrf.mxu3 }
 0x29c   :  { %v1824_v19 = vadd.f32 %v1780_v50, %v1550_v22 }
 0x29d   :  { %2257 = vmatmul.msk.f32.gmra.mxu3 %vm1895_vm3, %v1939_v55 }
 0x29e   :  { %v1858_v46 = vadd.f32 %v3576_v8, %v1824_v19 }
 0x29f   :  { %v2068_v44 = vld [vmem:[#allocation3 + $0xb0] sm:$0xff] }
 0x2a0   :  { %v1888_v6 = vmax.f32 %v1858_v46, 0.0 }
 0x2a2   :  { %1919 = vst.msk [vmem:[#allocation3 + $0xb8] sm:$0xff] %vm1895_vm3, %v1888_v6 }
 0x2a5   :  { %2258 = vmatmul.msk.f32.gmra.mxu3 %vm1895_vm3, %v1940_v61 }
 0x2a8   :  { %v1445_v32 = vpop.f32.mrf.mxu3  ;;  %v1783_v29 = vpop.f32.mrf.mxu2 }
 0x2a9   :  { %v1825_v38 = vadd.f32 %v1783_v29, %v1553_v31  ;;  %v2069_v22 = vld [vmem:[#allocation3 + $0xb8] sm:$0xff]  ;;  %v2410_v31 = vld [vmem:[%s3698_s6] ss:$0 sm:$0xff] }
 0x2ab   :  { %v1859_v40 = vadd.f32 %v3576_v8, %v1825_v38 }
 0x2ad   :  { %v1889_v54 = vmax.f32 %v1859_v40, 0.0 }
 0x2af   :  { %1920 = vst.msk [vmem:[#allocation3 + $0xc0] sm:$0xff] %vm1895_vm3, %v1889_v54 }
 0x2b0   :  { %v1561_v39 = vpop.f32.mrf.mxu3  ;;  %v1786_v56 = vpop.f32.mrf.mxu2 }
 0x2b1   :  { %v1826_v35 = vadd.f32 %v1786_v56, %v1556_v45  ;;  %v1562_v11 = vadd.f32 %v1561_v39, %v1439_v21 }
 0x2b3   :  { %v1860_v1 = vadd.f32 %v3576_v8, %v1826_v35 }
 0x2b5   :  { %v1890_v58 = vmax.f32 %v1860_v1, 0.0 }
 0x2b6   :  { %v2070_v25 = vld [vmem:[#allocation3 + $0xc0] sm:$0xff] }
 0x2b7   :  { %1921 = vst.msk [vmem:[#allocation3 + $0xc8] sm:$0xff] %vm1895_vm3, %v1890_v58 }
 0x2b8   :  { %v1564_v52 = vpop.f32.mrf.mxu3  ;;  %v1789_v42 = vpop.f32.mrf.mxu2 }
 0x2b9   :  { %v1827_v57 = vadd.f32 %v1789_v42, %v1559_v2  ;;  %v1565_v48 = vadd.f32 %v1564_v52, %v1442_v33 }
 0x2bb   :  { %v1861_v27 = vadd.f32 %v3576_v8, %v1827_v57 }
 0x2bd   :  { %v1891_v59 = vmax.f32 %v1861_v27, 0.0 }
 0x2be   :  { %v2071_v62 = vld [vmem:[#allocation3 + $0xc8] sm:$0xff] }
 0x2bf   :  { %1922 = vst.msk [vmem:[#allocation3 + $0xd0] sm:$0xff] %vm1895_vm3, %v1891_v59  ;;  %v2076_v9 = vmax.f32 %v2066_v34, %v2071_v62 }
 0x2c0   :  { %v1567_v26 = vpop.f32.mrf.mxu3 }
 0x2c1   :  { %2259 = vmatmul.msk.f32.vlgmr.msrb.gmra.mxu3 %vm1895_vm3, %v2076_v9  ;;  %v1568_v17 = vadd.f32 %v1567_v26, %v1445_v32 }
 0x2c6   :  { %v2072_v63 = vld [vmem:[#allocation3 + $0xd0] sm:$0xff] }
 0x2c7   :  { %v2077_v12 = vmax.f32 %v2067_v41, %v2072_v63 }
 0x2c8   :  { %v1792_v14 = vpop.f32.mrf.mxu3 }
 0x2c9   :  { %v1828_v37 = vadd.f32 %v1792_v14, %v1562_v11  ;;  %2260 = vmatmul.msk.f32.gmra.mxu3 %vm1895_vm3, %v2077_v12 }
 0x2cb   :  { %v1862_v15 = vadd.f32 %v3576_v8, %v1828_v37 }
 0x2cd   :  { %v1892_v30 = vmax.f32 %v1862_v15, 0.0 }
 0x2cf   :  { %1923 = vst.msk [vmem:[#allocation3 + $0xd8] sm:$0xff] %vm1895_vm3, %v1892_v30 }
 0x2d0   :  { %v1795_v18 = vpop.f32.mrf.mxu3 }
 0x2d1   :  { %v1829_v51 = vadd.f32 %v1795_v18, %v1565_v48 }
 0x2d3   :  { %v1863_v3 = vadd.f32 %v3576_v8, %v1829_v51 }
 0x2d5   :  { %v1893_v4 = vmax.f32 %v1863_v3, 0.0 }
 0x2d6   :  { %v2073_v53 = vld [vmem:[#allocation3 + $0xd8] sm:$0xff] }
 0x2d7   :  { %1924 = vst.msk [vmem:[#allocation3 + $0xe0] sm:$0xff] %vm1895_vm3, %v1893_v4  ;;  %v2078_v13 = vmax.f32 %v2068_v44, %v2073_v53 }
 0x2d8   :  { %v1798_v20 = vpop.f32.mrf.mxu3 }
 0x2d9   :  { %v1830_v21 = vadd.f32 %v1798_v20, %v1568_v17  ;;  %2261 = vmatmul.msk.f32.gmra.mxu3 %vm1895_vm3, %v2078_v13 }
 0x2db   :  { %v1864_v10 = vadd.f32 %v3576_v8, %v1830_v21 }
 0x2dd   :  { %v1894_v7 = vmax.f32 %v1864_v10, 0.0 }
 0x2de   :  { %v2074_v23 = vld [vmem:[#allocation3 + $0xe0] sm:$0xff] }
 0x2df   :  { %1925 = vst.msk [vmem:[#allocation3 + $0xe8] sm:$0xff] %vm1895_vm3, %v1894_v7  ;;  %v2079_v50 = vmax.f32 %v2069_v22, %v2074_v23 }
 0x2e0   :  { %v2004_v55 = vpop.f32.mrf.mxu3 }
 0x2e1   :  { %2262 = vmatmul.msk.f32.gmra.mxu3 %vm1895_vm3, %v2079_v50 }
 0x2e6   :  { %v2075_v19 = vld [vmem:[#allocation3 + $0xe8] sm:$0xff] }
 0x2e7   :  { %v2080_v43 = vmax.f32 %v2070_v25, %v2075_v19 }
 0x2e8   :  { %v2007_v46 = vpop.f32.mrf.mxu3 }
 0x2e9   :  { %2263 = vmatmul.msk.f32.gmra.mxu3 %vm1895_vm3, %v2080_v43 }
 0x2f0   :  { %v2010_v5 = vpop.f32.mrf.mxu3 }
 0x2f8   :  { %v2013_v33 = vpop.f32.mrf.mxu3 }
 0x300   :  { %v2016_v6 = vpop.f32.mrf.mxu3 }
 0x308   :  { %v2051_v0 = vpop.f32.mrf.mxu3 }
 0x309   :  { %v2052_v28 = vadd.f32 %v2051_v0, %v2004_v55 }
 0x310   :  { %v2054_v8 = vpop.f32.mrf.mxu3 }
 0x311   :  { %v2055_v40 = vadd.f32 %v2054_v8, %v2007_v46 }
 0x318   :  { %v2057_v16 = vpop.f32.mrf.mxu3 }
 0x319   :  { %v2058_v45 = vadd.f32 %v2057_v16, %v2010_v5 }
 0x320   :  { %v2060_v61 = vpop.f32.mrf.mxu3 }
 0x321   :  { %v2061_v1 = vadd.f32 %v2060_v61, %v2013_v33 }
 0x328   :  { %v2063_v24 = vpop.f32.mrf.mxu3 }
 0x329   :  { %v2064_v2 = vadd.f32 %v2063_v24, %v2016_v6 }
 0x344   :  { %v2121_v32 = vpop.f32.mrf.mxu3 }
 0x345   :  { %v2136_v29 = vadd.f32 %v2121_v32, %v2052_v28 }
 0x347   :  { %v2145_v38 = vadd.f32 %v2410_v31, %v2136_v29 }
 0x349   :  { %2150 = vst [vmem:[%s3699_s7] sm:$0xff] %v2145_v38 }
 0x34c   :  { %v2124_v36 = vpop.f32.mrf.mxu3 }
 0x34d   :  { %v2137_v54 = vadd.f32 %v2124_v36, %v2055_v40 }
 0x34f   :  { %v2146_v47 = vadd.f32 %v2410_v31, %v2137_v54 }
 0x351   :  { %2151 = vst [vmem:[%s3699_s7 + $0x8] sm:$0xff] %v2146_v47 }
 0x35c   :  { %v2127_v39 = vpop.f32.mrf.mxu3 }
 0x35d   :  { %v2138_v56 = vadd.f32 %v2127_v39, %v2058_v45 }
 0x35f   :  { %v2147_v35 = vadd.f32 %v2410_v31, %v2138_v56 }
 0x361   :  { %2152 = vst [vmem:[%s3699_s7 + $0x10] sm:$0xff] %v2147_v35 }
 0x364   :  { %v2130_v49 = vpop.f32.mrf.mxu3 }
 0x365   :  { %v2139_v58 = vadd.f32 %v2130_v49, %v2061_v1 }
 0x367   :  { %v2148_v60 = vadd.f32 %v2410_v31, %v2139_v58 }
 0x369   :  { %2153 = vst [vmem:[%s3699_s7 + $0x18] sm:$0xff] %v2148_v60 }
 0x36c   :  { %v2133_v52 = vpop.f32.mrf.mxu3 }
 0x36d   :  { %v2140_v42 = vadd.f32 %v2133_v52, %v2064_v2 }
 0x36f   :  { %v2149_v57 = vadd.f32 %v2410_v31, %v2140_v42 }
 0x371   :  { %2154 = vst [vmem:[%s3699_s7 + $0x20] sm:$0xff] %v2149_v57 }

</bundles_post_ra>
